<compile_context>
chip_gen: v7x
topology: tpu7x:2x2x1
jax: 0.10.0
libtpu: 0.0.40
codegen_flags: <defaults>
</compile_context>

<pallas_src>
import jax
import jax.numpy as jnp
from jax.experimental import pallas as pl
from jax.experimental.pallas import tpu as pltpu

IN_FEATURES = 32 * 32 * 3   # 3072
HIDDEN = 120
OUT_FEATURES = 10

HIDDEN_PAD = 128            # lane-dense hidden (120 -> 128, zero padded)
OUT_PAD = 128               # lane-dense output (10 -> 128, zero padded)


def _two_fc_kernel(x_ref, w1_ref, b1_ref, w2_ref, b2_ref, o_ref):
    # In-kernel cast: x is read from HBM exactly once (f32) and rounded to
    # bf16 on the VPU right before the MXU -- no staged bf16 copy in HBM.
    x_b = x_ref[...].astype(jnp.bfloat16)
    # fc1: bf16 operands on the MXU, f32 accumulation; bias + ReLU on the VPU.
    h = jnp.dot(x_b, w1_ref[...], preferred_element_type=jnp.float32)
    h = jnp.maximum(h + b1_ref[...], 0.0)
    # fc2: tiny (tm x 128 x 128) matmul, kept in f32 for accuracy.
    y = jnp.dot(h, w2_ref[...], preferred_element_type=jnp.float32)
    o_ref[...] = (y + b2_ref[...]).astype(o_ref.dtype)


def prepare_params(w1, b1, w2, b2):
    """One-time (load-time) weight staging: cast + zero-pad to lane-dense shapes.

    Args:
      w1: (3072, 120) float32   (transposed vs. torch's (120, 3072))
      b1: (120,)      float32
      w2: (120, 10)   float32   (transposed vs. torch's (10, 120))
      b2: (10,)       float32
    """
    w1_p = jnp.zeros((IN_FEATURES, HIDDEN_PAD), jnp.bfloat16).at[:, :HIDDEN].set(
        w1.astype(jnp.bfloat16))
    b1_p = jnp.zeros((1, HIDDEN_PAD), jnp.float32).at[:, :HIDDEN].set(
        b1.reshape(1, HIDDEN))
    w2_p = jnp.zeros((HIDDEN_PAD, OUT_PAD), jnp.float32).at[:HIDDEN, :OUT_FEATURES].set(w2)
    b2_p = jnp.zeros((1, OUT_PAD), jnp.float32).at[:, :OUT_FEATURES].set(
        b2.reshape(1, OUT_FEATURES))
    return (w1_p, b1_p, w2_p, b2_p)


def two_fc_net(x_nchw, params, *, tm=None):
    """Forward pass of TwoFcNet.

    Args:
      x_nchw: (B, 3, 32, 32) float32
      params: output of prepare_params (padded/cast weights, built once).
      tm: optional batch-tile override (multiple of 128).
    Returns:
      (B, 10) float32 logits.
    """
    w1_p, b1_p, w2_p, b2_p = params
    B = x_nchw.shape[0]
    x2d = x_nchw.reshape(B, IN_FEATURES)   # same flatten order as torch .view (no copy)

    if tm is None:
        # Aim for >=2 grid steps so v7x's dual TensorCores both get work,
        # but keep tiles >=128 rows (unmasked MXU/store path) and <=1024 rows
        # (2 double-buffered f32 x tiles = 24 MiB + ~1 MiB weights, safely
        # under v7x's 64 MiB VMEM/TC and v5e/v6e's 128 MiB).
        half = 128 * pl.cdiv(pl.cdiv(B, 2), 128)
        tm = int(min(1024, max(128, half)))
    grid_m = pl.cdiv(B, tm)

    rows = grid_m * tm   # rows of MXU work actually issued (last block is ragged)
    cost = pl.CostEstimate(
        flops=2 * rows * IN_FEATURES * HIDDEN_PAD + 2 * rows * HIDDEN_PAD * OUT_PAD,
        transcendentals=0,
        bytes_accessed=(B * IN_FEATURES * 4              # x (f32, read once)
                        + IN_FEATURES * HIDDEN_PAD * 2   # w1 (bf16)
                        + HIDDEN_PAD * OUT_PAD * 4       # w2 (f32)
                        + (HIDDEN_PAD + OUT_PAD) * 4     # biases
                        + B * OUT_PAD * 2),              # out (bf16)
    )

    out = pl.pallas_call(
        _two_fc_kernel,
        out_shape=jax.ShapeDtypeStruct((B, OUT_PAD), jnp.bfloat16),
        grid=(grid_m,),
        in_specs=[
            pl.BlockSpec((tm, IN_FEATURES), lambda i: (i, 0)),          # streamed (f32)
            pl.BlockSpec((IN_FEATURES, HIDDEN_PAD), lambda i: (0, 0)),  # resident
            pl.BlockSpec((1, HIDDEN_PAD), lambda i: (0, 0)),            # resident
            pl.BlockSpec((HIDDEN_PAD, OUT_PAD), lambda i: (0, 0)),      # resident
            pl.BlockSpec((1, OUT_PAD), lambda i: (0, 0)),               # resident
        ],
        out_specs=pl.BlockSpec((tm, OUT_PAD), lambda i: (i, 0)),
        compiler_params=pltpu.CompilerParams(
            dimension_semantics=("parallel",),   # megacore sharding on v7x
            vmem_limit_bytes=48 << 20),          # covers 2x f32 x tiles at tm=1024
        cost_estimate=cost,
    )(x2d, w1_p, b1_p, w2_p, b2_p)

    # Rows are exact (no batch padding was materialized); drop only the lane
    # padding with a cheap column slice and return f32 like the torch module.
    return out[:, :OUT_FEATURES].astype(jnp.float32)


def _init_params(key):
    """Deterministic init mimicking nn.Linear defaults (uniform +/-1/sqrt(fan_in))."""
    k1, k2, k3, k4 = jax.random.split(key, 4)
    bound1 = 1.0 / jnp.sqrt(jnp.float32(IN_FEATURES))
    bound2 = 1.0 / jnp.sqrt(jnp.float32(HIDDEN))
    w1 = jax.random.uniform(k1, (IN_FEATURES, HIDDEN), jnp.float32, -bound1, bound1)
    b1 = jax.random.uniform(k2, (HIDDEN,), jnp.float32, -bound1, bound1)
    w2 = jax.random.uniform(k3, (HIDDEN, OUT_FEATURES), jnp.float32, -bound2, bound2)
    b2 = jax.random.uniform(k4, (OUT_FEATURES,), jnp.float32, -bound2, bound2)
    return w1, b1, w2, b2


if __name__ == "__main__":
    key = jax.random.PRNGKey(0)
    k_x, k_p = jax.random.split(key)

    B = 2
    x = jax.random.normal(k_x, (B, 3, 32, 32), jnp.float32)   # NCHW, like torch
    w1, b1, w2, b2 = _init_params(k_p)

    params = prepare_params(w1, b1, w2, b2)   # hoisted out of the per-call path
    y = two_fc_net(x, params)
    y = jax.block_until_ready(y)

    # Pure-JAX reference. The kernel rounds the fc1 operands to bf16 and
    # stores the final logits as bf16, so mirror that rounding here
    # (fc2 itself stays full f32, same as in the kernel).
    x2d = x.reshape(B, IN_FEATURES)
    xr = x2d.astype(jnp.bfloat16).astype(jnp.float32)
    w1r = w1.astype(jnp.bfloat16).astype(jnp.float32)
    ref = jnp.maximum(xr @ w1r + b1, 0.0) @ w2 + b2
    ref = ref.astype(jnp.bfloat16).astype(jnp.float32)

    assert y.shape == (B, OUT_FEATURES)
    assert y.dtype == jnp.float32
    assert jnp.allclose(y, ref, atol=2e-2, rtol=2e-2), "mismatch vs reference"

    print("KERNEL_OK")
</pallas_src>

<mosaic_0001>
module attributes {stable_mosaic.version = 11 : i64} {
  func.func @_two_fc_kernel(%arg0: i32, %arg1: memref<128x3072xf32, #tpu.memory_space<vmem>>, %arg2: memref<3072x128xbf16, #tpu.memory_space<vmem>>, %arg3: memref<1x128xf32, #tpu.memory_space<vmem>>, %arg4: memref<128x128xf32, #tpu.memory_space<vmem>>, %arg5: memref<1x128xf32, #tpu.memory_space<vmem>>, %arg6: memref<128x128xbf16, #tpu.memory_space<vmem>>) attributes {dimension_semantics = [#tpu.dimension_semantics<parallel>], iteration_bounds = array<i64: 1>, scalar_prefetch = 0 : i64, scratch_operands = 0 : i64, tpu.core_type = #tpu.core_type<tc>, window_params = [{transform_indices = @transform_0, window_bounds = array<i64: 128, 3072>}, {pipeline_mode = #tpu.pipeline_mode<synchronous>, transform_indices = @transform_1, window_bounds = array<i64: 3072, 128>}, {pipeline_mode = #tpu.pipeline_mode<synchronous>, transform_indices = @transform_2, window_bounds = array<i64: 1, 128>}, {pipeline_mode = #tpu.pipeline_mode<synchronous>, transform_indices = @transform_3, window_bounds = array<i64: 128, 128>}, {pipeline_mode = #tpu.pipeline_mode<synchronous>, transform_indices = @transform_4, window_bounds = array<i64: 1, 128>}, {transform_indices = @transform_5, window_bounds = array<i64: 128, 128>}]} {
    %c0 = arith.constant 0 : index
    %c0_0 = arith.constant 0 : index
    %0 = vector.load %arg1[%c0, %c0_0] : memref<128x3072xf32, #tpu.memory_space<vmem>>, vector<128x3072xf32>
    %1 = arith.truncf %0 : vector<128x3072xf32> to vector<128x3072xbf16>
    %c0_1 = arith.constant 0 : index
    %c0_2 = arith.constant 0 : index
    %2 = vector.load %arg2[%c0_1, %c0_2] : memref<3072x128xbf16, #tpu.memory_space<vmem>>, vector<3072x128xbf16>
    %cst = arith.constant dense<0.000000e+00> : vector<128x128xf32>
    %3 = tpu.matmul %1, %2, %cst {dimension_numbers = #tpu.dot_dimension_numbers<[1], [0], [0], [1], [0, 0, 1, 1], [], []>} : vector<128x3072xbf16>, vector<3072x128xbf16>, vector<128x128xf32> -> vector<128x128xf32>
    %c0_3 = arith.constant 0 : index
    %c0_4 = arith.constant 0 : index
    %4 = vector.load %arg3[%c0_3, %c0_4] : memref<1x128xf32, #tpu.memory_space<vmem>>, vector<1x128xf32>
    %5 = vector.broadcast %4 : vector<1x128xf32> to vector<128x128xf32>
    %6 = arith.addf %3, %5 : vector<128x128xf32>
    %cst_5 = arith.constant 0.000000e+00 : f32
    %7 = vector.broadcast %cst_5 : f32 to vector<128x128xf32>
    %8 = arith.maximumf %6, %7 : vector<128x128xf32>
    %c0_6 = arith.constant 0 : index
    %c0_7 = arith.constant 0 : index
    %9 = vector.load %arg4[%c0_6, %c0_7] : memref<128x128xf32, #tpu.memory_space<vmem>>, vector<128x128xf32>
    %cst_8 = arith.constant dense<0.000000e+00> : vector<128x128xf32>
    %10 = tpu.matmul %8, %9, %cst_8 {dimension_numbers = #tpu.dot_dimension_numbers<[1], [0], [0], [1], [0, 0, 1, 1], [], []>} : vector<128x128xf32>, vector<128x128xf32>, vector<128x128xf32> -> vector<128x128xf32>
    %c0_9 = arith.constant 0 : index
    %c0_10 = arith.constant 0 : index
    %11 = vector.load %arg5[%c0_9, %c0_10] : memref<1x128xf32, #tpu.memory_space<vmem>>, vector<1x128xf32>
    %12 = vector.broadcast %11 : vector<1x128xf32> to vector<128x128xf32>
    %13 = arith.addf %10, %12 : vector<128x128xf32>
    %14 = arith.truncf %13 : vector<128x128xf32> to vector<128x128xbf16>
    %c0_11 = arith.constant 0 : index
    %c0_12 = arith.constant 0 : index
    %15 = vector.load %arg6[%c0_11, %c0_12] : memref<128x128xbf16, #tpu.memory_space<vmem>>, vector<128x128xbf16>
    tpu.vector_store %arg6[%c0_11, %c0_12], %14 {strides = array<i32>} : memref<128x128xbf16, #tpu.memory_space<vmem>>, vector<128x128xbf16>,
    return
  }
  func.func @transform_0(%arg0: i32) -> (i32, i32) {
    %c0_i32 = arith.constant 0 : i32
    %c0_i32_0 = arith.constant 0 : i32
    return %arg0, %c0_i32 : i32, i32
  }
  func.func @transform_1(%arg0: i32) -> (i32, i32) {
    %c0_i32 = arith.constant 0 : i32
    %c0_i32_0 = arith.constant 0 : i32
    %c0_i32_1 = arith.constant 0 : i32
    return %c0_i32, %c0_i32_0 : i32, i32
  }
  func.func @transform_2(%arg0: i32) -> (i32, i32) {
    %c0_i32 = arith.constant 0 : i32
    %c0_i32_0 = arith.constant 0 : i32
    %c0_i32_1 = arith.constant 0 : i32
    return %c0_i32, %c0_i32_0 : i32, i32
  }
  func.func @transform_3(%arg0: i32) -> (i32, i32) {
    %c0_i32 = arith.constant 0 : i32
    %c0_i32_0 = arith.constant 0 : i32
    %c0_i32_1 = arith.constant 0 : i32
    return %c0_i32, %c0_i32_0 : i32, i32
  }
  func.func @transform_4(%arg0: i32) -> (i32, i32) {
    %c0_i32 = arith.constant 0 : i32
    %c0_i32_0 = arith.constant 0 : i32
    %c0_i32_1 = arith.constant 0 : i32
    return %c0_i32, %c0_i32_0 : i32, i32
  }
  func.func @transform_5(%arg0: i32) -> (i32, i32) {
    %c0_i32 = arith.constant 0 : i32
    %c0_i32_0 = arith.constant 0 : i32
    return %arg0, %c0_i32 : i32, i32
  }
}

</mosaic_0001>

<bundles_post_ra>
// kernel: tpu_custom_call.1
= control target key start
LH: loop header
LB: loop body
LE: loop exit
PB: predicated region body
PF: predicated region fallthrough
CT: control target
= control target key end

     0   :  { %10 = vsyncpa [#allocation3], 0  ;;  %s11328_s0 = inlined_call_operand.hbm [shape: f32[2,3072], index: 0, kind: input, shape index: {}]   ;;  %s11329_s1 = inlined_call_operand.hbm [shape: bf16[3072,128], index: 1, kind: input, shape index: {}]   ;;  %s11330_s2 = inlined_call_operand.vmem [shape: f32[1,128], index: 2, kind: input, shape index: {}]   ;;  %s11331_s3 = inlined_call_operand.hbm [shape: f32[128,128], index: 3, kind: input, shape index: {}]   ;;  %s11332_s4 = inlined_call_operand.vmem [shape: f32[1,128], index: 4, kind: input, shape index: {}]   ;;  %s11333_s5 = inlined_call_operand.hbm [shape: bf16[2,128], index: 5, kind: output, shape index: {}]  }
   0x1   :  { %11 = vsyncpa [#allocation6], 0 }
   0x2   :  { %12 = vsyncpa [#allocation4], 0 }
   0x3   :  { %17 = vsyncadd [#allocation3], 48384  ;;  %s10322_s18 = smov [#allocation5]   ;;  %s10228_s22 = scalar_lea.hbm %s11329_s1, 24576 }
   0x4   :  { %s30_s19 = sshll.u32 %s10322_s18, 4  ;;  %p10229_p0 = scmp.ne.s32.totalorder %s11329_s1, %s10228_s22  ;;  %s31_s19 = int_to_ptr.vmem [resolvable:$true] %s30_s19 }
   0x5   :  { %p10232_p1 = scmp.lt.u32.totalorder %s10228_s22, %s11329_s1 }
   0x7   :  { %p10234_p2 = pnand %p10232_p1, %p10229_p0 }
   0x9   :  { %10237 = shalt.err (!%p10234_p2)
}
   0xa   :  { %s10238_s27 = scalar_lea.vmem %s31_s19, 24576  ;;  %p10243_p4 = scmp.lt.s32.totalorder %s31_s19, %s31_s19 }
   0xb   :  { %p10239_p3 = scmp.ne.s32.totalorder %s31_s19, %s10238_s27  ;;  %p10244_p5 = scmp.lt.s32.totalorder %s10238_s27, %s10238_s27 }
   0xd   :  { %p10245_p6 = por %p10244_p5, %p10243_p4 }
   0xf   :  { %p10246_p7 = pnand %p10245_p6, %p10239_p3 }
  0x11   :  { %10249 = shalt.err (!%p10246_p7)
}
  0x12   :  { %s10323_s28 = smov 64   ;;  %s10324_s29 = smov 4  }
  0x13   :  { %36 = dma.hbm_to_vmem [thread:$0]  %s11329_s1, 24576, %s31_s19, [#allocation6], %s10323_s28, %s10323_s28, %s10324_s29  }
  0x14   :  { %s10325_s7 = smov [#allocation2]   ;;  %s10250_s11 = scalar_lea.hbm %s11328_s0, 768 }
  0x15   :  { %s18_s8 = sshll.u32 %s10325_s7, 4  ;;  %p10251_p8 = scmp.ne.s32.totalorder %s11328_s0, %s10250_s11  ;;  %s19_s8 = int_to_ptr.vmem [resolvable:$true] %s18_s8 }
  0x16   :  { %p10254_p9 = scmp.lt.u32.totalorder %s10250_s11, %s11328_s0 }
  0x18   :  { %p10256_p10 = pnand %p10254_p9, %p10251_p8 }
  0x1a   :  { %10259 = shalt.err (!%p10256_p10)
}
  0x1b   :  { %s10260_s16 = scalar_lea.vmem %s19_s8, 768  ;;  %s10264_s1 = scalar_lea.vmem %s19_s8, 49152 }
  0x1c   :  { %p10261_p11 = scmp.ne.s32.totalorder %s19_s8, %s10260_s16  ;;  %p10265_p12 = scmp.lt.s32.totalorder %s19_s8, %s19_s8 }
  0x1d   :  { %p10266_p13 = scmp.lt.s32.totalorder %s10264_s1, %s10260_s16 }
  0x1f   :  { %p10267_p0 = por %p10266_p13, %p10265_p12 }
  0x21   :  { %p10268_p1 = pnand %p10267_p0, %p10261_p11 }
  0x23   :  { %10271 = shalt.err (!%p10268_p1)
}
  0x24   :  { %s10326_s17 = smov 768   ;;  %s10327_s18 = smov 48  }
  0x25   :  { %24 = dma.hbm_to_vmem [thread:$0]  %s11328_s0, 768, %s19_s8, [#allocation3], %s10326_s17, %s10326_s17, %s10327_s18  }
  0x26   :  { %s10328_s21 = smov [#allocation7]   ;;  %s10272_s25 = scalar_lea.hbm %s11331_s3, 2048 }
  0x27   :  { %s44_s22 = sshll.u32 %s10328_s21, 4  ;;  %p10273_p2 = scmp.ne.s32.totalorder %s11331_s3, %s10272_s25  ;;  %s45_s22 = int_to_ptr.vmem [resolvable:$true] %s44_s22 }
  0x28   :  { %p10276_p3 = scmp.lt.u32.totalorder %s10272_s25, %s11331_s3 }
  0x2a   :  { %p10278_p4 = pnand %p10276_p3, %p10273_p2 }
  0x2c   :  { %10281 = shalt.err (!%p10278_p4)
}
  0x2d   :  { %s10282_s30 = scalar_lea.vmem %s45_s22, 2048  ;;  %p10287_p6 = scmp.lt.s32.totalorder %s45_s22, %s45_s22 }
  0x2e   :  { %p10283_p5 = scmp.ne.s32.totalorder %s45_s22, %s10282_s30  ;;  %p10288_p7 = scmp.lt.s32.totalorder %s10282_s30, %s10282_s30 }
  0x30   :  { %p10289_p8 = por %p10288_p7, %p10287_p6 }
  0x32   :  { %p10290_p9 = pnand %p10289_p8, %p10283_p5 }
  0x34   :  { %10293 = shalt.err (!%p10290_p9)
}
  0x35   :  { %s10329_s0 = smov 128   ;;  %s10330_s6 = smov 8  }
  0x36   :  { %50 = dma.hbm_to_vmem [thread:$0]  %s11331_s3, 2048, %s45_s22, [#allocation6], %s10329_s0, %s10329_s0, %s10330_s6  }
  0x37   :  { %10316 = dma.done.wait [#allocation3], 49152  }
  0x38   :  { %10317 = vsyncadd [#allocation3], 4294918144 }
  0x39   :  { %10318 = dma.done.wait [#allocation6], 26624  }
  0x3a   :  { %10319 = vsyncadd [#allocation6], 4294940672  ;;  %v9460_v0 = vld [vmem:[#allocation5 + $0x40] sm:$0xff]   ;;  %v9464_v4 = vld [vmem:[#allocation5 + $0x48] sm:$0xff]   ;;  %v10331_v25 = vmov 1983009808   ;;  %v838_v27 = vlaneseq }
  0x3b   :  { %v9461_v1 = vld [vmem:[#allocation5 + $0xc0] sm:$0xff]   ;;  %8542 = vmatprep.subr.bf16.mxu0 %v9460_v0  ;;  %v9465_v5 = vld [vmem:[#allocation5 + $0xc8] sm:$0xff]   ;;  %v9468_v8 = vld [vmem:[#allocation5 + $0x50] sm:$0xff]   ;;  %v836_v26 = vunpack.c.l.s4 %v10331_v25 }
  0x3c   :  { %v9462_v2 = vld [vmem:[#allocation5] sm:$0xff]   ;;  %8606 = vmatprep.subr.bf16.mxu1 %v9461_v1  ;;  %v9466_v6 = vld [vmem:[#allocation5 + $0x8] sm:$0xff]   ;;  %v9469_v9 = vld [vmem:[#allocation5 + $0xd0] sm:$0xff]   ;;  %v10402_v33 = vshrl.u32 %v838_v27, 7 }
  0x3d   :  { %v9463_v3 = vld [vmem:[#allocation5 + $0x80] sm:$0xff]   ;;  %8543 = vmatpush3.bf16.msra.mxu0 %v9462_v2  ;;  %v9467_v7 = vld [vmem:[#allocation5 + $0x88] sm:$0xff]   ;;  %v9470_v10 = vld [vmem:[#allocation5 + $0x10] sm:$0xff]   ;;  %v837_v32 = vunpack.c.0.s8 %v836_v26 }
  0x3e   :  { %8607 = vmatpush3.bf16.msra.mxu1 %v9463_v3  ;;  %8544 = vmatprep.subr.bf16.mxu0 %v9464_v4  ;;  %v9471_v11 = vld [vmem:[#allocation5 + $0x90] sm:$0xff]   ;;  %v9472_v12 = vld [vmem:[#allocation5 + $0x58] sm:$0xff]   ;;  %v9476_v16 = vld [vmem:[#allocation5 + $0x60] sm:$0xff]  }
  0x3f   :  { %8608 = vmatprep.subr.bf16.mxu1 %v9465_v5  ;;  %v9473_v13 = vld [vmem:[#allocation5 + $0xd8] sm:$0xff]   ;;  %v9477_v17 = vld [vmem:[#allocation5 + $0xe0] sm:$0xff]   ;;  %v9480_v20 = vld [vmem:[#allocation5 + $0x68] sm:$0xff]   ;;  %v10405_v37 = vsub.s32 %v837_v32, %v10402_v33 }
  0x40   :  { %v9474_v14 = vld [vmem:[#allocation5 + $0x18] sm:$0xff]   ;;  %v9478_v18 = vld [vmem:[#allocation5 + $0x20] sm:$0xff]   ;;  %v9481_v21 = vld [vmem:[#allocation5 + $0xe8] sm:$0xff]  }
  0x41   :  { %8545 = vmatpush3.bf16.msra.mxu0 %v9466_v6  ;;  %v9475_v15 = vld [vmem:[#allocation5 + $0x98] sm:$0xff]   ;;  %v9479_v19 = vld [vmem:[#allocation5 + $0xa0] sm:$0xff]   ;;  %v9482_v22 = vld [vmem:[#allocation5 + $0x28] sm:$0xff]  }
  0x42   :  { %8609 = vmatpush3.bf16.msra.mxu1 %v9467_v7  ;;  %8546 = vmatprep.subr.bf16.mxu0 %v9468_v8  ;;  %v9483_v23 = vld [vmem:[#allocation5 + $0xa8] sm:$0xff]   ;;  %v9484_v24 = vld [vmem:[#allocation5 + $0x70] sm:$0xff]   ;;  %v9488_v31 = vld [vmem:[#allocation5 + $0x78] sm:$0xff]  }
  0x43   :  { %8610 = vmatprep.subr.bf16.mxu1 %v9469_v9  ;;  %v9485_v28 = vld [vmem:[#allocation5 + $0xf0] sm:$0xff]   ;;  %v9489_v34 = vld [vmem:[#allocation5 + $0xf8] sm:$0xff]   ;;  %v9504_v53 = vld [vmem:[#allocation5 + $0x140] sm:$0xff]  }
  0x44   :  { %v9486_v29 = vld [vmem:[#allocation5 + $0x30] sm:$0xff]   ;;  %v9490_v35 = vld [vmem:[#allocation5 + $0x38] sm:$0xff]   ;;  %v9505_v58 = vld [vmem:[#allocation5 + $0x100] sm:$0xff]  }
  0x45   :  { %8547 = vmatpush3.bf16.msra.mxu0 %v9470_v10  ;;  %v9487_v30 = vld [vmem:[#allocation5 + $0xb0] sm:$0xff]   ;;  %v9491_v36 = vld [vmem:[#allocation5 + $0xb8] sm:$0xff]   ;;  %v9506_v62 = vld [vmem:[#allocation5 + $0x1c0] sm:$0xff]  }
  0x46   :  { %8611 = vmatpush3.bf16.msra.mxu1 %v9471_v11  ;;  %8548 = vmatprep.subr.bf16.mxu0 %v9472_v12  ;;  %v9492_v38 = vld [vmem:[#allocation2] ss:$48 sps:$4 sm:$0xff]   ;;  %v9500_v43 = vld [vmem:[#allocation2 + $0x4] ss:$48 sps:$4 sm:$0xff]   ;;  %v9521_v25 = vld [vmem:[#allocation5 + $0x108] sm:$0xff]  }
  0x47   :  { %8612 = vmatprep.subr.bf16.mxu1 %v9473_v13  ;;  %v9494_v39 = vld [vmem:[#allocation2 + $0x60] ss:$48 sps:$4 sm:$0xff]   ;;  %v841_v42 = vrot.slane %v9492_v38, %v10405_v37  ;;  %v9501_v44 = vld [vmem:[#allocation2 + $0x64] ss:$48 sps:$4 sm:$0xff]   ;;  %v848_v50 = vrot.slane %v9500_v43, %v10405_v37 }
  0x48   :  { %v9496_v40 = vld [vmem:[#allocation2 + $0xc0] ss:$48 sps:$4 sm:$0xff]   ;;  %v9502_v45 = vld [vmem:[#allocation2 + $0xc4] ss:$48 sps:$4 sm:$0xff]   ;;  %v855_v46 = vrot.slane %v9494_v39, %v10405_v37  ;;  %v862_v51 = vrot.slane %v9501_v44, %v10405_v37 }
  0x49   :  { %8549 = vmatpush3.bf16.msra.mxu0 %v9474_v14  ;;  %v9498_v41 = vld [vmem:[#allocation2 + $0x120] ss:$48 sps:$4 sm:$0xff]   ;;  %v1057_v47 = vrot.slane %v9496_v40, %v10405_v37  ;;  %v9503_v49 = vld [vmem:[#allocation2 + $0x124] ss:$48 sps:$4 sm:$0xff]   ;;  %v1064_v52 = vrot.slane %v9502_v45, %v10405_v37 }
  0x4a   :  { %8613 = vmatpush3.bf16.msra.mxu1 %v9475_v15  ;;  %8550 = vmatprep.subr.bf16.mxu0 %v9476_v16  ;;  %v1071_v48 = vrot.slane %v9498_v41, %v10405_v37  ;;  %v864_v54 = vcombine.high %v841_v42, %v855_v46  ;;  %v1078_v56 = vrot.slane %v9503_v49, %v10405_v37  ;;  %v9507_v2 = vld [vmem:[#allocation5 + $0x180] sm:$0xff]  }
  0x4b   :  { %8614 = vmatprep.subr.bf16.mxu1 %v9477_v17  ;;  %v863_v57 = vcombine.low %v841_v42, %v855_v46  ;;  %v866_v59 = vcombine.high %v848_v50, %v862_v51  ;;  %v865_v61 = vcombine.low %v848_v50, %v862_v51  ;;  %v9508_v6 = vld [vmem:[#allocation2 + $0x180] ss:$48 sps:$4 sm:$0xff]   ;;  %v9516_v10 = vld [vmem:[#allocation2 + $0x184] ss:$48 sps:$4 sm:$0xff]  }
  0x4c   :  { %v1080_v55 = vcombine.high %v1057_v47, %v1071_v48  ;;  %v1079_v60 = vcombine.low %v1057_v47, %v1071_v48  ;;  %v1082_v0 = vcombine.high %v1064_v52, %v1078_v56  ;;  %v1081_v1 = vcombine.low %v1064_v52, %v1078_v56  ;;  %v9510_v7 = vld [vmem:[#allocation2 + $0x1e0] ss:$48 sps:$4 sm:$0xff]   ;;  %v9517_v11 = vld [vmem:[#allocation2 + $0x1e4] ss:$48 sps:$4 sm:$0xff]  }
  0x4d   :  { %8551 = vmatpush3.bf16.msra.mxu0 %v9478_v18  ;;  %v9512_v8 = vld [vmem:[#allocation2 + $0x240] ss:$48 sps:$4 sm:$0xff]   ;;  %v1273_v12 = vrot.slane %v9508_v6, %v10405_v37  ;;  %v1287_v13 = vrot.slane %v9510_v7, %v10405_v37  ;;  %v9518_v15 = vld [vmem:[#allocation2 + $0x244] ss:$48 sps:$4 sm:$0xff]   ;;  %v1280_v18 = vrot.slane %v9516_v10, %v10405_v37 }
  0x4e   :  { %8615 = vmatpush3.bf16.msra.mxu1 %v9479_v19  ;;  %8552 = vmatprep.subr.bf16.mxu0 %v9480_v20  ;;  %v4672_v63 = vpack.c.bf16 %v1080_v55, %v864_v54  ;;  %v4671_v3 = vpack.c.bf16 %v1079_v60, %v863_v57  ;;  %v4674_v4 = vpack.c.bf16 %v1082_v0, %v866_v59  ;;  %v9514_v9 = vld [vmem:[#allocation2 + $0x2a0] ss:$48 sps:$4 sm:$0xff]   ;;  %v9519_v16 = vld [vmem:[#allocation2 + $0x2a4] ss:$48 sps:$4 sm:$0xff]   ;;  %v9520_v20 = vld [vmem:[#allocation5 + $0x148] sm:$0xff]  }
  0x4f   :  { %8616 = vmatprep.subr.bf16.mxu1 %v9481_v21  ;;  %v4673_v5 = vpack.c.bf16 %v1081_v1, %v865_v61  ;;  %v1489_v14 = vrot.slane %v9512_v8, %v10405_v37  ;;  %v1503_v17 = vrot.slane %v9514_v9, %v10405_v37  ;;  %v1294_v19 = vrot.slane %v9517_v11, %v10405_v37  ;;  %v9524_v40 = vld [vmem:[#allocation2 + $0x300] ss:$48 sps:$4 sm:$0xff]   ;;  %v9532_v44 = vld [vmem:[#allocation2 + $0x304] ss:$48 sps:$4 sm:$0xff]  }
  0x50   :  { %6438 = vmatprep.mubr.bf16.mxu0 %v4672_v63  ;;  %6535 = vmatprep.mubr.bf16.mxu1 %v4674_v4  ;;  %v1296_v21 = vcombine.high %v1273_v12, %v1287_v13  ;;  %v9526_v41 = vld [vmem:[#allocation2 + $0x360] ss:$48 sps:$4 sm:$0xff]   ;;  %v1705_v45 = vrot.slane %v9524_v40, %v10405_v37  ;;  %v9533_v47 = vld [vmem:[#allocation2 + $0x364] ss:$48 sps:$4 sm:$0xff]   ;;  %v1712_v52 = vrot.slane %v9532_v44, %v10405_v37 }
  0x51   :  { %8553 = vmatpush3.bf16.msra.mxu0 %v9482_v22  ;;  %v1496_v22 = vrot.slane %v9518_v15, %v10405_v37  ;;  %v1512_v26 = vcombine.high %v1489_v14, %v1503_v17  ;;  %v1298_v27 = vcombine.high %v1280_v18, %v1294_v19  ;;  %v9528_v42 = vld [vmem:[#allocation2 + $0x3c0] ss:$48 sps:$4 sm:$0xff]   ;;  %v1719_v46 = vrot.slane %v9526_v41, %v10405_v37  ;;  %v9534_v48 = vld [vmem:[#allocation2 + $0x3c4] ss:$48 sps:$4 sm:$0xff]  }
  0x52   :  { %8617 = vmatpush3.bf16.msra.mxu1 %v9483_v23  ;;  %8554 = vmatprep.subr.bf16.mxu0 %v9484_v24  ;;  %v1510_v23 = vrot.slane %v9519_v16, %v10405_v37  ;;  %v1295_v24 = vcombine.low %v1273_v12, %v1287_v13  ;;  %v9530_v43 = vld [vmem:[#allocation2 + $0x420] ss:$48 sps:$4 sm:$0xff]   ;;  %v9535_v49 = vld [vmem:[#allocation2 + $0x424] ss:$48 sps:$4 sm:$0xff]   ;;  %v1921_v50 = vrot.slane %v9528_v42, %v10405_v37 }
  0x53   :  { %8618 = vmatprep.subr.bf16.mxu1 %v9485_v28  ;;  %v1511_v28 = vcombine.low %v1489_v14, %v1503_v17  ;;  %v1935_v51 = vrot.slane %v9530_v43, %v10405_v37  ;;  %v1728_v54 = vcombine.high %v1705_v45, %v1719_v46  ;;  %v1726_v55 = vrot.slane %v9533_v47, %v10405_v37  ;;  %v9540_v8 = vld [vmem:[#allocation2 + $0x480] ss:$48 sps:$4 sm:$0xff]   ;;  %v9548_v13 = vld [vmem:[#allocation2 + $0x484] ss:$48 sps:$4 sm:$0xff]  }
  0x54   :  { %v1513_v32 = vcombine.low %v1496_v22, %v1510_v23  ;;  %v1928_v56 = vrot.slane %v9534_v48, %v10405_v37  ;;  %v1942_v57 = vrot.slane %v9535_v49, %v10405_v37  ;;  %v1727_v60 = vcombine.low %v1705_v45, %v1719_v46  ;;  %v9542_v9 = vld [vmem:[#allocation2 + $0x4e0] ss:$48 sps:$4 sm:$0xff]   ;;  %v9549_v14 = vld [vmem:[#allocation2 + $0x4e4] ss:$48 sps:$4 sm:$0xff]  }
  0x55   :  { %8555 = vmatpush3.bf16.msra.mxu0 %v9486_v29  ;;  %v1297_v29 = vcombine.low %v1280_v18, %v1294_v19  ;;  %v1944_v59 = vcombine.high %v1921_v50, %v1935_v51  ;;  %v1943_v61 = vcombine.low %v1921_v50, %v1935_v51  ;;  %v1730_v63 = vcombine.high %v1712_v52, %v1726_v55  ;;  %v9544_v10 = vld [vmem:[#allocation2 + $0x540] ss:$48 sps:$4 sm:$0xff]   ;;  %v9550_v15 = vld [vmem:[#allocation2 + $0x544] ss:$48 sps:$4 sm:$0xff]  }
  0x56   :  { %8619 = vmatpush3.bf16.msra.mxu1 %v9487_v30  ;;  %8556 = vmatprep.subr.bf16.mxu0 %v9488_v31  ;;  %v9522_v30 = vld [vmem:[#allocation5 + $0x1c8] sm:$0xff]   ;;  %v1514_v31 = vcombine.high %v1496_v22, %v1510_v23  ;;  %v1946_v0 = vcombine.high %v1928_v56, %v1942_v57  ;;  %v1729_v1 = vcombine.low %v1712_v52, %v1726_v55  ;;  %v9546_v11 = vld [vmem:[#allocation2 + $0x5a0] ss:$48 sps:$4 sm:$0xff]   ;;  %v9551_v19 = vld [vmem:[#allocation2 + $0x5a4] ss:$48 sps:$4 sm:$0xff]  }
  0x57   :  { %8620 = vmatprep.subr.bf16.mxu1 %v9489_v34  ;;  %v9523_v34 = vld [vmem:[#allocation5 + $0x188] sm:$0xff]   ;;  %v4697_v39 = vpack.c.bf16 %v1513_v32, %v1297_v29  ;;  %v4720_v4 = vpack.c.bf16 %v1944_v59, %v1728_v54  ;;  %v2137_v12 = vrot.slane %v9540_v8, %v10405_v37  ;;  %v2151_v16 = vrot.slane %v9542_v9, %v10405_v37  ;;  %v9552_v23 = vld [vmem:[#allocation5 + $0x158] sm:$0xff]   ;;  %v9556_v42 = vld [vmem:[#allocation2 + $0x600] ss:$48 sps:$4 sm:$0xff]  }
  0x58   :  { %v4698_v38 = vpack.c.bf16 %v1514_v31, %v1298_v27  ;;  %v4722_v6 = vpack.c.bf16 %v1946_v0, %v1730_v63  ;;  %v2353_v17 = vrot.slane %v9544_v10, %v10405_v37  ;;  %v2367_v18 = vrot.slane %v9546_v11, %v10405_v37  ;;  %v9554_v32 = vld [vmem:[#allocation5 + $0x1d8] sm:$0xff]   ;;  %v9558_v43 = vld [vmem:[#allocation2 + $0x660] ss:$48 sps:$4 sm:$0xff]   ;;  %v9564_v46 = vld [vmem:[#allocation2 + $0x604] ss:$48 sps:$4 sm:$0xff]  }
  0x59   :  { %8557 = vmatpush3.bf16.msra.mxu0 %v9490_v35  ;;  %v4696_v35 = vpack.c.bf16 %v1512_v26, %v1296_v21  ;;  %v2158_v21 = vrot.slane %v9549_v14, %v10405_v37  ;;  %v2360_v22 = vrot.slane %v9550_v15, %v10405_v37  ;;  %v2374_v26 = vrot.slane %v9551_v19, %v10405_v37  ;;  %v9560_v44 = vld [vmem:[#allocation2 + $0x6c0] ss:$48 sps:$4 sm:$0xff]   ;;  %v9565_v47 = vld [vmem:[#allocation2 + $0x664] ss:$48 sps:$4 sm:$0xff]  }
  0x5a   :  { %8621 = vmatpush3.bf16.msra.mxu1 %v9491_v36  ;;  %8670 = vmatprep.subr.bf16.mxu0 %v9504_v53  ;;  %v4695_v36 = vpack.c.bf16 %v1511_v28, %v1295_v24  ;;  %v9536_v53 = vld [vmem:[#allocation5 + $0x150] sm:$0xff]   ;;  %v2160_v24 = vcombine.high %v2137_v12, %v2151_v16  ;;  %v2159_v27 = vcombine.low %v2137_v12, %v2151_v16  ;;  %v9553_v28 = vld [vmem:[#allocation5 + $0x118] sm:$0xff]  }
  0x5b   :  { %8734 = vmatprep.subr.bf16.mxu1 %v9506_v62  ;;  %v9538_v62 = vld [vmem:[#allocation5 + $0x1d0] sm:$0xff]   ;;  %v2569_v48 = vrot.slane %v9556_v42, %v10405_v37  ;;  %v2583_v49 = vrot.slane %v9558_v43, %v10405_v37  ;;  %v2785_v50 = vrot.slane %v9560_v44, %v10405_v37  ;;  %v2576_v54 = vrot.slane %v9564_v46, %v10405_v37 }
  0x5c   :  { %6439 = vmatmul.mubr.bf16.vlgmr.msra.gmra.mrb[0].mxu0 %v4671_v3  ;;  %v9539_v3 = vld [vmem:[#allocation5 + $0x190] sm:$0xff]   ;;  %v2590_v55 = vrot.slane %v9565_v47, %v10405_v37 }
  0x5d   :  { %8671 = vmatpush3.bf16.msra.mxu0 %v9505_v58  ;;  %6536 = vmatmul.mubr.bf16.vlgmr.msra.gmra.mrb[0].mxu1 %v4673_v5  ;;  %v9537_v58 = vld [vmem:[#allocation5 + $0x110] sm:$0xff]   ;;  %v4719_v5 = vpack.c.bf16 %v1943_v61, %v1727_v60  ;;  %v2591_v60 = vcombine.low %v2569_v48, %v2583_v49  ;;  %v9569_v61 = vld [vmem:[#allocation5 + $0x120] sm:$0xff]  }
  0x5e   :  { %8735 = vmatpush3.bf16.msra.mxu1 %v9507_v2  ;;  %8672 = vmatprep.subr.bf16.mxu0 %v9520_v20  ;;  %v1945_v2 = vcombine.low %v1928_v56, %v1942_v57  ;;  %v2144_v20 = vrot.slane %v9548_v13, %v10405_v37  ;;  %v9562_v45 = vld [vmem:[#allocation2 + $0x720] ss:$48 sps:$4 sm:$0xff]   ;;  %v9566_v51 = vld [vmem:[#allocation2 + $0x6c4] ss:$48 sps:$4 sm:$0xff]   ;;  %v2592_v57 = vcombine.high %v2569_v48, %v2583_v49 }
  0x5f   :  { %8736 = vmatprep.subr.bf16.mxu1 %v9522_v30  ;;  %6446 = vmatprep.mubr.bf16.mxu0 %v4696_v35  ;;  %v2375_v30 = vcombine.low %v2353_v17, %v2367_v18  ;;  %v2378_v35 = vcombine.high %v2360_v22, %v2374_v26  ;;  %v9567_v52 = vld [vmem:[#allocation2 + $0x724] ss:$48 sps:$4 sm:$0xff]   ;;  %v2594_v63 = vcombine.high %v2576_v54, %v2590_v55  ;;  %v9572_v10 = vld [vmem:[#allocation2 + $0x780] ss:$48 sps:$4 sm:$0xff]  }
  0x60   :  { %6543 = vmatprep.mubr.bf16.mxu1 %v4698_v38  ;;  %v4721_v7 = vpack.c.bf16 %v1945_v2, %v1729_v1  ;;  %v2162_v29 = vcombine.high %v2144_v20, %v2158_v21  ;;  %v2161_v31 = vcombine.low %v2144_v20, %v2158_v21  ;;  %v9555_v38 = vld [vmem:[#allocation5 + $0x198] sm:$0xff]   ;;  %v9568_v56 = vld [vmem:[#allocation5 + $0x160] sm:$0xff]   ;;  %v2806_v59 = vrot.slane %v9567_v52, %v10405_v37 }
  0x61   :  { %8673 = vmatpush3.bf16.msra.mxu0 %v9521_v25  ;;  %v2376_v25 = vcombine.high %v2353_v17, %v2367_v18  ;;  %v2593_v1 = vcombine.low %v2576_v54, %v2590_v55  ;;  %v9570_v2 = vld [vmem:[#allocation5 + $0x1e0] sm:$0xff]   ;;  %v3001_v15 = vrot.slane %v9572_v10, %v10405_v37 }
  0x62   :  { %8737 = vmatpush3.bf16.msra.mxu1 %v9523_v34  ;;  %8674 = vmatprep.subr.bf16.mxu0 %v9536_v53  ;;  %v4746_v40 = vpack.c.bf16 %v2378_v35, %v2162_v29  ;;  %v2799_v53 = vrot.slane %v9562_v45, %v10405_v37  ;;  %v9574_v11 = vld [vmem:[#allocation2 + $0x7e0] ss:$48 sps:$4 sm:$0xff]   ;;  %v9580_v14 = vld [vmem:[#allocation2 + $0x784] ss:$48 sps:$4 sm:$0xff]  }
  0x63   :  { %8738 = vmatprep.subr.bf16.mxu1 %v9538_v62  ;;  %v4744_v34 = vpack.c.bf16 %v2376_v25, %v2160_v24  ;;  %v9576_v12 = vld [vmem:[#allocation2 + $0x840] ss:$48 sps:$4 sm:$0xff]   ;;  %v3015_v16 = vrot.slane %v9574_v11, %v10405_v37  ;;  %v9581_v17 = vld [vmem:[#allocation2 + $0x7e4] ss:$48 sps:$4 sm:$0xff]  }
  0x64   :  { %6447 = vmatmul.mubr.bf16.gmra.mrb[4].mxu0 %v4695_v36  ;;  %v2377_v36 = vcombine.low %v2360_v22, %v2374_v26  ;;  %v2808_v62 = vcombine.high %v2785_v50, %v2799_v53  ;;  %v2807_v0 = vcombine.low %v2785_v50, %v2799_v53  ;;  %v9578_v13 = vld [vmem:[#allocation2 + $0x8a0] ss:$48 sps:$4 sm:$0xff]   ;;  %v9582_v18 = vld [vmem:[#allocation2 + $0x844] ss:$48 sps:$4 sm:$0xff]   ;;  %v3217_v20 = vrot.slane %v9576_v12, %v10405_v37 }
  0x65   :  { %6544 = vmatmul.mubr.bf16.gmra.mrb[4].mxu1 %v4697_v39  ;;  %8675 = vmatpush3.bf16.msra.mxu0 %v9537_v58  ;;  %v4743_v39 = vpack.c.bf16 %v2375_v30, %v2159_v27  ;;  %v2792_v58 = vrot.slane %v9566_v51, %v10405_v37  ;;  %v9583_v19 = vld [vmem:[#allocation2 + $0x8a4] ss:$48 sps:$4 sm:$0xff]   ;;  %v3231_v21 = vrot.slane %v9578_v13, %v10405_v37  ;;  %v9588_v44 = vld [vmem:[#allocation2 + $0x900] ss:$48 sps:$4 sm:$0xff]  }
  0x66   :  { %8739 = vmatpush3.bf16.msra.mxu1 %v9539_v3  ;;  %6454 = vmatprep.mubr.bf16.mxu0 %v4720_v4  ;;  %v4745_v41 = vpack.c.bf16 %v2377_v36, %v2161_v31  ;;  %v3008_v22 = vrot.slane %v9580_v14, %v10405_v37  ;;  %v3024_v24 = vcombine.high %v3001_v15, %v3015_v16  ;;  %v9590_v45 = vld [vmem:[#allocation2 + $0x960] ss:$48 sps:$4 sm:$0xff]   ;;  %v9596_v49 = vld [vmem:[#allocation2 + $0x904] ss:$48 sps:$4 sm:$0xff]  }
  0x67   :  { %6551 = vmatprep.mubr.bf16.mxu1 %v4722_v6  ;;  %8676 = vmatprep.subr.bf16.mxu0 %v9552_v23  ;;  %v2810_v3 = vcombine.high %v2792_v58, %v2806_v59  ;;  %v2809_v4 = vcombine.low %v2792_v58, %v2806_v59  ;;  %v4768_v6 = vpack.c.bf16 %v2808_v62, %v2592_v57  ;;  %v9584_v23 = vld [vmem:[#allocation5 + $0x168] sm:$0xff]   ;;  %v9592_v46 = vld [vmem:[#allocation2 + $0x9c0] ss:$48 sps:$4 sm:$0xff]   ;;  %v9597_v50 = vld [vmem:[#allocation2 + $0x964] ss:$48 sps:$4 sm:$0xff]  }
  0x68   :  { %8740 = vmatprep.subr.bf16.mxu1 %v9554_v32  ;;  %v3022_v25 = vrot.slane %v9581_v17, %v10405_v37  ;;  %v3224_v26 = vrot.slane %v9582_v18, %v10405_v37  ;;  %v3238_v27 = vrot.slane %v9583_v19, %v10405_v37  ;;  %v3240_v29 = vcombine.high %v3217_v20, %v3231_v21  ;;  %v9586_v32 = vld [vmem:[#allocation5 + $0x1e8] sm:$0xff]   ;;  %v9594_v47 = vld [vmem:[#allocation2 + $0xa20] ss:$48 sps:$4 sm:$0xff]   ;;  %v9598_v51 = vld [vmem:[#allocation2 + $0x9c4] ss:$48 sps:$4 sm:$0xff]  }
  0x69   :  { %8677 = vmatpush3.bf16.msra.mxu0 %v9553_v28  ;;  %v4770_v8 = vpack.c.bf16 %v2810_v3, %v2594_v63  ;;  %v4769_v9 = vpack.c.bf16 %v2809_v4, %v2593_v1  ;;  %v9585_v28 = vld [vmem:[#allocation5 + $0x128] sm:$0xff]   ;;  %v3023_v30 = vcombine.low %v3001_v15, %v3015_v16  ;;  %v3239_v31 = vcombine.low %v3217_v20, %v3231_v21  ;;  %v9599_v55 = vld [vmem:[#allocation2 + $0xa24] ss:$48 sps:$4 sm:$0xff]   ;;  %v9604_v12 = vld [vmem:[#allocation2 + $0xa80] ss:$48 sps:$4 sm:$0xff]  }
  0x6a   :  { %8741 = vmatpush3.bf16.msra.mxu1 %v9555_v38  ;;  %8678 = vmatprep.subr.bf16.mxu0 %v9568_v56  ;;  %v3242_v35 = vcombine.high %v3224_v26, %v3238_v27  ;;  %v3025_v36 = vcombine.low %v3008_v22, %v3022_v25  ;;  %v3241_v38 = vcombine.low %v3224_v26, %v3238_v27  ;;  %v9600_v59 = vld [vmem:[#allocation5 + $0x170] sm:$0xff]   ;;  %v9616_v26 = vld [vmem:[#allocation5 + $0x178] sm:$0xff]  }
  0x6b   :  { %8742 = vmatprep.subr.bf16.mxu1 %v9570_v2  ;;  %v3433_v48 = vrot.slane %v9588_v44, %v10405_v37  ;;  %v3447_v52 = vrot.slane %v9590_v45, %v10405_v37  ;;  %v3649_v53 = vrot.slane %v9592_v46, %v10405_v37  ;;  %v3663_v54 = vrot.slane %v9594_v47, %v10405_v37  ;;  %v9602_v4 = vld [vmem:[#allocation5 + $0x1f0] sm:$0xff]   ;;  %v9620_v46 = vld [vmem:[#allocation2 + $0x8] ss:$48 sps:$4 sm:$0xff]  }
  0x6c   :  { %6455 = vmatmul.mubr.bf16.gmra.mrb[8].mxu0 %v4719_v5  ;;  %v9571_v5 = vld [vmem:[#allocation5 + $0x1a0] sm:$0xff]   ;;  %v4793_v43 = vpack.c.bf16 %v3241_v38, %v3025_v36  ;;  %v3440_v56 = vrot.slane %v9596_v49, %v10405_v37  ;;  %v3454_v57 = vrot.slane %v9597_v50, %v10405_v37  ;;  %v3656_v58 = vrot.slane %v9598_v51, %v10405_v37  ;;  %v9618_v38 = vld [vmem:[#allocation5 + $0x1f8] sm:$0xff]  }
  0x6d   :  { %6552 = vmatmul.mubr.bf16.gmra.mrb[8].mxu1 %v4721_v7  ;;  %6462 = vmatprep.mubr.bf16.mxu0 %v4744_v34  ;;  %v4767_v7 = vpack.c.bf16 %v2807_v0, %v2591_v60  ;;  %v3026_v34 = vcombine.high %v3008_v22, %v3022_v25  ;;  %v3456_v60 = vcombine.high %v3433_v48, %v3447_v52  ;;  %v9601_v0 = vld [vmem:[#allocation5 + $0x130] sm:$0xff]   ;;  %v9622_v47 = vld [vmem:[#allocation2 + $0x68] ss:$48 sps:$4 sm:$0xff]   ;;  %v9628_v50 = vld [vmem:[#allocation2 + $0xc] ss:$48 sps:$4 sm:$0xff]  }
  0x6e   :  { %6559 = vmatprep.mubr.bf16.mxu1 %v4746_v40  ;;  %8679 = vmatpush3.bf16.msra.mxu0 %v9569_v61  ;;  %v4792_v40 = vpack.c.bf16 %v3240_v29, %v3024_v24  ;;  %v3672_v61 = vcombine.high %v3649_v53, %v3663_v54  ;;  %v3670_v62 = vrot.slane %v9599_v55, %v10405_v37  ;;  %v9606_v13 = vld [vmem:[#allocation2 + $0xae0] ss:$48 sps:$4 sm:$0xff]   ;;  %v9612_v16 = vld [vmem:[#allocation2 + $0xa84] ss:$48 sps:$4 sm:$0xff]   ;;  %v9626_v49 = vld [vmem:[#allocation2 + $0x128] ss:$48 sps:$4 sm:$0xff]  }
  0x6f   :  { %8743 = vmatpush3.bf16.msra.mxu1 %v9571_v5  ;;  %8680 = vmatprep.subr.bf16.mxu0 %v9584_v23  ;;  %v4794_v42 = vpack.c.bf16 %v3242_v35, %v3026_v34  ;;  %v3455_v63 = vcombine.low %v3433_v48, %v3447_v52  ;;  %v3458_v1 = vcombine.high %v3440_v56, %v3454_v57  ;;  %v9608_v14 = vld [vmem:[#allocation2 + $0xb40] ss:$48 sps:$4 sm:$0xff]   ;;  %v9613_v17 = vld [vmem:[#allocation2 + $0xae4] ss:$48 sps:$4 sm:$0xff]   ;;  %v9624_v48 = vld [vmem:[#allocation2 + $0xc8] ss:$48 sps:$4 sm:$0xff]  }
  0x70   :  { %8744 = vmatprep.subr.bf16.mxu1 %v9586_v32  ;;  %v3671_v2 = vcombine.low %v3649_v53, %v3663_v54  ;;  %v3457_v3 = vcombine.low %v3440_v56, %v3454_v57  ;;  %v4816_v5 = vpack.c.bf16 %v3672_v61, %v3456_v60  ;;  %v9610_v15 = vld [vmem:[#allocation2 + $0xba0] ss:$48 sps:$4 sm:$0xff]   ;;  %v3865_v18 = vrot.slane %v9604_v12, %v10405_v37  ;;  %v9614_v21 = vld [vmem:[#allocation2 + $0xb44] ss:$48 sps:$4 sm:$0xff]   ;;  %v9629_v53 = vld [vmem:[#allocation2 + $0x6c] ss:$48 sps:$4 sm:$0xff]  }
  0x71   :  { %v3879_v19 = vrot.slane %v9606_v13, %v10405_v37  ;;  %v4081_v20 = vrot.slane %v9608_v14, %v10405_v37  ;;  %v9615_v22 = vld [vmem:[#allocation2 + $0xba4] ss:$48 sps:$4 sm:$0xff]   ;;  %v4095_v23 = vrot.slane %v9610_v15, %v10405_v37  ;;  %v3872_v24 = vrot.slane %v9612_v16, %v10405_v37  ;;  %v9630_v54 = vld [vmem:[#allocation2 + $0xcc] ss:$48 sps:$4 sm:$0xff]   ;;  %v9636_v14 = vld [vmem:[#allocation2 + $0x188] ss:$48 sps:$4 sm:$0xff]  }
  0x72   :  { %8681 = vmatpush3.bf16.msra.mxu0 %v9585_v28  ;;  %v3886_v25 = vrot.slane %v9613_v17, %v10405_v37  ;;  %v4088_v28 = vrot.slane %v9614_v21, %v10405_v37  ;;  %v4102_v29 = vrot.slane %v9615_v22, %v10405_v37  ;;  %v877_v51 = vrot.slane %v9620_v46, %v10405_v37  ;;  %v9631_v55 = vld [vmem:[#allocation2 + $0x12c] ss:$48 sps:$4 sm:$0xff]   ;;  %v9638_v15 = vld [vmem:[#allocation2 + $0x1e8] ss:$48 sps:$4 sm:$0xff]  }
  0x73   :  { %8682 = vmatprep.subr.bf16.mxu0 %v9600_v59  ;;  %v3888_v27 = vcombine.high %v3865_v18, %v3879_v19  ;;  %v4104_v32 = vcombine.high %v4081_v20, %v4095_v23  ;;  %v4103_v35 = vcombine.low %v4081_v20, %v4095_v23  ;;  %v891_v52 = vrot.slane %v9622_v47, %v10405_v37  ;;  %v9632_v59 = vld [vmem:[#allocation5 + $0x240] sm:$0xff]   ;;  %v9640_v16 = vld [vmem:[#allocation2 + $0x248] ss:$48 sps:$4 sm:$0xff]   ;;  %v9645_v20 = vld [vmem:[#allocation2 + $0x1ec] ss:$48 sps:$4 sm:$0xff]  }
  0x74   :  { %6463 = vmatmul.mubr.bf16.gmra.mrb[12].mxu0 %v4743_v39  ;;  %v9587_v39 = vld [vmem:[#allocation5 + $0x1a8] sm:$0xff]   ;;  %v3890_v34 = vcombine.high %v3872_v24, %v3886_v25  ;;  %v3889_v36 = vcombine.low %v3872_v24, %v3886_v25  ;;  %v1093_v56 = vrot.slane %v9624_v48, %v10405_v37  ;;  %v1107_v57 = vrot.slane %v9626_v49, %v10405_v37 }
  0x75   :  { %6560 = vmatmul.mubr.bf16.gmra.mrb[12].mxu1 %v4745_v41  ;;  %6470 = vmatprep.mubr.bf16.mxu0 %v4768_v6  ;;  %v4791_v41 = vpack.c.bf16 %v3239_v31, %v3023_v30  ;;  %v3674_v6 = vcombine.high %v3656_v58, %v3670_v62  ;;  %v3887_v30 = vcombine.low %v3865_v18, %v3879_v19  ;;  %v9617_v31 = vld [vmem:[#allocation5 + $0x138] sm:$0xff]  }
  0x76   :  { %6567 = vmatprep.mubr.bf16.mxu1 %v4770_v8  ;;  %8745 = vmatpush3.bf16.msra.mxu1 %v9587_v39  ;;  %v9603_v8 = vld [vmem:[#allocation5 + $0x1b0] sm:$0xff]   ;;  %v4106_v39 = vcombine.high %v4088_v28, %v4102_v29  ;;  %v899_v60 = vcombine.low %v877_v51, %v891_v52  ;;  %v900_v61 = vcombine.high %v877_v51, %v891_v52  ;;  %v9642_v17 = vld [vmem:[#allocation2 + $0x2a8] ss:$48 sps:$4 sm:$0xff]   ;;  %v9644_v19 = vld [vmem:[#allocation2 + $0x18c] ss:$48 sps:$4 sm:$0xff]  }
  0x77   :  { %8683 = vmatpush3.bf16.msra.mxu0 %v9601_v0  ;;  %8746 = vmatprep.subr.bf16.mxu1 %v9602_v4  ;;  %v4818_v10 = vpack.c.bf16 %v3674_v6, %v3458_v1  ;;  %v1115_v0 = vcombine.low %v1093_v56, %v1107_v57  ;;  %v1116_v1 = vcombine.high %v1093_v56, %v1107_v57  ;;  %v9633_v6 = vld [vmem:[#allocation5 + $0x200] sm:$0xff]   ;;  %v9646_v21 = vld [vmem:[#allocation2 + $0x24c] ss:$48 sps:$4 sm:$0xff]   ;;  %v9652_v48 = vld [vmem:[#allocation2 + $0x308] ss:$48 sps:$4 sm:$0xff]  }
  0x78   :  { %8684 = vmatprep.subr.bf16.mxu0 %v9616_v26  ;;  %v4842_v44 = vpack.c.bf16 %v4106_v39, %v3890_v34  ;;  %v1309_v18 = vrot.slane %v9636_v14, %v10405_v37  ;;  %v1323_v22 = vrot.slane %v9638_v15, %v10405_v37  ;;  %v1525_v23 = vrot.slane %v9640_v16, %v10405_v37  ;;  %v9647_v25 = vld [vmem:[#allocation2 + $0x2ac] ss:$48 sps:$4 sm:$0xff]   ;;  %v9654_v49 = vld [vmem:[#allocation2 + $0x368] ss:$48 sps:$4 sm:$0xff]  }
  0x79   :  { %v1539_v24 = vrot.slane %v9642_v17, %v10405_v37  ;;  %v1316_v26 = vrot.slane %v9644_v19, %v10405_v37  ;;  %v9658_v51 = vld [vmem:[#allocation2 + $0x428] ss:$48 sps:$4 sm:$0xff]   ;;  %v9660_v52 = vld [vmem:[#allocation2 + $0x30c] ss:$48 sps:$4 sm:$0xff]  }
  0x7a   :  { %8747 = vmatpush3.bf16.msra.mxu1 %v9603_v8  ;;  %v1331_v34 = vcombine.low %v1309_v18, %v1323_v22  ;;  %v9662_v57 = vld [vmem:[#allocation2 + $0x3cc] ss:$48 sps:$4 sm:$0xff]   ;;  %v9668_v16 = vld [vmem:[#allocation2 + $0x488] ss:$48 sps:$4 sm:$0xff]  }
  0x7b   :  { %8685 = vmatpush3.bf16.msra.mxu0 %v9617_v31  ;;  %8748 = vmatprep.subr.bf16.mxu1 %v9618_v38  ;;  %v1548_v31 = vcombine.high %v1525_v23, %v1539_v24  ;;  %v1547_v38 = vcombine.low %v1525_v23, %v1539_v24  ;;  %v9670_v17 = vld [vmem:[#allocation2 + $0x4e8] ss:$48 sps:$4 sm:$0xff]   ;;  %v9677_v23 = vld [vmem:[#allocation2 + $0x4ec] ss:$48 sps:$4 sm:$0xff]  }
  0x7c   :  { %6471 = vmatmul.mubr.bf16.gmra.mrb[16].mxu0 %v4767_v7  ;;  %v3673_v7 = vcombine.low %v3656_v58, %v3670_v62  ;;  %v884_v58 = vrot.slane %v9628_v50, %v10405_v37  ;;  %v898_v62 = vrot.slane %v9629_v53, %v10405_v37  ;;  %8798 = vmatprep.subr.bf16.mxu0 %v9632_v59  ;;  %v9656_v50 = vld [vmem:[#allocation2 + $0x3c8] ss:$48 sps:$4 sm:$0xff]   ;;  %v9661_v53 = vld [vmem:[#allocation2 + $0x36c] ss:$48 sps:$4 sm:$0xff]  }
  0x7d   :  { %6568 = vmatmul.mubr.bf16.gmra.mrb[16].mxu1 %v4769_v9  ;;  %6478 = vmatprep.mubr.bf16.mxu0 %v4792_v40  ;;  %v4815_v9 = vpack.c.bf16 %v3671_v2, %v3455_v63  ;;  %v4105_v40 = vcombine.low %v4088_v28, %v4102_v29  ;;  %v1100_v63 = vrot.slane %v9630_v54, %v10405_v37  ;;  %v9648_v29 = vld [vmem:[#allocation5 + $0x248] sm:$0xff]  }
  0x7e   :  { %6575 = vmatprep.mubr.bf16.mxu1 %v4794_v42  ;;  %v4817_v11 = vpack.c.bf16 %v3673_v7, %v3457_v3  ;;  %v4840_v42 = vpack.c.bf16 %v4104_v32, %v3888_v27  ;;  %v1114_v2 = vrot.slane %v9631_v55, %v10405_v37  ;;  %v9634_v3 = vld [vmem:[#allocation5 + $0x2c0] sm:$0xff]   ;;  %v901_v4 = vcombine.low %v884_v58, %v898_v62  ;;  %v9674_v19 = vld [vmem:[#allocation2 + $0x5a8] ss:$48 sps:$4 sm:$0xff]   ;;  %v9678_v24 = vld [vmem:[#allocation2 + $0x54c] ss:$48 sps:$4 sm:$0xff]  }
  0x7f   :  { %v4841_v45 = vpack.c.bf16 %v4105_v40, %v3889_v36  ;;  %v4676_v7 = vpack.c.bf16 %v1116_v1, %v900_v61  ;;  %v1330_v27 = vrot.slane %v9645_v20, %v10405_v37  ;;  %v1532_v28 = vrot.slane %v9646_v21, %v10405_v37  ;;  %v9650_v40 = vld [vmem:[#allocation5 + $0x2c8] sm:$0xff]  }
  0x80   :  { %v1117_v8 = vcombine.low %v1100_v63, %v1114_v2  ;;  %v1546_v32 = vrot.slane %v9647_v25, %v10405_v37  ;;  %v1741_v54 = vrot.slane %v9652_v48, %v10405_v37  ;;  %v1755_v55 = vrot.slane %v9654_v49, %v10405_v37  ;;  %v9676_v20 = vld [vmem:[#allocation2 + $0x48c] ss:$48 sps:$4 sm:$0xff]  }
  0x81   :  { %v1334_v36 = vcombine.high %v1316_v26, %v1330_v27  ;;  %v1333_v39 = vcombine.low %v1316_v26, %v1330_v27  ;;  %v1957_v56 = vrot.slane %v9656_v50, %v10405_v37  ;;  %v1971_v59 = vrot.slane %v9658_v51, %v10405_v37  ;;  %v9679_v25 = vld [vmem:[#allocation2 + $0x5ac] ss:$48 sps:$4 sm:$0xff]   ;;  %v9684_v50 = vld [vmem:[#allocation2 + $0x608] ss:$48 sps:$4 sm:$0xff]  }
  0x82   :  { %v4677_v13 = vpack.c.bf16 %v1117_v8, %v901_v4  ;;  %v1762_v61 = vrot.slane %v9661_v53, %v10405_v37  ;;  %v9666_v8 = vld [vmem:[#allocation5 + $0x2d0] sm:$0xff]   ;;  %v2173_v21 = vrot.slane %v9668_v16, %v10405_v37  ;;  %v2403_v27 = vrot.slane %v9674_v19, %v10405_v37  ;;  %v9686_v51 = vld [vmem:[#allocation2 + $0x668] ss:$48 sps:$4 sm:$0xff]  }
  0x83   :  { %v1980_v4 = vcombine.high %v1957_v56, %v1971_v59  ;;  %v9690_v53 = vld [vmem:[#allocation2 + $0x728] ss:$48 sps:$4 sm:$0xff]  }
  0x84   :  { %6479 = vmatmul.mubr.bf16.gmra.mrb[20].mxu0 %v4791_v41  ;;  %v9619_v41 = vld [vmem:[#allocation5 + $0x1b8] sm:$0xff]  }
  0x85   :  { %6576 = vmatmul.mubr.bf16.gmra.mrb[20].mxu1 %v4793_v43  ;;  %6486 = vmatprep.mubr.bf16.mxu0 %v4816_v5  ;;  %v4839_v43 = vpack.c.bf16 %v4103_v35, %v3887_v30  ;;  %v902_v5 = vcombine.high %v884_v58, %v898_v62  ;;  %v1332_v30 = vcombine.high %v1309_v18, %v1323_v22  ;;  %v9649_v35 = vld [vmem:[#allocation5 + $0x208] sm:$0xff]   ;;  %v9664_v62 = vld [vmem:[#allocation5 + $0x250] sm:$0xff]  }
  0x86   :  { %6583 = vmatprep.mubr.bf16.mxu1 %v4818_v10  ;;  %8749 = vmatpush3.bf16.msra.mxu1 %v9619_v41  ;;  %v4675_v10 = vpack.c.bf16 %v1115_v0, %v899_v60  ;;  %v9663_v58 = vld [vmem:[#allocation2 + $0x42c] ss:$48 sps:$4 sm:$0xff]   ;;  %v1748_v60 = vrot.slane %v9660_v52, %v10405_v37  ;;  %v1964_v0 = vrot.slane %v9662_v57, %v10405_v37  ;;  %v9672_v18 = vld [vmem:[#allocation2 + $0x548] ss:$48 sps:$4 sm:$0xff]  }
  0x87   :  { %8862 = vmatprep.subr.bf16.mxu1 %v9634_v3  ;;  %v4700_v41 = vpack.c.bf16 %v1548_v31, %v1332_v30  ;;  %v1978_v1 = vrot.slane %v9663_v58, %v10405_v37  ;;  %v9665_v3 = vld [vmem:[#allocation5 + $0x210] sm:$0xff]   ;;  %v2187_v22 = vrot.slane %v9670_v17, %v10405_v37  ;;  %v2389_v26 = vrot.slane %v9672_v18, %v10405_v37  ;;  %v9688_v52 = vld [vmem:[#allocation2 + $0x6c8] ss:$48 sps:$4 sm:$0xff]   ;;  %v9694_v57 = vld [vmem:[#allocation2 + $0x6cc] ss:$48 sps:$4 sm:$0xff]  }
  0x88   :  { %v2194_v31 = vrot.slane %v9677_v23, %v10405_v37  ;;  %v2619_v58 = vrot.slane %v9686_v51, %v10405_v37  ;;  %v9700_v18 = vld [vmem:[#allocation2 + $0x788] ss:$48 sps:$4 sm:$0xff]   ;;  %v9709_v23 = vld [vmem:[#allocation2 + $0x7ec] ss:$48 sps:$4 sm:$0xff]  }
  0x89   :  { %v2196_v30 = vcombine.high %v2173_v21, %v2187_v22  ;;  %v9702_v19 = vld [vmem:[#allocation2 + $0x7e8] ss:$48 sps:$4 sm:$0xff]  }
  0x8c   :  { %6487 = vmatmul.mubr.bf16.gmra.mrb[24].mxu0 %v4815_v9  ;;  %v1118_v9 = vcombine.high %v1100_v63, %v1114_v2  ;;  %v1764_v63 = vcombine.high %v1741_v54, %v1755_v55  ;;  %v1763_v2 = vcombine.low %v1741_v54, %v1755_v55  ;;  %v2605_v54 = vrot.slane %v9684_v50, %v10405_v37  ;;  %v9692_v55 = vld [vmem:[#allocation2 + $0x60c] ss:$48 sps:$4 sm:$0xff]  }
  0x8d   :  { %6584 = vmatmul.mubr.bf16.gmra.mrb[24].mxu1 %v4817_v11  ;;  %6494 = vmatprep.mubr.bf16.mxu0 %v4840_v42  ;;  %v9635_v11 = vld [vmem:[#allocation5 + $0x280] sm:$0xff]   ;;  %v1550_v42 = vcombine.high %v1532_v28, %v1546_v32 }
  0x8e   :  { %6591 = vmatprep.mubr.bf16.mxu1 %v4842_v44  ;;  %v4678_v12 = vpack.c.bf16 %v1118_v9, %v902_v5  ;;  %v9651_v44 = vld [vmem:[#allocation5 + $0x288] sm:$0xff]   ;;  %v1766_v5 = vcombine.high %v1748_v60, %v1762_v61  ;;  %v1982_v9 = vcombine.high %v1964_v0, %v1978_v1 }
  0x8f   :  { %v4702_v46 = vpack.c.bf16 %v1550_v42, %v1334_v36  ;;  %v2412_v36 = vcombine.high %v2389_v26, %v2403_v27 }
  0x90   :  { %v4726_v14 = vpack.c.bf16 %v1982_v9, %v1766_v5  ;;  %v2627_v5 = vcombine.low %v2605_v54, %v2619_v58 }
  0x94   :  { %6495 = vmatmul.mubr.bf16.gmra.mrb[28].mxu0 %v4839_v43  ;;  %v1549_v43 = vcombine.low %v1532_v28, %v1546_v32  ;;  %v2180_v28 = vrot.slane %v9676_v20, %v10405_v37  ;;  %v2396_v32 = vrot.slane %v9678_v24, %v10405_v37  ;;  %v9704_v20 = vld [vmem:[#allocation2 + $0x848] ss:$48 sps:$4 sm:$0xff]   ;;  %v3037_v24 = vrot.slane %v9700_v18, %v10405_v37 }
  0x95   :  { %6592 = vmatmul.mubr.bf16.gmra.mrb[28].mxu1 %v4841_v45  ;;  %6632 = vmatprep.mubr.bf16.mxu0 %v4676_v7  ;;  %v4699_v45 = vpack.c.bf16 %v1547_v38, %v1331_v34  ;;  %v1765_v7 = vcombine.low %v1748_v60, %v1762_v61  ;;  %v2410_v34 = vrot.slane %v9679_v25, %v10405_v37  ;;  %v9695_v61 = vld [vmem:[#allocation2 + $0x72c] ss:$48 sps:$4 sm:$0xff]  }
  0x96   :  { %6729 = vmatprep.mubr.bf16.mxu1 %v4678_v12  ;;  %v4701_v47 = vpack.c.bf16 %v1549_v43, %v1333_v39  ;;  %v4724_v12 = vpack.c.bf16 %v1980_v4, %v1764_v63  ;;  %v2195_v38 = vcombine.low %v2173_v21, %v2187_v22  ;;  %v2411_v39 = vcombine.low %v2389_v26, %v2403_v27  ;;  %v9706_v21 = vld [vmem:[#allocation2 + $0x8a8] ss:$48 sps:$4 sm:$0xff]   ;;  %v9708_v22 = vld [vmem:[#allocation2 + $0x78c] ss:$48 sps:$4 sm:$0xff]  }
  0x97   :  { %v2414_v42 = vcombine.high %v2396_v32, %v2410_v34  ;;  %v2197_v43 = vcombine.low %v2180_v28, %v2194_v31  ;;  %v2835_v60 = vrot.slane %v9690_v53, %v10405_v37  ;;  %v2842_v4 = vrot.slane %v9695_v61, %v10405_v37  ;;  %v9710_v27 = vld [vmem:[#allocation2 + $0x84c] ss:$48 sps:$4 sm:$0xff]   ;;  %v9718_v53 = vld [vmem:[#allocation2 + $0x968] ss:$48 sps:$4 sm:$0xff]  }
  0x98   :  { %v3051_v25 = vrot.slane %v9702_v19, %v10405_v37  ;;  %v3253_v26 = vrot.slane %v9704_v20, %v10405_v37  ;;  %v9727_v61 = vld [vmem:[#allocation2 + $0xa2c] ss:$48 sps:$4 sm:$0xff]   ;;  %v9732_v20 = vld [vmem:[#allocation2 + $0xa88] ss:$48 sps:$4 sm:$0xff]  }
  0x9c   :  { %6633 = vmatmul.mubr.bf16.vlgmr.msra.gmra.mrb[32].mxu0 %v4675_v10  ;;  %v1981_v10 = vcombine.low %v1964_v0, %v1978_v1  ;;  %v2828_v0 = vrot.slane %v9694_v57, %v10405_v37  ;;  %v9696_v1 = vld [vmem:[#allocation5 + $0x260] sm:$0xff]  }
  0x9d   :  { %8799 = vmatpush3.bf16.msra.mxu0 %v9633_v6  ;;  %6730 = vmatmul.mubr.bf16.vlgmr.msra.gmra.mrb[32].mxu1 %v4677_v13  ;;  %v1979_v6 = vcombine.low %v1957_v56, %v1971_v59  ;;  %v9693_v56 = vld [vmem:[#allocation2 + $0x66c] ss:$48 sps:$4 sm:$0xff]   ;;  %v2821_v59 = vrot.slane %v9688_v52, %v10405_v37  ;;  %v9716_v52 = vld [vmem:[#allocation2 + $0x908] ss:$48 sps:$4 sm:$0xff]  }
  0x9e   :  { %8863 = vmatpush3.bf16.msra.mxu1 %v9635_v11  ;;  %8800 = vmatprep.subr.bf16.mxu0 %v9648_v29  ;;  %v9667_v11 = vld [vmem:[#allocation5 + $0x290] sm:$0xff]   ;;  %v4725_v15 = vpack.c.bf16 %v1981_v10, %v1765_v7  ;;  %v9680_v29 = vld [vmem:[#allocation5 + $0x258] sm:$0xff]   ;;  %v2626_v63 = vrot.slane %v9693_v56, %v10405_v37  ;;  %v9698_v10 = vld [vmem:[#allocation5 + $0x2e0] sm:$0xff]   ;;  %v3469_v57 = vrot.slane %v9716_v52, %v10405_v37 }
  0x9f   :  { %8864 = vmatprep.subr.bf16.mxu1 %v9650_v40  ;;  %6640 = vmatprep.mubr.bf16.mxu0 %v4700_v41  ;;  %v4723_v13 = vpack.c.bf16 %v1979_v6, %v1763_v2  ;;  %v9682_v40 = vld [vmem:[#allocation5 + $0x2d8] sm:$0xff]   ;;  %v2198_v41 = vcombine.high %v2180_v28, %v2194_v31  ;;  %v2628_v2 = vcombine.high %v2605_v54, %v2619_v58  ;;  %v9697_v6 = vld [vmem:[#allocation5 + $0x220] sm:$0xff]  }
  0xa0   :  { %6737 = vmatprep.mubr.bf16.mxu1 %v4702_v46  ;;  %v4748_v46 = vpack.c.bf16 %v2412_v36, %v2196_v30  ;;  %v9711_v28 = vld [vmem:[#allocation2 + $0x8ac] ss:$48 sps:$4 sm:$0xff]   ;;  %v3044_v30 = vrot.slane %v9708_v22, %v10405_v37  ;;  %v3058_v31 = vrot.slane %v9709_v23, %v10405_v37  ;;  %v9720_v54 = vld [vmem:[#allocation2 + $0x9c8] ss:$48 sps:$4 sm:$0xff]   ;;  %v3483_v58 = vrot.slane %v9718_v53, %v10405_v37 }
  0xa1   :  { %8801 = vmatpush3.bf16.msra.mxu0 %v9649_v35  ;;  %v9681_v35 = vld [vmem:[#allocation5 + $0x218] sm:$0xff]   ;;  %v4750_v48 = vpack.c.bf16 %v2414_v42, %v2198_v41  ;;  %v3274_v36 = vrot.slane %v9711_v28, %v10405_v37 }
  0xa2   :  { %8865 = vmatpush3.bf16.msra.mxu1 %v9651_v44  ;;  %8802 = vmatprep.subr.bf16.mxu0 %v9664_v62  ;;  %v2413_v44 = vcombine.low %v2396_v32, %v2410_v34  ;;  %v2612_v62 = vrot.slane %v9692_v55, %v10405_v37  ;;  %v9712_v32 = vld [vmem:[#allocation5 + $0x268] sm:$0xff]   ;;  %v3060_v34 = vcombine.high %v3037_v24, %v3051_v25 }
  0xa3   :  { %8866 = vmatprep.subr.bf16.mxu1 %v9666_v8  ;;  %v2843_v8 = vcombine.low %v2821_v59, %v2835_v60  ;;  %v3062_v41 = vcombine.high %v3044_v30, %v3058_v31  ;;  %v9722_v55 = vld [vmem:[#allocation2 + $0xa28] ss:$48 sps:$4 sm:$0xff]   ;;  %v9724_v56 = vld [vmem:[#allocation2 + $0x90c] ss:$48 sps:$4 sm:$0xff]  }
  0xa4   :  { %6641 = vmatmul.mubr.bf16.gmra.mrb[36].mxu0 %v4699_v45  ;;  %v9683_v45 = vld [vmem:[#allocation5 + $0x298] sm:$0xff]   ;;  %v4749_v49 = vpack.c.bf16 %v2413_v44, %v2197_v43  ;;  %v2630_v7 = vcombine.high %v2612_v62, %v2626_v63  ;;  %v2629_v9 = vcombine.low %v2612_v62, %v2626_v63  ;;  %v3061_v43 = vcombine.low %v3044_v30, %v3058_v31  ;;  %v9714_v44 = vld [vmem:[#allocation5 + $0x2e8] sm:$0xff]  }
  0xa5   :  { %6738 = vmatmul.mubr.bf16.gmra.mrb[36].mxu1 %v4701_v47  ;;  %8803 = vmatpush3.bf16.msra.mxu0 %v9665_v3  ;;  %v4747_v47 = vpack.c.bf16 %v2411_v39, %v2195_v38  ;;  %v2844_v3 = vcombine.high %v2821_v59, %v2835_v60  ;;  %v3059_v38 = vcombine.low %v3037_v24, %v3051_v25  ;;  %v9713_v39 = vld [vmem:[#allocation5 + $0x228] sm:$0xff]  }
  0xa6   :  { %8867 = vmatpush3.bf16.msra.mxu1 %v9667_v11  ;;  %6648 = vmatprep.mubr.bf16.mxu0 %v4724_v12  ;;  %v2846_v12 = vcombine.high %v2828_v0, %v2842_v4  ;;  %v9725_v59 = vld [vmem:[#allocation2 + $0x96c] ss:$48 sps:$4 sm:$0xff]   ;;  %v3685_v62 = vrot.slane %v9720_v54, %v10405_v37  ;;  %v3699_v63 = vrot.slane %v9722_v55, %v10405_v37  ;;  %v9736_v22 = vld [vmem:[#allocation2 + $0xb48] ss:$48 sps:$4 sm:$0xff]   ;;  %v9748_v54 = vld [vmem:[#allocation2 + $0x10] ss:$48 sps:$4 sm:$0xff]  }
  0xa7   :  { %6745 = vmatprep.mubr.bf16.mxu1 %v4726_v14  ;;  %8804 = vmatprep.subr.bf16.mxu0 %v9680_v29  ;;  %v4772_v11 = vpack.c.bf16 %v2844_v3, %v2628_v2  ;;  %v9699_v14 = vld [vmem:[#allocation5 + $0x2a0] sm:$0xff]   ;;  %v3267_v29 = vrot.slane %v9706_v21, %v10405_v37  ;;  %v9726_v60 = vld [vmem:[#allocation2 + $0x9cc] ss:$48 sps:$4 sm:$0xff]   ;;  %v3492_v2 = vcombine.high %v3469_v57, %v3483_v58  ;;  %v9734_v21 = vld [vmem:[#allocation2 + $0xae8] ss:$48 sps:$4 sm:$0xff]  }
  0xa8   :  { %8868 = vmatprep.subr.bf16.mxu1 %v9682_v40  ;;  %v4774_v16 = vpack.c.bf16 %v2846_v12, %v2630_v7  ;;  %v3490_v3 = vrot.slane %v9725_v59, %v10405_v37  ;;  %v3708_v7 = vcombine.high %v3685_v62, %v3699_v63  ;;  %v9738_v23 = vld [vmem:[#allocation2 + $0xba8] ss:$48 sps:$4 sm:$0xff]   ;;  %v3901_v24 = vrot.slane %v9732_v20, %v10405_v37  ;;  %v9740_v25 = vld [vmem:[#allocation2 + $0xa8c] ss:$48 sps:$4 sm:$0xff]   ;;  %v9750_v55 = vld [vmem:[#allocation2 + $0x70] ss:$48 sps:$4 sm:$0xff]  }
  0xa9   :  { %8805 = vmatpush3.bf16.msra.mxu0 %v9681_v35  ;;  %v3260_v35 = vrot.slane %v9710_v27, %v10405_v37  ;;  %v3276_v40 = vcombine.high %v3253_v26, %v3267_v29  ;;  %v3275_v42 = vcombine.low %v3253_v26, %v3267_v29  ;;  %v9741_v26 = vld [vmem:[#allocation2 + $0xaec] ss:$48 sps:$4 sm:$0xff]   ;;  %v3915_v28 = vrot.slane %v9734_v21, %v10405_v37  ;;  %v9757_v59 = vld [vmem:[#allocation2 + $0x74] ss:$48 sps:$4 sm:$0xff]  }
  0xaa   :  { %8869 = vmatpush3.bf16.msra.mxu1 %v9683_v45  ;;  %8806 = vmatprep.subr.bf16.mxu0 %v9696_v1  ;;  %v9728_v1 = vld [vmem:[#allocation5 + $0x270] sm:$0xff]   ;;  %v9742_v27 = vld [vmem:[#allocation2 + $0xb4c] ss:$48 sps:$4 sm:$0xff]   ;;  %v4117_v29 = vrot.slane %v9736_v22, %v10405_v37  ;;  %v4131_v30 = vrot.slane %v9738_v23, %v10405_v37 }
  0xab   :  { %8870 = vmatprep.subr.bf16.mxu1 %v9698_v10  ;;  %v3278_v45 = vcombine.high %v3260_v35, %v3274_v36  ;;  %v9730_v10 = vld [vmem:[#allocation5 + $0x2f0] sm:$0xff]   ;;  %v9743_v31 = vld [vmem:[#allocation2 + $0xbac] ss:$48 sps:$4 sm:$0xff]  }
  0xac   :  { %6649 = vmatmul.mubr.bf16.gmra.mrb[40].mxu0 %v4723_v13  ;;  %v2845_v13 = vcombine.low %v2828_v0, %v2842_v4  ;;  %v3476_v0 = vrot.slane %v9724_v56, %v10405_v37  ;;  %v3692_v4 = vrot.slane %v9726_v60, %v10405_v37  ;;  %v9752_v56 = vld [vmem:[#allocation2 + $0xd0] ss:$48 sps:$4 sm:$0xff]   ;;  %v913_v60 = vrot.slane %v9748_v54, %v10405_v37 }
  0xad   :  { %6746 = vmatmul.mubr.bf16.gmra.mrb[40].mxu1 %v4725_v15  ;;  %6656 = vmatprep.mubr.bf16.mxu0 %v4748_v46  ;;  %v4771_v15 = vpack.c.bf16 %v2843_v8, %v2627_v5  ;;  %v3277_v46 = vcombine.low %v3260_v35, %v3274_v36  ;;  %v4798_v50 = vpack.c.bf16 %v3278_v45, %v3062_v41  ;;  %v9744_v36 = vld [vmem:[#allocation5 + $0x278] sm:$0xff]   ;;  %v9764_v22 = vld [vmem:[#allocation2 + $0x190] ss:$48 sps:$4 sm:$0xff]  }
  0xae   :  { %6753 = vmatprep.mubr.bf16.mxu1 %v4750_v48  ;;  %8807 = vmatpush3.bf16.msra.mxu0 %v9697_v6  ;;  %v4773_v17 = vpack.c.bf16 %v2845_v13, %v2629_v9  ;;  %v4796_v48 = vpack.c.bf16 %v3276_v40, %v3060_v34  ;;  %v3706_v5 = vrot.slane %v9727_v61, %v10405_v37  ;;  %v9729_v6 = vld [vmem:[#allocation5 + $0x230] sm:$0xff]  }
  0xaf   :  { %8871 = vmatpush3.bf16.msra.mxu1 %v9699_v14  ;;  %8808 = vmatprep.subr.bf16.mxu0 %v9712_v32  ;;  %v4797_v51 = vpack.c.bf16 %v3277_v46, %v3061_v43  ;;  %v3491_v8 = vcombine.low %v3469_v57, %v3483_v58  ;;  %v3707_v9 = vcombine.low %v3685_v62, %v3699_v63  ;;  %v9746_v46 = vld [vmem:[#allocation5 + $0x2f8] sm:$0xff]   ;;  %v9754_v57 = vld [vmem:[#allocation2 + $0x130] ss:$48 sps:$4 sm:$0xff]   ;;  %v9756_v58 = vld [vmem:[#allocation2 + $0x14] ss:$48 sps:$4 sm:$0xff]  }
  0xb0   :  { %8872 = vmatprep.subr.bf16.mxu1 %v9714_v44  ;;  %v3710_v12 = vcombine.high %v3692_v4, %v3706_v5  ;;  %v3493_v13 = vcombine.low %v3476_v0, %v3490_v3  ;;  %v3709_v14 = vcombine.low %v3692_v4, %v3706_v5  ;;  %v3908_v32 = vrot.slane %v9740_v25, %v10405_v37  ;;  %v9758_v63 = vld [vmem:[#allocation2 + $0xd4] ss:$48 sps:$4 sm:$0xff]   ;;  %v9766_v23 = vld [vmem:[#allocation2 + $0x1f0] ss:$48 sps:$4 sm:$0xff]  }
  0xb1   :  { %v3922_v34 = vrot.slane %v9741_v26, %v10405_v37  ;;  %v4124_v35 = vrot.slane %v9742_v27, %v10405_v37  ;;  %v4138_v40 = vrot.slane %v9743_v31, %v10405_v37  ;;  %v3923_v41 = vcombine.low %v3901_v24, %v3915_v28  ;;  %v9760_v4 = vld [vmem:[#allocation5 + $0x340] sm:$0xff]  }
  0xb2   :  { %8809 = vmatpush3.bf16.msra.mxu0 %v9713_v39  ;;  %v4821_v19 = vpack.c.bf16 %v3709_v14, %v3493_v13  ;;  %v4140_v39 = vcombine.high %v4117_v29, %v4131_v30  ;;  %v4139_v44 = vcombine.low %v4117_v29, %v4131_v30  ;;  %v927_v61 = vrot.slane %v9750_v55, %v10405_v37  ;;  %v9761_v13 = vld [vmem:[#allocation5 + $0x300] sm:$0xff]  }
  0xb3   :  { %8810 = vmatprep.subr.bf16.mxu0 %v9728_v1  ;;  %v3926_v43 = vcombine.high %v3908_v32, %v3922_v34  ;;  %v3925_v45 = vcombine.low %v3908_v32, %v3922_v34  ;;  %v1129_v62 = vrot.slane %v9752_v56, %v10405_v37  ;;  %v1143_v1 = vrot.slane %v9754_v57, %v10405_v37  ;;  %v9762_v14 = vld [vmem:[#allocation5 + $0x3c0] sm:$0xff]  }
  0xb4   :  { %6657 = vmatmul.mubr.bf16.gmra.mrb[44].mxu0 %v4747_v47  ;;  %v9715_v47 = vld [vmem:[#allocation5 + $0x2a8] sm:$0xff]   ;;  %v935_v5 = vcombine.low %v913_v60, %v927_v61  ;;  %v9770_v25 = vld [vmem:[#allocation2 + $0x2b0] ss:$48 sps:$4 sm:$0xff]   ;;  %v9772_v26 = vld [vmem:[#allocation2 + $0x194] ss:$48 sps:$4 sm:$0xff]   ;;  %v1345_v27 = vrot.slane %v9764_v22, %v10405_v37 }
  0xb5   :  { %6754 = vmatmul.mubr.bf16.gmra.mrb[44].mxu1 %v4749_v49  ;;  %6664 = vmatprep.mubr.bf16.mxu0 %v4772_v11  ;;  %v4795_v49 = vpack.c.bf16 %v3275_v42, %v3059_v38  ;;  %v3494_v11 = vcombine.high %v3476_v0, %v3490_v3  ;;  %v3924_v38 = vcombine.high %v3901_v24, %v3915_v28  ;;  %v9745_v42 = vld [vmem:[#allocation5 + $0x238] sm:$0xff]   ;;  %v9759_v0 = vld [vmem:[#allocation2 + $0x134] ss:$48 sps:$4 sm:$0xff]   ;;  %v9768_v24 = vld [vmem:[#allocation2 + $0x250] ss:$48 sps:$4 sm:$0xff]  }
  0xb6   :  { %6761 = vmatprep.mubr.bf16.mxu1 %v4774_v16  ;;  %8873 = vmatpush3.bf16.msra.mxu1 %v9715_v47  ;;  %v4820_v16 = vpack.c.bf16 %v3708_v7, %v3492_v2  ;;  %v920_v2 = vrot.slane %v9756_v58, %v10405_v37  ;;  %v934_v3 = vrot.slane %v9757_v59, %v10405_v37  ;;  %v9773_v29 = vld [vmem:[#allocation2 + $0x1f4] ss:$48 sps:$4 sm:$0xff]   ;;  %v9780_v56 = vld [vmem:[#allocation2 + $0x310] ss:$48 sps:$4 sm:$0xff]  }
  0xb7   :  { %8811 = vmatpush3.bf16.msra.mxu0 %v9729_v6  ;;  %8874 = vmatprep.subr.bf16.mxu1 %v9730_v10  ;;  %v4822_v18 = vpack.c.bf16 %v3710_v12, %v3494_v11  ;;  %v4844_v47 = vpack.c.bf16 %v4140_v39, %v3924_v38  ;;  %v936_v6 = vcombine.high %v913_v60, %v927_v61  ;;  %v9774_v30 = vld [vmem:[#allocation2 + $0x254] ss:$48 sps:$4 sm:$0xff]   ;;  %v9782_v57 = vld [vmem:[#allocation2 + $0x370] ss:$48 sps:$4 sm:$0xff]  }
  0xb8   :  { %8812 = vmatprep.subr.bf16.mxu0 %v9744_v36  ;;  %v1136_v7 = vrot.slane %v9758_v63, %v10405_v37  ;;  %v1152_v10 = vcombine.high %v1129_v62, %v1143_v1  ;;  %v937_v11 = vcombine.low %v920_v2, %v934_v3  ;;  %v938_v12 = vcombine.high %v920_v2, %v934_v3  ;;  %v9775_v31 = vld [vmem:[#allocation2 + $0x2b4] ss:$48 sps:$4 sm:$0xff]   ;;  %v9776_v36 = vld [vmem:[#allocation5 + $0x348] sm:$0xff]   ;;  %v9784_v58 = vld [vmem:[#allocation2 + $0x3d0] ss:$48 sps:$4 sm:$0xff]  }
  0xb9   :  { %v1359_v28 = vrot.slane %v9766_v23, %v10405_v37  ;;  %v1561_v32 = vrot.slane %v9768_v24, %v10405_v37  ;;  %v1575_v34 = vrot.slane %v9770_v25, %v10405_v37  ;;  %v1366_v39 = vrot.slane %v9773_v29, %v10405_v37  ;;  %v9786_v59 = vld [vmem:[#allocation2 + $0x430] ss:$48 sps:$4 sm:$0xff]   ;;  %v9788_v61 = vld [vmem:[#allocation2 + $0x314] ss:$48 sps:$4 sm:$0xff]  }
  0xba   :  { %v1777_v60 = vrot.slane %v9780_v56, %v10405_v37  ;;  %v9790_v63 = vld [vmem:[#allocation2 + $0x3d4] ss:$48 sps:$4 sm:$0xff]   ;;  %v2007_v2 = vrot.slane %v9786_v59, %v10405_v37  ;;  %v9796_v24 = vld [vmem:[#allocation2 + $0x490] ss:$48 sps:$4 sm:$0xff]  }
  0xbb   :  { %8813 = vmatpush3.bf16.msra.mxu0 %v9745_v42  ;;  %v1368_v38 = vcombine.high %v1345_v27, %v1359_v28  ;;  %v9777_v42 = vld [vmem:[#allocation5 + $0x308] sm:$0xff]   ;;  %v9791_v3 = vld [vmem:[#allocation2 + $0x434] ss:$48 sps:$4 sm:$0xff]   ;;  %v9798_v25 = vld [vmem:[#allocation2 + $0x4f0] ss:$48 sps:$4 sm:$0xff]  }
  0xbc   :  { %6665 = vmatmul.mubr.bf16.gmra.mrb[48].mxu0 %v4771_v15  ;;  %v9731_v15 = vld [vmem:[#allocation5 + $0x2b0] sm:$0xff]   ;;  %8926 = vmatprep.subr.bf16.mxu0 %v9760_v4  ;;  %v1784_v4 = vrot.slane %v9788_v61, %v10405_v37 }
  0xbd   :  { %6762 = vmatmul.mubr.bf16.gmra.mrb[48].mxu1 %v4773_v17  ;;  %6672 = vmatprep.mubr.bf16.mxu0 %v4796_v48  ;;  %v4819_v17 = vpack.c.bf16 %v3707_v9, %v3491_v8  ;;  %v4142_v48 = vcombine.high %v4124_v35, %v4138_v40  ;;  %v1150_v8 = vrot.slane %v9759_v0, %v10405_v37  ;;  %v9805_v29 = vld [vmem:[#allocation2 + $0x4f4] ss:$48 sps:$4 sm:$0xff]   ;;  %v9814_v59 = vld [vmem:[#allocation2 + $0x670] ss:$48 sps:$4 sm:$0xff]  }
  0xbe   :  { %6769 = vmatprep.mubr.bf16.mxu1 %v4798_v50  ;;  %8875 = vmatpush3.bf16.msra.mxu1 %v9731_v15  ;;  %v9747_v50 = vld [vmem:[#allocation5 + $0x2b8] sm:$0xff]   ;;  %v1151_v9 = vcombine.low %v1129_v62, %v1143_v1  ;;  %v9789_v62 = vld [vmem:[#allocation2 + $0x374] ss:$48 sps:$4 sm:$0xff]   ;;  %v1791_v0 = vrot.slane %v9782_v57, %v10405_v37  ;;  %v1993_v1 = vrot.slane %v9784_v58, %v10405_v37  ;;  %v9812_v58 = vld [vmem:[#allocation2 + $0x610] ss:$48 sps:$4 sm:$0xff]  }
  0xbf   :  { %8876 = vmatprep.subr.bf16.mxu1 %v9746_v46  ;;  %v4846_v52 = vpack.c.bf16 %v4142_v48, %v3926_v43  ;;  %v1153_v15 = vcombine.low %v1136_v7, %v1150_v8  ;;  %v1584_v43 = vcombine.high %v1561_v32, %v1575_v34  ;;  %v9778_v46 = vld [vmem:[#allocation5 + $0x3c8] sm:$0xff]   ;;  %v9818_v61 = vld [vmem:[#allocation2 + $0x730] ss:$48 sps:$4 sm:$0xff]  }
  0xc1   :  { %v4681_v21 = vpack.c.bf16 %v1153_v15, %v937_v11  ;;  %v1799_v11 = vcombine.low %v1777_v60, %v1791_v0 }
  0xc2   :  { %8877 = vmatpush3.bf16.msra.mxu1 %v9747_v50 }
  0xc3   :  { %8990 = vmatprep.subr.bf16.mxu1 %v9762_v14  ;;  %v2015_v14 = vcombine.low %v1993_v1, %v2007_v2 }
  0xc4   :  { %6673 = vmatmul.mubr.bf16.gmra.mrb[52].mxu0 %v4795_v49  ;;  %v4141_v49 = vcombine.low %v4124_v35, %v4138_v40  ;;  %v1352_v35 = vrot.slane %v9772_v26, %v10405_v37  ;;  %v1568_v40 = vrot.slane %v9774_v30, %v10405_v37  ;;  %v9800_v26 = vld [vmem:[#allocation2 + $0x550] ss:$48 sps:$4 sm:$0xff]   ;;  %v2209_v30 = vrot.slane %v9796_v24, %v10405_v37 }
  0xc5   :  { %6770 = vmatmul.mubr.bf16.gmra.mrb[52].mxu1 %v4797_v51  ;;  %6680 = vmatprep.mubr.bf16.mxu0 %v4820_v16  ;;  %v4843_v51 = vpack.c.bf16 %v4139_v44, %v3923_v41  ;;  %v1154_v16 = vcombine.high %v1136_v7, %v1150_v8  ;;  %v1582_v41 = vrot.slane %v9775_v31, %v10405_v37  ;;  %v9792_v7 = vld [vmem:[#allocation5 + $0x350] sm:$0xff]  }
  0xc6   :  { %6777 = vmatprep.mubr.bf16.mxu1 %v4822_v18  ;;  %v4845_v53 = vpack.c.bf16 %v4141_v49, %v3925_v45  ;;  %v4680_v18 = vpack.c.bf16 %v1152_v10, %v936_v6  ;;  %v1367_v44 = vcombine.low %v1345_v27, %v1359_v28  ;;  %v1583_v45 = vcombine.low %v1561_v32, %v1575_v34  ;;  %v9802_v27 = vld [vmem:[#allocation2 + $0x5b0] ss:$48 sps:$4 sm:$0xff]   ;;  %v9804_v28 = vld [vmem:[#allocation2 + $0x494] ss:$48 sps:$4 sm:$0xff]  }
  0xc7   :  { %v4682_v20 = vpack.c.bf16 %v1154_v16, %v938_v12  ;;  %v1586_v48 = vcombine.high %v1568_v40, %v1582_v41  ;;  %v1369_v49 = vcombine.low %v1352_v35, %v1366_v39  ;;  %v1585_v50 = vcombine.low %v1568_v40, %v1582_v41  ;;  %v9793_v12 = vld [vmem:[#allocation5 + $0x310] sm:$0xff]   ;;  %v9808_v40 = vld [vmem:[#allocation5 + $0x358] sm:$0xff]  }
  0xc8   :  { %v2000_v6 = vrot.slane %v9790_v63, %v10405_v37  ;;  %v1800_v8 = vcombine.high %v1777_v60, %v1791_v0  ;;  %v2014_v10 = vrot.slane %v9791_v3, %v10405_v37  ;;  %v9794_v16 = vld [vmem:[#allocation5 + $0x3d0] sm:$0xff]   ;;  %v2223_v31 = vrot.slane %v9798_v25, %v10405_v37 }
  0xc9   :  { %v4705_v55 = vpack.c.bf16 %v1585_v50, %v1369_v49  ;;  %v2425_v32 = vrot.slane %v9800_v26, %v10405_v37  ;;  %v9806_v34 = vld [vmem:[#allocation2 + $0x554] ss:$48 sps:$4 sm:$0xff]   ;;  %v9810_v50 = vld [vmem:[#allocation5 + $0x3d8] sm:$0xff]   ;;  %v9816_v60 = vld [vmem:[#allocation2 + $0x6d0] ss:$48 sps:$4 sm:$0xff]   ;;  %v2641_v63 = vrot.slane %v9812_v58, %v10405_v37  ;;  %v2655_v0 = vrot.slane %v9814_v59, %v10405_v37 }
  0xca   :  { %v2232_v41 = vcombine.high %v2209_v30, %v2223_v31  ;;  %v9823_v3 = vld [vmem:[#allocation2 + $0x734] ss:$48 sps:$4 sm:$0xff]   ;;  %v9828_v26 = vld [vmem:[#allocation2 + $0x790] ss:$48 sps:$4 sm:$0xff]  }
  0xcc   :  { %6681 = vmatmul.mubr.bf16.gmra.mrb[56].mxu0 %v4819_v17  ;;  %v9763_v17 = vld [vmem:[#allocation5 + $0x380] sm:$0xff]  }
  0xcd   :  { %6778 = vmatmul.mubr.bf16.gmra.mrb[56].mxu1 %v4821_v19  ;;  %6688 = vmatprep.mubr.bf16.mxu0 %v4844_v47  ;;  %v4679_v19 = vpack.c.bf16 %v1151_v9, %v935_v5  ;;  %v1370_v47 = vcombine.high %v1352_v35, %v1366_v39  ;;  %v1798_v5 = vrot.slane %v9789_v62, %v10405_v37  ;;  %v9807_v35 = vld [vmem:[#allocation2 + $0x5b4] ss:$48 sps:$4 sm:$0xff]  }
  0xce   :  { %6785 = vmatprep.mubr.bf16.mxu1 %v4846_v52  ;;  %v4704_v52 = vpack.c.bf16 %v1584_v43, %v1368_v38  ;;  %v2016_v9 = vcombine.high %v1993_v1, %v2007_v2  ;;  %v2216_v38 = vrot.slane %v9804_v28, %v10405_v37  ;;  %v2230_v39 = vrot.slane %v9805_v29, %v10405_v37  ;;  %v9820_v62 = vld [vmem:[#allocation2 + $0x614] ss:$48 sps:$4 sm:$0xff]   ;;  %v9832_v28 = vld [vmem:[#allocation2 + $0x850] ss:$48 sps:$4 sm:$0xff]  }
  0xcf   :  { %v4706_v54 = vpack.c.bf16 %v1586_v48, %v1370_v47  ;;  %v1801_v15 = vcombine.low %v1784_v4, %v1798_v5  ;;  %v2446_v43 = vrot.slane %v9807_v35, %v10405_v37  ;;  %v9821_v1 = vld [vmem:[#allocation2 + $0x674] ss:$48 sps:$4 sm:$0xff]   ;;  %v9834_v29 = vld [vmem:[#allocation2 + $0x8b0] ss:$48 sps:$4 sm:$0xff]  }
  0xd0   :  { %v2234_v47 = vcombine.high %v2216_v38, %v2230_v39  ;;  %v2233_v49 = vcombine.low %v2216_v38, %v2230_v39  ;;  %v9822_v2 = vld [vmem:[#allocation2 + $0x6d4] ss:$48 sps:$4 sm:$0xff]   ;;  %v3303_v38 = vrot.slane %v9834_v29, %v10405_v37  ;;  %v9862_v29 = vld [vmem:[#allocation2 + $0xaf0] ss:$48 sps:$4 sm:$0xff]  }
  0xd1   :  { %v9839_v39 = vld [vmem:[#allocation2 + $0x8b4] ss:$48 sps:$4 sm:$0xff]  }
  0xd4   :  { %6689 = vmatmul.mubr.bf16.gmra.mrb[60].mxu0 %v4843_v51  ;;  %v9779_v51 = vld [vmem:[#allocation5 + $0x388] sm:$0xff]  }
  0xd5   :  { %6786 = vmatmul.mubr.bf16.gmra.mrb[60].mxu1 %v4845_v53  ;;  %6826 = vmatprep.mubr.bf16.mxu0 %v4680_v18  ;;  %v4703_v53 = vpack.c.bf16 %v1583_v45, %v1367_v44  ;;  %v2018_v18 = vcombine.high %v2000_v6, %v2014_v10  ;;  %v2231_v44 = vcombine.low %v2209_v30, %v2223_v31  ;;  %v9809_v45 = vld [vmem:[#allocation5 + $0x318] sm:$0xff]   ;;  %v9836_v31 = vld [vmem:[#allocation2 + $0x794] ss:$48 sps:$4 sm:$0xff]  }
  0xd6   :  { %6923 = vmatprep.mubr.bf16.mxu1 %v4682_v20  ;;  %v9795_v20 = vld [vmem:[#allocation5 + $0x390] sm:$0xff]   ;;  %v3073_v30 = vrot.slane %v9828_v26, %v10405_v37 }
  0xdc   :  { %6827 = vmatmul.mubr.bf16.vlgmr.msra.gmra.mrb[64].mxu0 %v4679_v19  ;;  %v2017_v19 = vcombine.low %v2000_v6, %v2014_v10  ;;  %v2648_v6 = vrot.slane %v9820_v62, %v10405_v37  ;;  %v2864_v10 = vrot.slane %v9822_v2, %v10405_v37  ;;  %v9848_v62 = vld [vmem:[#allocation2 + $0x9d0] ss:$48 sps:$4 sm:$0xff]  }
  0xdd   :  { %6924 = vmatmul.mubr.bf16.vlgmr.msra.gmra.mrb[64].mxu1 %v4681_v21  ;;  %8927 = vmatpush3.bf16.msra.mxu0 %v9761_v13  ;;  %v1802_v13 = vcombine.high %v1784_v4, %v1798_v5  ;;  %v4727_v21 = vpack.c.bf16 %v2015_v14, %v1799_v11  ;;  %v2857_v4 = vrot.slane %v9816_v60, %v10405_v37  ;;  %v9844_v60 = vld [vmem:[#allocation2 + $0x910] ss:$48 sps:$4 sm:$0xff]  }
  0xde   :  { %8991 = vmatpush3.bf16.msra.mxu1 %v9763_v17  ;;  %8928 = vmatprep.subr.bf16.mxu0 %v9776_v36  ;;  %v4728_v17 = vpack.c.bf16 %v2016_v9, %v1800_v8  ;;  %v4729_v23 = vpack.c.bf16 %v2017_v19, %v1801_v15  ;;  %v2439_v36 = vrot.slane %v9802_v27, %v10405_v37  ;;  %v9830_v27 = vld [vmem:[#allocation2 + $0x7f0] ss:$48 sps:$4 sm:$0xff]  }
  0xdf   :  { %8992 = vmatprep.subr.bf16.mxu1 %v9778_v46  ;;  %6834 = vmatprep.mubr.bf16.mxu0 %v4704_v52  ;;  %v4730_v22 = vpack.c.bf16 %v2018_v18, %v1802_v13  ;;  %v2871_v5 = vrot.slane %v9818_v61, %v10405_v37  ;;  %v2664_v8 = vcombine.high %v2641_v63, %v2655_v0  ;;  %v9846_v61 = vld [vmem:[#allocation2 + $0x970] ss:$48 sps:$4 sm:$0xff]  }
  0xe0   :  { %6931 = vmatprep.mubr.bf16.mxu1 %v4706_v54  ;;  %v2448_v46 = vcombine.high %v2425_v32, %v2439_v36  ;;  %v2447_v48 = vcombine.low %v2425_v32, %v2439_v36  ;;  %v2662_v9 = vrot.slane %v9821_v1, %v10405_v37  ;;  %v2878_v11 = vrot.slane %v9823_v3, %v10405_v37  ;;  %v9837_v32 = vld [vmem:[#allocation2 + $0x7f4] ss:$48 sps:$4 sm:$0xff]  }
  0xe1   :  { %8929 = vmatpush3.bf16.msra.mxu0 %v9777_v42  ;;  %v2432_v42 = vrot.slane %v9806_v34, %v10405_v37  ;;  %v2880_v13 = vcombine.high %v2857_v4, %v2871_v5  ;;  %v2663_v14 = vcombine.low %v2641_v63, %v2655_v0  ;;  %v2879_v15 = vcombine.low %v2857_v4, %v2871_v5  ;;  %v9838_v34 = vld [vmem:[#allocation2 + $0x854] ss:$48 sps:$4 sm:$0xff]   ;;  %v9850_v63 = vld [vmem:[#allocation2 + $0xa30] ss:$48 sps:$4 sm:$0xff]  }
  0xe2   :  { %8993 = vmatpush3.bf16.msra.mxu1 %v9779_v51  ;;  %8930 = vmatprep.subr.bf16.mxu0 %v9792_v7  ;;  %v4752_v54 = vpack.c.bf16 %v2448_v46, %v2232_v41  ;;  %v9824_v7 = vld [vmem:[#allocation5 + $0x360] sm:$0xff]   ;;  %v2882_v18 = vcombine.high %v2864_v10, %v2878_v11  ;;  %v2665_v19 = vcombine.low %v2648_v6, %v2662_v9 }
  0xe3   :  { %8994 = vmatprep.subr.bf16.mxu1 %v9794_v16  ;;  %v2450_v51 = vcombine.high %v2432_v42, %v2446_v43  ;;  %v2449_v52 = vcombine.low %v2432_v42, %v2446_v43  ;;  %v9826_v16 = vld [vmem:[#allocation5 + $0x3e0] sm:$0xff]   ;;  %v3087_v35 = vrot.slane %v9830_v27, %v10405_v37  ;;  %v3289_v36 = vrot.slane %v9832_v28, %v10405_v37  ;;  %v9840_v43 = vld [vmem:[#allocation5 + $0x368] sm:$0xff]  }
  0xe4   :  { %6835 = vmatmul.mubr.bf16.gmra.mrb[68].mxu0 %v4703_v53  ;;  %v9811_v53 = vld [vmem:[#allocation5 + $0x398] sm:$0xff]   ;;  %v3094_v41 = vrot.slane %v9837_v32, %v10405_v37  ;;  %v3296_v42 = vrot.slane %v9838_v34, %v10405_v37  ;;  %v3310_v46 = vrot.slane %v9839_v39, %v10405_v37  ;;  %v9852_v0 = vld [vmem:[#allocation2 + $0x914] ss:$48 sps:$4 sm:$0xff]   ;;  %v3505_v2 = vrot.slane %v9844_v60, %v10405_v37  ;;  %v9860_v28 = vld [vmem:[#allocation2 + $0xa90] ss:$48 sps:$4 sm:$0xff]  }
  0xe5   :  { %6932 = vmatmul.mubr.bf16.gmra.mrb[68].mxu1 %v4705_v55  ;;  %8931 = vmatpush3.bf16.msra.mxu0 %v9793_v12  ;;  %v4751_v55 = vpack.c.bf16 %v2447_v48, %v2231_v44  ;;  %v4754_v56 = vpack.c.bf16 %v2450_v51, %v2234_v47  ;;  %v4753_v57 = vpack.c.bf16 %v2449_v52, %v2233_v49  ;;  %v9825_v12 = vld [vmem:[#allocation5 + $0x320] sm:$0xff]   ;;  %v9841_v48 = vld [vmem:[#allocation5 + $0x328] sm:$0xff]  }
  0xe6   :  { %6842 = vmatprep.mubr.bf16.mxu0 %v4728_v17  ;;  %8995 = vmatpush3.bf16.msra.mxu1 %v9795_v20  ;;  %v2666_v17 = vcombine.high %v2648_v6, %v2662_v9  ;;  %v2881_v20 = vcombine.low %v2864_v10, %v2878_v11  ;;  %v3096_v44 = vcombine.high %v3073_v30, %v3087_v35  ;;  %v9842_v52 = vld [vmem:[#allocation5 + $0x3e8] sm:$0xff]   ;;  %v9853_v1 = vld [vmem:[#allocation2 + $0x974] ss:$48 sps:$4 sm:$0xff]  }
  0xe7   :  { %6939 = vmatprep.mubr.bf16.mxu1 %v4730_v22  ;;  %8932 = vmatprep.subr.bf16.mxu0 %v9808_v40  ;;  %v4776_v22 = vpack.c.bf16 %v2880_v13, %v2664_v8  ;;  %v3080_v40 = vrot.slane %v9836_v31, %v10405_v37  ;;  %v3095_v47 = vcombine.low %v3073_v30, %v3087_v35  ;;  %v9854_v5 = vld [vmem:[#allocation2 + $0x9d4] ss:$48 sps:$4 sm:$0xff]   ;;  %v9864_v30 = vld [vmem:[#allocation2 + $0xb50] ss:$48 sps:$4 sm:$0xff]  }
  0xe8   :  { %8996 = vmatprep.subr.bf16.mxu1 %v9810_v50  ;;  %v4778_v24 = vpack.c.bf16 %v2882_v18, %v2666_v17  ;;  %v4777_v25 = vpack.c.bf16 %v2881_v20, %v2665_v19  ;;  %v3311_v50 = vcombine.low %v3289_v36, %v3303_v38  ;;  %v3519_v3 = vrot.slane %v9846_v61, %v10405_v37  ;;  %v9855_v6 = vld [vmem:[#allocation2 + $0xa34] ss:$48 sps:$4 sm:$0xff]   ;;  %v9866_v31 = vld [vmem:[#allocation2 + $0xbb0] ss:$48 sps:$4 sm:$0xff]  }
  0xe9   :  { %8933 = vmatpush3.bf16.msra.mxu0 %v9809_v45  ;;  %v3312_v45 = vcombine.high %v3289_v36, %v3303_v38  ;;  %v3098_v49 = vcombine.high %v3080_v40, %v3094_v41  ;;  %v3097_v51 = vcombine.low %v3080_v40, %v3094_v41  ;;  %v3721_v4 = vrot.slane %v9848_v62, %v10405_v37  ;;  %v9856_v10 = vld [vmem:[#allocation5 + $0x370] sm:$0xff]  }
  0xea   :  { %8997 = vmatpush3.bf16.msra.mxu1 %v9811_v53  ;;  %8934 = vmatprep.subr.bf16.mxu0 %v9824_v7  ;;  %v3735_v7 = vrot.slane %v9850_v63, %v10405_v37  ;;  %v3512_v8 = vrot.slane %v9852_v0, %v10405_v37  ;;  %v3526_v9 = vrot.slane %v9853_v1, %v10405_v37  ;;  %v9858_v20 = vld [vmem:[#allocation5 + $0x3f0] sm:$0xff]  }
  0xeb   :  { %8998 = vmatprep.subr.bf16.mxu1 %v9826_v16  ;;  %v4800_v53 = vpack.c.bf16 %v3312_v45, %v3096_v44  ;;  %v3528_v11 = vcombine.high %v3505_v2, %v3519_v3  ;;  %v3742_v13 = vrot.slane %v9855_v6, %v10405_v37  ;;  %v9868_v32 = vld [vmem:[#allocation2 + $0xa94] ss:$48 sps:$4 sm:$0xff]   ;;  %v3937_v34 = vrot.slane %v9860_v28, %v10405_v37  ;;  %v9878_v6 = vld [vmem:[#allocation2 + $0x78] ss:$48 sps:$4 sm:$0xff]  }
  0xec   :  { %6843 = vmatmul.mubr.bf16.gmra.mrb[72].mxu0 %v4727_v21  ;;  %v9827_v21 = vld [vmem:[#allocation5 + $0x3a0] sm:$0xff]   ;;  %v3744_v16 = vcombine.high %v3721_v4, %v3735_v7  ;;  %v3530_v17 = vcombine.high %v3512_v8, %v3526_v9  ;;  %v3743_v18 = vcombine.low %v3721_v4, %v3735_v7  ;;  %v3529_v19 = vcombine.low %v3512_v8, %v3526_v9  ;;  %v9880_v7 = vld [vmem:[#allocation2 + $0xd8] ss:$48 sps:$4 sm:$0xff]  }
  0xed   :  { %6940 = vmatmul.mubr.bf16.gmra.mrb[72].mxu1 %v4729_v23  ;;  %6850 = vmatprep.mubr.bf16.mxu0 %v4752_v54  ;;  %v4775_v23 = vpack.c.bf16 %v2879_v15, %v2663_v14  ;;  %v3314_v54 = vcombine.high %v3296_v42, %v3310_v46  ;;  %v3527_v14 = vcombine.low %v3505_v2, %v3519_v3  ;;  %v9857_v15 = vld [vmem:[#allocation5 + $0x330] sm:$0xff]   ;;  %v9876_v3 = vld [vmem:[#allocation2 + $0x18] ss:$48 sps:$4 sm:$0xff]  }
  0xee   :  { %6947 = vmatprep.mubr.bf16.mxu1 %v4754_v56  ;;  %8935 = vmatpush3.bf16.msra.mxu0 %v9825_v12  ;;  %v9843_v56 = vld [vmem:[#allocation5 + $0x3a8] sm:$0xff]   ;;  %v3728_v12 = vrot.slane %v9854_v5, %v10405_v37  ;;  %v3951_v35 = vrot.slane %v9862_v29, %v10405_v37  ;;  %v9869_v36 = vld [vmem:[#allocation2 + $0xaf4] ss:$48 sps:$4 sm:$0xff]   ;;  %v4153_v40 = vrot.slane %v9864_v30, %v10405_v37 }
  0xef   :  { %8999 = vmatpush3.bf16.msra.mxu1 %v9827_v21  ;;  %8936 = vmatprep.subr.bf16.mxu0 %v9840_v43  ;;  %v4802_v58 = vpack.c.bf16 %v3314_v54, %v3098_v49  ;;  %v9870_v38 = vld [vmem:[#allocation2 + $0xb54] ss:$48 sps:$4 sm:$0xff]   ;;  %v4167_v41 = vrot.slane %v9866_v31, %v10405_v37  ;;  %v9872_v43 = vld [vmem:[#allocation5 + $0x378] sm:$0xff]   ;;  %v3958_v45 = vrot.slane %v9869_v36, %v10405_v37 }
  0xf0   :  { %9000 = vmatprep.subr.bf16.mxu1 %v9842_v52  ;;  %v3746_v21 = vcombine.high %v3728_v12, %v3742_v13  ;;  %v9871_v39 = vld [vmem:[#allocation2 + $0xbb4] ss:$48 sps:$4 sm:$0xff]   ;;  %v3960_v44 = vcombine.high %v3937_v34, %v3951_v35  ;;  %v9874_v52 = vld [vmem:[#allocation5 + $0x3f8] sm:$0xff]  }
  0xf1   :  { %v4176_v49 = vcombine.high %v4153_v40, %v4167_v41  ;;  %v9882_v8 = vld [vmem:[#allocation2 + $0x138] ss:$48 sps:$4 sm:$0xff]  }
  0xf2   :  { %8937 = vmatpush3.bf16.msra.mxu0 %v9841_v48  ;;  %v4826_v26 = vpack.c.bf16 %v3746_v21, %v3530_v17  ;;  %v9873_v48 = vld [vmem:[#allocation5 + $0x338] sm:$0xff]   ;;  %v1179_v17 = vrot.slane %v9882_v8, %v10405_v37  ;;  %v9905_v8 = vld [vmem:[#allocation5 + $0x408] sm:$0xff]  }
  0xf3   :  { %9001 = vmatpush3.bf16.msra.mxu1 %v9843_v56  ;;  %8938 = vmatprep.subr.bf16.mxu0 %v9856_v10 }
  0xf4   :  { %6851 = vmatmul.mubr.bf16.gmra.mrb[76].mxu0 %v4751_v55  ;;  %v3313_v55 = vcombine.low %v3296_v42, %v3310_v46  ;;  %9002 = vmatprep.subr.bf16.mxu1 %v9858_v20  ;;  %v3944_v42 = vrot.slane %v9868_v32, %v10405_v37  ;;  %v4160_v46 = vrot.slane %v9870_v38, %v10405_v37  ;;  %v9890_v32 = vld [vmem:[#allocation5 + $0x4c0] sm:$0xff]  }
  0xf5   :  { %6948 = vmatmul.mubr.bf16.gmra.mrb[76].mxu1 %v4753_v57  ;;  %6858 = vmatprep.mubr.bf16.mxu0 %v4776_v22  ;;  %v4799_v57 = vpack.c.bf16 %v3311_v50, %v3095_v47  ;;  %v3745_v22 = vcombine.low %v3728_v12, %v3742_v13  ;;  %v4174_v47 = vrot.slane %v9871_v39, %v10405_v37  ;;  %v9884_v12 = vld [vmem:[#allocation2 + $0x1c] ss:$48 sps:$4 sm:$0xff]   ;;  %v9889_v38 = vld [vmem:[#allocation5 + $0x400] sm:$0xff]  }
  0xf6   :  { %6955 = vmatprep.mubr.bf16.mxu1 %v4778_v24  ;;  %v4801_v59 = vpack.c.bf16 %v3313_v55, %v3097_v51  ;;  %8939 = vmatpush3.bf16.msra.mxu0 %v9857_v15  ;;  %v4824_v24 = vpack.c.bf16 %v3744_v16, %v3528_v11  ;;  %v3959_v50 = vcombine.low %v3937_v34, %v3951_v35  ;;  %v9885_v13 = vld [vmem:[#allocation2 + $0x7c] ss:$48 sps:$4 sm:$0xff]  }
  0xf7   :  { %v4825_v27 = vpack.c.bf16 %v3745_v22, %v3529_v19  ;;  %v4175_v51 = vcombine.low %v4153_v40, %v4167_v41  ;;  %8940 = vmatprep.subr.bf16.mxu0 %v9872_v43  ;;  %v4178_v54 = vcombine.high %v4160_v46, %v4174_v47  ;;  %v3961_v55 = vcombine.low %v3944_v42, %v3958_v45  ;;  %v9888_v22 = vld [vmem:[#allocation5 + $0x440] sm:$0xff]  }
  0xf8   :  { %v4177_v56 = vcombine.low %v4160_v46, %v4174_v47  ;;  %v949_v11 = vrot.slane %v9876_v3, %v10405_v37  ;;  %v963_v15 = vrot.slane %v9878_v6, %v10405_v37  ;;  %v1165_v16 = vrot.slane %v9880_v7, %v10405_v37 }
  0xf9   :  { %v4847_v60 = vpack.c.bf16 %v4175_v51, %v3959_v50  ;;  %v956_v19 = vrot.slane %v9884_v12, %v10405_v37  ;;  %v970_v20 = vrot.slane %v9885_v13, %v10405_v37  ;;  %v9892_v50 = vld [vmem:[#allocation2 + $0x198] ss:$48 sps:$4 sm:$0xff]  }
  0xfa   :  { %8941 = vmatpush3.bf16.msra.mxu0 %v9873_v48  ;;  %v4849_v63 = vpack.c.bf16 %v4177_v56, %v3961_v55  ;;  %v9894_v51 = vld [vmem:[#allocation2 + $0x1f8] ss:$48 sps:$4 sm:$0xff]   ;;  %v9900_v55 = vld [vmem:[#allocation2 + $0x19c] ss:$48 sps:$4 sm:$0xff]  }
  0xfb   :  { %v973_v29 = vcombine.low %v956_v19, %v970_v20  ;;  %v974_v30 = vcombine.high %v956_v19, %v970_v20  ;;  %9054 = vmatprep.subr.bf16.mxu0 %v9888_v22  ;;  %v9901_v56 = vld [vmem:[#allocation2 + $0x1fc] ss:$48 sps:$4 sm:$0xff]  }
  0xfc   :  { %6859 = vmatmul.mubr.bf16.gmra.mrb[80].mxu0 %v4775_v23  ;;  %v9859_v23 = vld [vmem:[#allocation5 + $0x3b0] sm:$0xff]   ;;  %v9907_v20 = vld [vmem:[#allocation5 + $0x488] sm:$0xff]  }
  0xfd   :  { %6956 = vmatmul.mubr.bf16.gmra.mrb[80].mxu1 %v4777_v25  ;;  %6866 = vmatprep.mubr.bf16.mxu0 %v4800_v53  ;;  %v4823_v25 = vpack.c.bf16 %v3743_v18, %v3527_v14  ;;  %v3962_v53 = vcombine.high %v3944_v42, %v3958_v45  ;;  %v9886_v14 = vld [vmem:[#allocation2 + $0xdc] ss:$48 sps:$4 sm:$0xff]   ;;  %v9891_v42 = vld [vmem:[#allocation5 + $0x480] sm:$0xff]  }
  0xfe   :  { %6963 = vmatprep.mubr.bf16.mxu1 %v4802_v58  ;;  %9003 = vmatpush3.bf16.msra.mxu1 %v9859_v23  ;;  %v9887_v18 = vld [vmem:[#allocation2 + $0x13c] ss:$48 sps:$4 sm:$0xff]   ;;  %v1172_v21 = vrot.slane %v9886_v14, %v10405_v37 }
  0xff   :  { %9004 = vmatprep.subr.bf16.mxu1 %v9874_v52  ;;  %v4850_v62 = vpack.c.bf16 %v4178_v54, %v3962_v53  ;;  %v1186_v31 = vrot.slane %v9887_v18, %v10405_v37  ;;  %v9896_v52 = vld [vmem:[#allocation2 + $0x258] ss:$48 sps:$4 sm:$0xff]  }
 0x100   :  { %v9898_v54 = vld [vmem:[#allocation2 + $0x2b8] ss:$48 sps:$4 sm:$0xff]  }
 0x101   :  { %v1189_v40 = vcombine.low %v1172_v21, %v1186_v31  ;;  %v1190_v41 = vcombine.high %v1172_v21, %v1186_v31 }
 0x103   :  { %v4686_v48 = vpack.c.bf16 %v1190_v41, %v974_v30  ;;  %v9914_v41 = vld [vmem:[#allocation2 + $0x438] ss:$48 sps:$4 sm:$0xff]  }
 0x104   :  { %6867 = vmatmul.mubr.bf16.gmra.mrb[84].mxu0 %v4799_v57  ;;  %v9875_v57 = vld [vmem:[#allocation5 + $0x3b8] sm:$0xff]  }
 0x105   :  { %6964 = vmatmul.mubr.bf16.gmra.mrb[84].mxu1 %v4801_v59  ;;  %6874 = vmatprep.mubr.bf16.mxu0 %v4824_v24  ;;  %v4848_v59 = vpack.c.bf16 %v4176_v49, %v3960_v44  ;;  %v971_v24 = vcombine.low %v949_v11, %v963_v15  ;;  %v4685_v49 = vpack.c.bf16 %v1189_v40, %v973_v29  ;;  %v9912_v40 = vld [vmem:[#allocation2 + $0x3d8] ss:$48 sps:$4 sm:$0xff]  }
 0x106   :  { %6971 = vmatprep.mubr.bf16.mxu1 %v4826_v26  ;;  %9005 = vmatpush3.bf16.msra.mxu1 %v9875_v57  ;;  %v1187_v26 = vcombine.low %v1165_v16, %v1179_v17  ;;  %v1381_v57 = vrot.slane %v9892_v50, %v10405_v37  ;;  %v2043_v50 = vrot.slane %v9914_v41, %v10405_v37 }
 0x107   :  { %9118 = vmatprep.subr.bf16.mxu1 %v9890_v32 }
 0x108   :  { %v4683_v36 = vpack.c.bf16 %v1187_v26, %v971_v24 }
 0x10c   :  { %6875 = vmatmul.mubr.bf16.gmra.mrb[88].mxu0 %v4823_v25  ;;  %v972_v25 = vcombine.high %v949_v11, %v963_v15 }
 0x10d   :  { %6972 = vmatmul.mubr.bf16.gmra.mrb[88].mxu1 %v4825_v27  ;;  %6882 = vmatprep.mubr.bf16.mxu0 %v4848_v59  ;;  %v1188_v27 = vcombine.high %v1165_v16, %v1179_v17  ;;  %v1597_v59 = vrot.slane %v9896_v52, %v10405_v37  ;;  %v9906_v16 = vld [vmem:[#allocation5 + $0x4c8] sm:$0xff]   ;;  %v9920_v52 = vld [vmem:[#allocation5 + $0x450] sm:$0xff]  }
 0x10e   :  { %6979 = vmatprep.mubr.bf16.mxu1 %v4850_v62  ;;  %v1611_v62 = vrot.slane %v9898_v54, %v10405_v37 }
 0x10f   :  { %v4684_v35 = vpack.c.bf16 %v1188_v27, %v972_v25 }
 0x110   :  { %v1620_v12 = vcombine.high %v1597_v59, %v1611_v62  ;;  %v1619_v14 = vcombine.low %v1597_v59, %v1611_v62  ;;  %v9921_v59 = vld [vmem:[#allocation5 + $0x410] sm:$0xff]  }
 0x114   :  { %6883 = vmatmul.mubr.bf16.gmra.mrb[92].mxu0 %v4847_v60  ;;  %v9902_v60 = vld [vmem:[#allocation2 + $0x25c] ss:$48 sps:$4 sm:$0xff]  }
 0x115   :  { %6980 = vmatmul.mubr.bf16.gmra.mrb[92].mxu1 %v4849_v63  ;;  %7020 = vmatprep.mubr.bf16.mxu0 %v4684_v35  ;;  %v1388_v63 = vrot.slane %v9900_v55, %v10405_v37  ;;  %v9908_v35 = vld [vmem:[#allocation2 + $0x318] ss:$48 sps:$4 sm:$0xff]  }
 0x116   :  { %7117 = vmatprep.mubr.bf16.mxu1 %v4686_v48  ;;  %v9919_v48 = vld [vmem:[#allocation2 + $0x43c] ss:$48 sps:$4 sm:$0xff]  }
 0x11c   :  { %7021 = vmatmul.mubr.bf16.vlgmr.msra.gmra.mrb[96].mxu0 %v4683_v36  ;;  %v9910_v36 = vld [vmem:[#allocation2 + $0x378] ss:$48 sps:$4 sm:$0xff]  }
 0x11d   :  { %9055 = vmatpush3.bf16.msra.mxu0 %v9889_v38  ;;  %7118 = vmatmul.mubr.bf16.vlgmr.msra.gmra.mrb[96].mxu1 %v4685_v49  ;;  %v2029_v49 = vrot.slane %v9912_v40, %v10405_v37 }
 0x11e   :  { %9119 = vmatpush3.bf16.msra.mxu1 %v9891_v42  ;;  %v9916_v42 = vld [vmem:[#allocation2 + $0x31c] ss:$48 sps:$4 sm:$0xff]  }
 0x11f   :  { %9120 = vmatprep.subr.bf16.mxu1 %v9906_v16 }
 0x122   :  { %9121 = vmatpush3.bf16.msra.mxu1 %v9907_v20 }
 0x12f   :  { %v8558_v58 = vpop.f32.mrb[0].mxu0 }
 0x130   :  { %v8559_v61 = vpop.f32.mrb[1].mxu0  ;;  %v8622_v0 = vpop.f32.mrb[0].mxu1 }
 0x131   :  { %v10599_v1 = vadd.f32 %v8559_v61, %v8558_v58  ;;  %v8561_v2 = vpop.f32.mrb[2].mxu0  ;;  %v8623_v4 = vpop.f32.mrb[1].mxu1  ;;  %v1395_v58 = vrot.slane %v9894_v51, %v10405_v37  ;;  %v9903_v61 = vld [vmem:[#allocation2 + $0x2bc] ss:$48 sps:$4 sm:$0xff]   ;;  %v1820_v51 = vrot.slane %v9916_v42, %v10405_v37 }
 0x132   :  { %v8562_v5 = vpop.f32.mrb[3].mxu0  ;;  %v10601_v9 = vadd.f32 %v8623_v4, %v8622_v0  ;;  %v8625_v23 = vpop.f32.mrb[2].mxu1  ;;  %v1402_v0 = vrot.slane %v9901_v56, %v10405_v37  ;;  %v1618_v6 = vrot.slane %v9903_v61, %v10405_v37  ;;  %v2052_v61 = vcombine.high %v2029_v49, %v2043_v50 }
 0x133   :  { %v10603_v10 = vadd.f32 %v8562_v5, %v8561_v2  ;;  %v8626_v28 = vpop.f32.mrb[3].mxu1  ;;  %v9904_v2 = vld [vmem:[#allocation5 + $0x448] sm:$0xff]   ;;  %v1404_v4 = vcombine.high %v1381_v57, %v1395_v58  ;;  %v1604_v5 = vrot.slane %v9902_v60, %v10405_v37  ;;  %v1403_v7 = vcombine.low %v1381_v57, %v1395_v58 }
 0x134   :  { %v10613_v34 = vadd.f32 %v8626_v28, %v8625_v23  ;;  %v1406_v13 = vcombine.high %v1388_v63, %v1402_v0  ;;  %v1405_v15 = vcombine.low %v1388_v63, %v1402_v0  ;;  %9056 = vmatprep.subr.bf16.mxu0 %v9904_v2  ;;  %v2050_v58 = vrot.slane %v9919_v48, %v10405_v37  ;;  %v9922_v0 = vld [vmem:[#allocation5 + $0x4d0] sm:$0xff]  }
 0x135   :  { %v1622_v18 = vcombine.high %v1604_v5, %v1618_v6  ;;  %v1621_v19 = vcombine.low %v1604_v5, %v1618_v6  ;;  %9057 = vmatpush3.bf16.msra.mxu0 %v9905_v8  ;;  %v4708_v24 = vpack.c.bf16 %v1620_v12, %v1404_v4  ;;  %v4707_v25 = vpack.c.bf16 %v1619_v14, %v1403_v7  ;;  %v9923_v7 = vld [vmem:[#allocation5 + $0x490] sm:$0xff]  }
 0x136   :  { %v2051_v63 = vcombine.low %v2029_v49, %v2043_v50  ;;  %9058 = vmatprep.subr.bf16.mxu0 %v9920_v52  ;;  %9122 = vmatprep.subr.bf16.mxu1 %v9922_v0 }
 0x137   :  { %v8564_v39 = vpop.f32.mrb[4].mxu0  ;;  %v4710_v28 = vpack.c.bf16 %v1622_v18, %v1406_v13  ;;  %v4709_v29 = vpack.c.bf16 %v1621_v19, %v1405_v15  ;;  %7028 = vmatprep.mubr.bf16.mxu0 %v4708_v24  ;;  %v10644_v13 = vld [vmem:[%s11330_s2] ss:$0 sm:$0xff]  ;;  %9123 = vmatpush3.bf16.msra.mxu1 %v9923_v7 }
 0x138   :  { %v8628_v43 = vpop.f32.mrb[4].mxu1  ;;  %v8565_v44 = vpop.f32.mrb[5].mxu0  ;;  %7029 = vmatmul.mubr.bf16.gmra.mrb[100].mxu0 %v4707_v25  ;;  %v6441_v18 = vadd.f32 %v10599_v1, %v10644_v13  ;;  %v6444_v19 = vadd.f32 %v10603_v10, %v10644_v13 }
 0x139   :  { %v10615_v45 = vadd.f32 %v8565_v44, %v8564_v39  ;;  %v8629_v46 = vpop.f32.mrb[5].mxu1  ;;  %v8567_v47 = vpop.f32.mrb[6].mxu0  ;;  %7125 = vmatprep.mubr.bf16.mxu1 %v4710_v28  ;;  %v1827_v44 = vrot.slane %v9910_v36, %v10405_v37  ;;  %9059 = vmatpush3.bf16.msra.mxu0 %v9921_v59  ;;  %v9932_v36 = vld [vmem:[#allocation2 + $0x49c] ss:$48 sps:$4 sm:$0xff]  }
 0x13a   :  { %v10617_v53 = vadd.f32 %v8629_v46, %v8628_v43  ;;  %v8631_v3 = vpop.f32.mrb[6].mxu1  ;;  %v8568_v11 = vpop.f32.mrb[7].mxu0  ;;  %7126 = vmatmul.mubr.bf16.gmra.mrb[100].mxu1 %v4709_v29  ;;  %v1813_v43 = vrot.slane %v9908_v35, %v10405_v37  ;;  %v9917_v46 = vld [vmem:[#allocation2 + $0x37c] ss:$48 sps:$4 sm:$0xff]   ;;  %v10657_v1 = vadd.f32 %v10601_v9, %v6441_v18  ;;  %v10660_v10 = vadd.f32 %v10613_v34, %v6444_v19 }
 0x13b   :  { %v8632_v17 = vpop.f32.mrb[7].mxu1  ;;  %v10627_v21 = vadd.f32 %v8568_v11, %v8567_v47  ;;  %v9918_v47 = vld [vmem:[#allocation2 + $0x3dc] ss:$48 sps:$4 sm:$0xff]   ;;  %v1834_v56 = vrot.slane %v9917_v46, %v10405_v37  ;;  %v6449_v24 = vadd.f32 %v10615_v45, %v10644_v13  ;;  %v9928_v45 = vld [vmem:[#allocation2 + $0x558] ss:$48 sps:$4 sm:$0xff]  }
 0x13c   :  { %v10629_v22 = vadd.f32 %v8632_v17, %v8631_v3  ;;  %v1836_v55 = vcombine.high %v1813_v43, %v1827_v44  ;;  %v2036_v57 = vrot.slane %v9918_v47, %v10405_v37  ;;  %v1835_v62 = vcombine.low %v1813_v43, %v1827_v44  ;;  %v9934_v44 = vld [vmem:[#allocation2 + $0x55c] ss:$48 sps:$4 sm:$0xff]  }
 0x13d   :  { %v1838_v3 = vcombine.high %v1820_v51, %v1834_v56  ;;  %v1837_v5 = vcombine.low %v1820_v51, %v1834_v56  ;;  %v6452_v25 = vadd.f32 %v10627_v21, %v10644_v13  ;;  %v9930_v21 = vld [vmem:[#allocation2 + $0x5b8] ss:$48 sps:$4 sm:$0xff]   ;;  %v2461_v43 = vrot.slane %v9928_v45, %v10405_v37  ;;  %v9935_v46 = vld [vmem:[#allocation2 + $0x5bc] ss:$48 sps:$4 sm:$0xff]  }
 0x13e   :  { %v2054_v4 = vcombine.high %v2036_v57, %v2050_v58  ;;  %v2053_v6 = vcombine.low %v2036_v57, %v2050_v58  ;;  %v4732_v11 = vpack.c.bf16 %v2052_v61, %v1836_v55  ;;  %v4731_v12 = vpack.c.bf16 %v2051_v63, %v1835_v62  ;;  %v9937_v56 = vld [vmem:[#allocation5 + $0x418] sm:$0xff]  }
 0x13f   :  { %v8570_v23 = vpop.f32.mrb[8].mxu0  ;;  %v10666_v40 = vadd.f32 %v10629_v22, %v6452_v25  ;;  %v2252_v22 = vrot.slane %v9932_v36, %v10405_v37  ;;  %v2468_v52 = vrot.slane %v9934_v44, %v10405_v37  ;;  %v9938_v62 = vld [vmem:[#allocation5 + $0x4d8] sm:$0xff]  }
 0x140   :  { %v8634_v26 = vpop.f32.mrb[8].mxu1  ;;  %v8571_v27 = vpop.f32.mrb[9].mxu0  ;;  %v4734_v16 = vpack.c.bf16 %v2054_v4, %v1838_v3  ;;  %v4733_v17 = vpack.c.bf16 %v2053_v6, %v1837_v5  ;;  %7036 = vmatprep.mubr.bf16.mxu0 %v4732_v11  ;;  %9124 = vmatprep.subr.bf16.mxu1 %v9938_v62  ;;  %v9951_v36 = vld [vmem:[#allocation2 + $0x73c] ss:$48 sps:$4 sm:$0xff]  }
 0x141   :  { %v8572_v30 = vadd.f32 %v8571_v27, %v8570_v23  ;;  %v8635_v31 = vpop.f32.mrb[9].mxu1  ;;  %v8573_v32 = vpop.f32.mrb[10].mxu0  ;;  %7037 = vmatmul.mubr.bf16.gmra.mrb[104].mxu0 %v4731_v12 }
 0x142   :  { %v10631_v38 = vadd.f32 %v8635_v31, %v8634_v26  ;;  %v8637_v39 = vpop.f32.mrb[10].mxu1  ;;  %v8574_v54 = vpop.f32.mrb[11].mxu0  ;;  %7133 = vmatprep.mubr.bf16.mxu1 %v4734_v16  ;;  %v9924_v31 = vld [vmem:[#allocation2 + $0x498] ss:$48 sps:$4 sm:$0xff]  }
 0x143   :  { %v8638_v60 = vpop.f32.mrb[11].mxu1  ;;  %v8575_v2 = vadd.f32 %v8574_v54, %v8573_v32  ;;  %v6457_v26 = vadd.f32 %v8572_v30, %v10644_v13  ;;  %v9926_v32 = vld [vmem:[#allocation2 + $0x4f8] ss:$48 sps:$4 sm:$0xff]   ;;  %7134 = vmatmul.mubr.bf16.gmra.mrb[104].mxu1 %v4733_v17  ;;  %v9933_v30 = vld [vmem:[#allocation2 + $0x4fc] ss:$48 sps:$4 sm:$0xff]   ;;  %v2245_v34 = vrot.slane %v9924_v31, %v10405_v37  ;;  %v2482_v54 = vrot.slane %v9935_v46, %v10405_v37 }
 0x144   :  { %v8639_v14 = vadd.f32 %v8638_v60, %v8637_v39  ;;  %v10663_v39 = vadd.f32 %v10617_v53, %v6449_v24  ;;  %v2259_v42 = vrot.slane %v9926_v32, %v10405_v37  ;;  %v2475_v53 = vrot.slane %v9930_v21, %v10405_v37  ;;  %v9942_v24 = vld [vmem:[#allocation2 + $0x678] ss:$48 sps:$4 sm:$0xff]   ;;  %v9950_v21 = vld [vmem:[#allocation2 + $0x6dc] ss:$48 sps:$4 sm:$0xff]  }
 0x145   :  { %v6460_v27 = vadd.f32 %v8575_v2, %v10644_v13  ;;  %v10669_v9 = vadd.f32 %v10631_v38, %v6457_v26  ;;  %v2266_v48 = vrot.slane %v9933_v30, %v10405_v37  ;;  %v9936_v38 = vld [vmem:[#allocation5 + $0x458] sm:$0xff]   ;;  %v2486_v63 = vcombine.high %v2468_v52, %v2482_v54 }
 0x146   :  { %v2268_v51 = vcombine.high %v2245_v34, %v2259_v42  ;;  %v2267_v55 = vcombine.low %v2245_v34, %v2259_v42  ;;  %v2484_v58 = vcombine.high %v2461_v43, %v2475_v53  ;;  %v2483_v60 = vcombine.low %v2461_v43, %v2475_v53  ;;  %9060 = vmatprep.subr.bf16.mxu0 %v9936_v38  ;;  %v9939_v2 = vld [vmem:[#allocation5 + $0x498] sm:$0xff]   ;;  %v9952_v43 = vld [vmem:[#allocation5 + $0x460] sm:$0xff]  }
 0x147   :  { %v8576_v8 = vpop.f32.mrb[12].mxu0  ;;  %v10671_v41 = vadd.f32 %v8639_v14, %v6460_v27  ;;  %v2270_v59 = vcombine.high %v2252_v22, %v2266_v48  ;;  %v2269_v61 = vcombine.low %v2252_v22, %v2266_v48  ;;  %v2485_v0 = vcombine.low %v2468_v52, %v2482_v54  ;;  %9061 = vmatpush3.bf16.msra.mxu0 %v9937_v56  ;;  %v9944_v26 = vld [vmem:[#allocation2 + $0x6d8] ss:$48 sps:$4 sm:$0xff]   ;;  %v9953_v38 = vld [vmem:[#allocation5 + $0x420] sm:$0xff]  }
 0x148   :  { %v8577_v15 = vpop.f32.mrb[13].mxu0  ;;  %v8640_v20 = vpop.f32.mrb[12].mxu1  ;;  %v4756_v6 = vpack.c.bf16 %v2484_v58, %v2268_v51  ;;  %v4755_v7 = vpack.c.bf16 %v2483_v60, %v2267_v55  ;;  %9125 = vmatpush3.bf16.msra.mxu1 %v9939_v2  ;;  %v9946_v27 = vld [vmem:[#allocation2 + $0x738] ss:$48 sps:$4 sm:$0xff]   ;;  %v2691_v45 = vrot.slane %v9942_v24, %v10405_v37  ;;  %v2893_v30 = vrot.slane %v9944_v26, %v10405_v37  ;;  %v9954_v54 = vld [vmem:[#allocation5 + $0x4e0] sm:$0xff]  }
 0x149   :  { %v8579_v23 = vpop.f32.mrb[14].mxu0  ;;  %v8641_v28 = vpop.f32.mrb[13].mxu1  ;;  %v8578_v35 = vadd.f32 %v8577_v15, %v8576_v8  ;;  %v4758_v14 = vpack.c.bf16 %v2486_v63, %v2270_v59  ;;  %v4757_v15 = vpack.c.bf16 %v2485_v0, %v2269_v61  ;;  %v2907_v34 = vrot.slane %v9946_v27, %v10405_v37  ;;  %9062 = vmatprep.subr.bf16.mxu0 %v9952_v43  ;;  %v9955_v60 = vld [vmem:[#allocation5 + $0x4a0] sm:$0xff]   ;;  %v9962_v24 = vld [vmem:[#allocation2 + $0x8b8] ss:$48 sps:$4 sm:$0xff]  }
 0x14a   :  { %v8580_v29 = vpop.f32.mrb[15].mxu0  ;;  %v8642_v49 = vadd.f32 %v8641_v28, %v8640_v20  ;;  %v8643_v50 = vpop.f32.mrb[14].mxu1  ;;  %7044 = vmatprep.mubr.bf16.mxu0 %v4756_v6  ;;  %v9940_v20 = vld [vmem:[#allocation2 + $0x618] ss:$48 sps:$4 sm:$0xff]   ;;  %v9948_v28 = vld [vmem:[#allocation2 + $0x61c] ss:$48 sps:$4 sm:$0xff]   ;;  %v2900_v22 = vrot.slane %v9950_v21, %v10405_v37  ;;  %v2914_v48 = vrot.slane %v9951_v36, %v10405_v37  ;;  %9126 = vmatprep.subr.bf16.mxu1 %v9954_v54 }
 0x14b   :  { %v6465_v47 = vadd.f32 %v8578_v35, %v10644_v13  ;;  %v8644_v57 = vpop.f32.mrb[15].mxu1  ;;  %v8581_v4 = vadd.f32 %v8580_v29, %v8579_v23  ;;  %7141 = vmatprep.mubr.bf16.mxu1 %v4758_v14  ;;  %7045 = vmatmul.mubr.bf16.gmra.mrb[108].mxu0 %v4755_v7  ;;  %v2677_v32 = vrot.slane %v9940_v20, %v10405_v37  ;;  %v9949_v35 = vld [vmem:[#allocation2 + $0x67c] ss:$48 sps:$4 sm:$0xff]   ;;  %v9956_v14 = vld [vmem:[#allocation2 + $0x798] ss:$48 sps:$4 sm:$0xff]  }
 0x14c   :  { %v8645_v8 = vadd.f32 %v8644_v57, %v8643_v50  ;;  %7142 = vmatmul.mubr.bf16.gmra.mrb[108].mxu1 %v4757_v15  ;;  %v2684_v42 = vrot.slane %v9948_v28, %v10405_v37  ;;  %v2698_v53 = vrot.slane %v9949_v35, %v10405_v37  ;;  %v2916_v50 = vcombine.high %v2893_v30, %v2907_v34  ;;  %v9960_v20 = vld [vmem:[#allocation2 + $0x858] ss:$48 sps:$4 sm:$0xff]   ;;  %v9964_v27 = vld [vmem:[#allocation2 + $0x79c] ss:$48 sps:$4 sm:$0xff]  }
 0x14d   :  { %v10682_v3 = vadd.f32 %v8642_v49, %v6465_v47  ;;  %v6468_v16 = vadd.f32 %v8581_v4, %v10644_v13  ;;  %v2700_v47 = vcombine.high %v2677_v32, %v2691_v45  ;;  %v2699_v51 = vcombine.low %v2677_v32, %v2691_v45  ;;  %9063 = vmatpush3.bf16.msra.mxu0 %v9953_v38  ;;  %v9965_v28 = vld [vmem:[#allocation2 + $0x7fc] ss:$48 sps:$4 sm:$0xff]  }
 0x14e   :  { %v2915_v52 = vcombine.low %v2893_v30, %v2907_v34  ;;  %v2702_v56 = vcombine.high %v2684_v42, %v2698_v53  ;;  %v2918_v57 = vcombine.high %v2900_v22, %v2914_v48  ;;  %v2701_v58 = vcombine.low %v2684_v42, %v2698_v53  ;;  %9127 = vmatpush3.bf16.msra.mxu1 %v9955_v60  ;;  %v9967_v21 = vld [vmem:[#allocation2 + $0x8bc] ss:$48 sps:$4 sm:$0xff]  }
 0x14f   :  { %v8582_v5 = vpop.f32.mrb[16].mxu0  ;;  %v10685_v29 = vadd.f32 %v8645_v8, %v6468_v16  ;;  %v2917_v59 = vcombine.low %v2900_v22, %v2914_v48  ;;  %v4780_v62 = vpack.c.bf16 %v2916_v50, %v2700_v47  ;;  %v3109_v26 = vrot.slane %v9956_v14, %v10405_v37  ;;  %v9968_v43 = vld [vmem:[#allocation5 + $0x468] sm:$0xff]  }
 0x150   :  { %v8646_v11 = vpop.f32.mrb[16].mxu1  ;;  %v8583_v12 = vpop.f32.mrb[17].mxu0  ;;  %v4779_v63 = vpack.c.bf16 %v2915_v52, %v2699_v51  ;;  %v4782_v6 = vpack.c.bf16 %v2918_v57, %v2702_v56  ;;  %v3325_v45 = vrot.slane %v9960_v20, %v10405_v37  ;;  %v3339_v35 = vrot.slane %v9962_v24, %v10405_v37  ;;  %9064 = vmatprep.subr.bf16.mxu0 %v9968_v43  ;;  %v9970_v54 = vld [vmem:[#allocation5 + $0x4e8] sm:$0xff]  }
 0x151   :  { %v8584_v17 = vadd.f32 %v8583_v12, %v8582_v5  ;;  %v8647_v18 = vpop.f32.mrb[17].mxu1  ;;  %v8585_v19 = vpop.f32.mrb[18].mxu0  ;;  %v4781_v7 = vpack.c.bf16 %v2917_v59, %v2701_v58  ;;  %7052 = vmatprep.mubr.bf16.mxu0 %v4780_v62  ;;  %v3116_v30 = vrot.slane %v9964_v27, %v10405_v37  ;;  %v3130_v34 = vrot.slane %v9965_v28, %v10405_v37  ;;  %v9971_v60 = vld [vmem:[#allocation5 + $0x4a8] sm:$0xff]  }
 0x152   :  { %v8648_v25 = vadd.f32 %v8647_v18, %v8646_v11  ;;  %v8649_v23 = vpop.f32.mrb[18].mxu1  ;;  %v8586_v46 = vpop.f32.mrb[19].mxu0  ;;  %7149 = vmatprep.mubr.bf16.mxu1 %v4782_v6  ;;  %v3348_v22 = vcombine.high %v3325_v45, %v3339_v35  ;;  %v3346_v48 = vrot.slane %v9967_v21, %v10405_v37  ;;  %v3347_v51 = vcombine.low %v3325_v45, %v3339_v35  ;;  %v9976_v14 = vld [vmem:[#allocation2 + $0x9d8] ss:$48 sps:$4 sm:$0xff]   ;;  %v9980_v20 = vld [vmem:[#allocation2 + $0x91c] ss:$48 sps:$4 sm:$0xff]  }
 0x153   :  { %v6473_v31 = vadd.f32 %v8584_v17, %v10644_v13  ;;  %v8650_v49 = vpop.f32.mrb[19].mxu1  ;;  %v8587_v55 = vadd.f32 %v8586_v46, %v8585_v19  ;;  %7053 = vmatmul.mubr.bf16.gmra.mrb[112].mxu0 %v4779_v63  ;;  %v9958_v19 = vld [vmem:[#allocation2 + $0x7f8] ss:$48 sps:$4 sm:$0xff]   ;;  %v3134_v50 = vcombine.high %v3116_v30, %v3130_v34  ;;  %v3133_v52 = vcombine.low %v3116_v30, %v3130_v34  ;;  %v9981_v24 = vld [vmem:[#allocation2 + $0x97c] ss:$48 sps:$4 sm:$0xff]   ;;  %v9984_v21 = vld [vmem:[#allocation5 + $0x470] sm:$0xff]  }
 0x154   :  { %v8651_v2 = vadd.f32 %v8650_v49, %v8649_v23  ;;  %7150 = vmatmul.mubr.bf16.gmra.mrb[112].mxu1 %v4781_v7  ;;  %v3123_v32 = vrot.slane %v9958_v19, %v10405_v37  ;;  %v9969_v49 = vld [vmem:[#allocation5 + $0x428] sm:$0xff]   ;;  %9128 = vmatprep.subr.bf16.mxu1 %v9970_v54  ;;  %v3548_v45 = vrot.slane %v9980_v20, %v10405_v37 }
 0x155   :  { %v10693_v44 = vadd.f32 %v8648_v25, %v6473_v31  ;;  %v6476_v0 = vadd.f32 %v8587_v55, %v10644_v13  ;;  %v9966_v31 = vld [vmem:[#allocation2 + $0x85c] ss:$48 sps:$4 sm:$0xff]   ;;  %9065 = vmatpush3.bf16.msra.mxu0 %v9969_v49  ;;  %9129 = vmatpush3.bf16.msra.mxu1 %v9971_v60  ;;  %v9978_v19 = vld [vmem:[#allocation2 + $0xa38] ss:$48 sps:$4 sm:$0xff]   ;;  %v3562_v35 = vrot.slane %v9981_v24, %v10405_v37 }
 0x156   :  { %v3332_v42 = vrot.slane %v9966_v31, %v10405_v37  ;;  %v3132_v53 = vcombine.high %v3109_v26, %v3123_v32  ;;  %v3131_v38 = vcombine.low %v3109_v26, %v3123_v32  ;;  %v3757_v26 = vrot.slane %v9976_v14, %v10405_v37  ;;  %v9982_v27 = vld [vmem:[#allocation2 + $0x9dc] ss:$48 sps:$4 sm:$0xff]   ;;  %9066 = vmatprep.subr.bf16.mxu0 %v9984_v21  ;;  %v9992_v14 = vld [vmem:[#allocation2 + $0xb58] ss:$48 sps:$4 sm:$0xff]  }
 0x157   :  { %v8588_v61 = vpop.f32.mrb[20].mxu0  ;;  %v10699_v15 = vadd.f32 %v8651_v2, %v6476_v0  ;;  %v9983_v28 = vld [vmem:[#allocation2 + $0xa3c] ss:$48 sps:$4 sm:$0xff]   ;;  %v3771_v32 = vrot.slane %v9978_v19, %v10405_v37  ;;  %v3764_v43 = vrot.slane %v9982_v27, %v10405_v37 }
 0x158   :  { %v8652_v4 = vpop.f32.mrb[20].mxu1  ;;  %v8589_v5 = vpop.f32.mrb[21].mxu0  ;;  %v4804_v57 = vpack.c.bf16 %v3348_v22, %v3132_v53  ;;  %v3350_v58 = vcombine.high %v3332_v42, %v3346_v48  ;;  %v3349_v59 = vcombine.low %v3332_v42, %v3346_v48  ;;  %v4803_v62 = vpack.c.bf16 %v3347_v51, %v3131_v38  ;;  %v9985_v53 = vld [vmem:[#allocation5 + $0x430] sm:$0xff]   ;;  %v9997_v24 = vld [vmem:[#allocation2 + $0xafc] ss:$48 sps:$4 sm:$0xff]  }
 0x159   :  { %v8590_v8 = vadd.f32 %v8589_v5, %v8588_v61  ;;  %v8653_v11 = vpop.f32.mrb[21].mxu1  ;;  %v8591_v12 = vpop.f32.mrb[22].mxu0  ;;  %v3780_v48 = vcombine.high %v3757_v26, %v3771_v32  ;;  %v3566_v38 = vcombine.high %v3548_v45, %v3562_v35  ;;  %v3779_v49 = vcombine.low %v3757_v26, %v3771_v32  ;;  %v9986_v51 = vld [vmem:[#allocation5 + $0x4f0] sm:$0xff]   ;;  %9067 = vmatpush3.bf16.msra.mxu0 %v9985_v53  ;;  %v10000_v32 = vld [vmem:[#allocation5 + $0x478] sm:$0xff]  }
 0x15a   :  { %v8654_v16 = vadd.f32 %v8653_v11, %v8652_v4  ;;  %v8655_v17 = vpop.f32.mrb[22].mxu1  ;;  %v8592_v18 = vpop.f32.mrb[23].mxu0  ;;  %7060 = vmatprep.mubr.bf16.mxu0 %v4804_v57  ;;  %v4806_v5 = vpack.c.bf16 %v3350_v58, %v3134_v50  ;;  %v4805_v6 = vpack.c.bf16 %v3349_v59, %v3133_v52  ;;  %v9972_v11 = vld [vmem:[#allocation2 + $0x918] ss:$48 sps:$4 sm:$0xff]   ;;  %v3565_v50 = vcombine.low %v3548_v45, %v3562_v35 }
 0x15b   :  { %v6481_v25 = vadd.f32 %v8590_v8, %v10644_v13  ;;  %v8593_v23 = vadd.f32 %v8592_v18, %v8591_v12  ;;  %v8656_v47 = vpop.f32.mrb[23].mxu1  ;;  %7061 = vmatmul.mubr.bf16.gmra.mrb[116].mxu0 %v4803_v62  ;;  %v9974_v12 = vld [vmem:[#allocation2 + $0x978] ss:$48 sps:$4 sm:$0xff]   ;;  %9130 = vmatprep.subr.bf16.mxu1 %v9986_v51  ;;  %v4189_v26 = vrot.slane %v9992_v14, %v10405_v37  ;;  %v10006_v14 = vld [vmem:[#allocation2 + $0x80] ss:$48 sps:$4 sm:$0xff]  }
 0x15c   :  { %v8657_v55 = vadd.f32 %v8656_v47, %v8655_v17  ;;  %7157 = vmatprep.mubr.bf16.mxu1 %v4806_v5  ;;  %9068 = vmatprep.subr.bf16.mxu0 %v10000_v32 }
 0x15d   :  { %v10706_v36 = vadd.f32 %v8654_v16, %v6481_v25  ;;  %v6484_v46 = vadd.f32 %v8593_v23, %v10644_v13  ;;  %7158 = vmatmul.mubr.bf16.gmra.mrb[116].mxu1 %v4805_v6  ;;  %v3541_v25 = vrot.slane %v9972_v11, %v10405_v37  ;;  %v3555_v23 = vrot.slane %v9974_v12, %v10405_v37 }
 0x15f   :  { %v8594_v56 = vpop.f32.mrb[24].mxu0  ;;  %v10713_v63 = vadd.f32 %v8657_v55, %v6484_v46  ;;  %v3564_v42 = vcombine.high %v3541_v25, %v3555_v23  ;;  %v3778_v46 = vrot.slane %v9983_v28, %v10405_v37  ;;  %v3563_v47 = vcombine.low %v3541_v25, %v3555_v23  ;;  %v9987_v55 = vld [vmem:[#allocation5 + $0x4b0] sm:$0xff]   ;;  %v9998_v25 = vld [vmem:[#allocation2 + $0xb5c] ss:$48 sps:$4 sm:$0xff]  }
 0x160   :  { %v8595_v61 = vpop.f32.mrb[25].mxu0  ;;  %v8658_v0 = vpop.f32.mrb[24].mxu1  ;;  %9131 = vmatpush3.bf16.msra.mxu1 %v9987_v55  ;;  %v9999_v23 = vld [vmem:[#allocation2 + $0xbbc] ss:$48 sps:$4 sm:$0xff]  }
 0x161   :  { %v8596_v2 = vadd.f32 %v8595_v61, %v8594_v56  ;;  %v8597_v4 = vpop.f32.mrb[26].mxu0  ;;  %v8659_v7 = vpop.f32.mrb[25].mxu1  ;;  %v3782_v52 = vcombine.high %v3764_v43, %v3778_v46  ;;  %v3781_v54 = vcombine.low %v3764_v43, %v3778_v46  ;;  %v4828_v58 = vpack.c.bf16 %v3780_v48, %v3564_v42  ;;  %v10001_v43 = vld [vmem:[#allocation5 + $0x438] sm:$0xff]  }
 0x162   :  { %v8598_v8 = vpop.f32.mrb[27].mxu0  ;;  %v8660_v17 = vadd.f32 %v8659_v7, %v8658_v0  ;;  %v8661_v30 = vpop.f32.mrb[26].mxu1  ;;  %v4827_v59 = vpack.c.bf16 %v3779_v49, %v3563_v47  ;;  %v9988_v7 = vld [vmem:[#allocation2 + $0xa98] ss:$48 sps:$4 sm:$0xff]   ;;  %v4210_v42 = vrot.slane %v9999_v23, %v10405_v37  ;;  %9069 = vmatpush3.bf16.msra.mxu0 %v10001_v43  ;;  %v999_v23 = vrot.slane %v10006_v14, %v10405_v37  ;;  %v10022_v14 = vld [vmem:[#allocation2 + $0x200] ss:$48 sps:$4 sm:$0xff]  }
 0x163   :  { %v6489_v16 = vadd.f32 %v8596_v2, %v10644_v13  ;;  %v8599_v18 = vadd.f32 %v8598_v8, %v8597_v4  ;;  %v8662_v22 = vpop.f32.mrb[27].mxu1  ;;  %v4830_v62 = vpack.c.bf16 %v3782_v52, %v3566_v38  ;;  %v4829_v0 = vpack.c.bf16 %v3781_v54, %v3565_v50  ;;  %7068 = vmatprep.mubr.bf16.mxu0 %v4828_v58  ;;  %v9990_v8 = vld [vmem:[#allocation2 + $0xaf8] ss:$48 sps:$4 sm:$0xff]  }
 0x164   :  { %v8663_v56 = vadd.f32 %v8662_v22, %v8661_v30  ;;  %7069 = vmatmul.mubr.bf16.gmra.mrb[120].mxu0 %v4827_v59  ;;  %v3973_v19 = vrot.slane %v9988_v7, %v10405_v37  ;;  %v3987_v20 = vrot.slane %v9990_v8, %v10405_v37  ;;  %v3994_v30 = vrot.slane %v9997_v24, %v10405_v37  ;;  %v10002_v48 = vld [vmem:[#allocation5 + $0x4f8] sm:$0xff]   ;;  %v10013_v24 = vld [vmem:[#allocation2 + $0x84] ss:$48 sps:$4 sm:$0xff]  }
 0x165   :  { %v10719_v31 = vadd.f32 %v8660_v17, %v6489_v16  ;;  %v6492_v34 = vadd.f32 %v8599_v18, %v10644_v13  ;;  %7165 = vmatprep.mubr.bf16.mxu1 %v4830_v62  ;;  %v9994_v16 = vld [vmem:[#allocation2 + $0xbb8] ss:$48 sps:$4 sm:$0xff]   ;;  %v9996_v17 = vld [vmem:[#allocation2 + $0xa9c] ss:$48 sps:$4 sm:$0xff]   ;;  %9132 = vmatprep.subr.bf16.mxu1 %v10002_v48 }
 0x166   :  { %7166 = vmatmul.mubr.bf16.gmra.mrb[120].mxu1 %v4829_v0  ;;  %v4203_v27 = vrot.slane %v9994_v16, %v10405_v37  ;;  %v3980_v28 = vrot.slane %v9996_v17, %v10405_v37  ;;  %v3996_v21 = vcombine.high %v3973_v19, %v3987_v20  ;;  %v3995_v53 = vcombine.low %v3973_v19, %v3987_v20  ;;  %v10003_v54 = vld [vmem:[#allocation5 + $0x4b8] sm:$0xff]   ;;  %v10008_v16 = vld [vmem:[#allocation2 + $0xe0] ss:$48 sps:$4 sm:$0xff]   ;;  %v10012_v20 = vld [vmem:[#allocation2 + $0x24] ss:$48 sps:$4 sm:$0xff]  }
 0x167   :  { %v8600_v57 = vpop.f32.mrb[28].mxu0  ;;  %v10727_v2 = vadd.f32 %v8663_v56, %v6492_v34  ;;  %v4196_v34 = vrot.slane %v9998_v25, %v10405_v37  ;;  %9133 = vmatpush3.bf16.msra.mxu1 %v10003_v54  ;;  %v10010_v17 = vld [vmem:[#allocation2 + $0x140] ss:$48 sps:$4 sm:$0xff]   ;;  %v10014_v25 = vld [vmem:[#allocation2 + $0xe4] ss:$48 sps:$4 sm:$0xff]  }
 0x168   :  { %v8664_v60 = vpop.f32.mrb[28].mxu1  ;;  %v8601_v61 = vpop.f32.mrb[29].mxu0  ;;  %v4212_v47 = vcombine.high %v4189_v26, %v4203_v27  ;;  %v4211_v22 = vcombine.low %v4189_v26, %v4203_v27  ;;  %v3998_v49 = vcombine.high %v3980_v28, %v3994_v30  ;;  %v3997_v51 = vcombine.low %v3980_v28, %v3994_v30  ;;  %v10015_v28 = vld [vmem:[#allocation2 + $0x144] ss:$48 sps:$4 sm:$0xff]  }
 0x169   :  { %v8602_v4 = vadd.f32 %v8601_v61, %v8600_v57  ;;  %v8665_v5 = vpop.f32.mrb[29].mxu1  ;;  %v8603_v6 = vpop.f32.mrb[30].mxu0  ;;  %v4214_v50 = vcombine.high %v4196_v34, %v4210_v42  ;;  %v4213_v52 = vcombine.low %v4196_v34, %v4210_v42  ;;  %v1201_v26 = vrot.slane %v10008_v16, %v10405_v37  ;;  %v10016_v30 = vld [vmem:[#allocation5 + $0x540] sm:$0xff]  }
 0x16a   :  { %v8666_v11 = vadd.f32 %v8665_v5, %v8664_v60  ;;  %v8667_v12 = vpop.f32.mrb[30].mxu1  ;;  %v8604_v35 = vpop.f32.mrb[31].mxu0  ;;  %v4852_v56 = vpack.c.bf16 %v4212_v47, %v3996_v21  ;;  %v4851_v57 = vpack.c.bf16 %v4211_v22, %v3995_v53  ;;  %v1215_v27 = vrot.slane %v10010_v17, %v10405_v37  ;;  %9182 = vmatprep.subr.bf16.mxu0 %v10016_v30  ;;  %v10024_v16 = vld [vmem:[#allocation2 + $0x260] ss:$48 sps:$4 sm:$0xff]  }
 0x16b   :  { %v6497_v18 = vadd.f32 %v8602_v4, %v10644_v13  ;;  %v8668_v46 = vpop.f32.mrb[31].mxu1  ;;  %v8605_v38 = vadd.f32 %v8604_v35, %v8603_v6  ;;  %v4854_v61 = vpack.c.bf16 %v4214_v50, %v3998_v49  ;;  %v4853_v62 = vpack.c.bf16 %v4213_v52, %v3997_v51  ;;  %v10004_v6 = vld [vmem:[#allocation2 + $0x20] ss:$48 sps:$4 sm:$0xff]  }
 0x16c   :  { %v8669_v59 = vadd.f32 %v8668_v46, %v8667_v12  ;;  %7076 = vmatprep.mubr.bf16.mxu0 %v4852_v56  ;;  %v985_v19 = vrot.slane %v10004_v6, %v10405_v37  ;;  %v992_v35 = vrot.slane %v10012_v20, %v10405_v37  ;;  %v1208_v21 = vrot.slane %v10014_v25, %v10405_v37  ;;  %v10018_v50 = vld [vmem:[#allocation5 + $0x5c0] sm:$0xff]  }
 0x16d   :  { %v10735_v45 = vadd.f32 %v8666_v11, %v6497_v18  ;;  %v6500_v58 = vadd.f32 %v8605_v38, %v10644_v13  ;;  %7173 = vmatprep.mubr.bf16.mxu1 %v4854_v61  ;;  %7077 = vmatmul.mubr.bf16.gmra.mrb[124].mxu0 %v4851_v57  ;;  %v1223_v47 = vcombine.low %v1201_v26, %v1215_v27  ;;  %v10017_v56 = vld [vmem:[#allocation5 + $0x500] sm:$0xff]  }
 0x16e   :  { %7174 = vmatmul.mubr.bf16.gmra.mrb[124].mxu1 %v4853_v62  ;;  %v1007_v43 = vcombine.low %v985_v19, %v999_v23  ;;  %v1008_v46 = vcombine.high %v985_v19, %v999_v23  ;;  %v1224_v53 = vcombine.high %v1201_v26, %v1215_v27  ;;  %v1222_v49 = vrot.slane %v10015_v28, %v10405_v37  ;;  %v10029_v19 = vld [vmem:[#allocation2 + $0x204] ss:$48 sps:$4 sm:$0xff]  }
 0x16f   :  { %v8686_v55 = vpop.f32.mrb[32].mxu0  ;;  %v10741_v7 = vadd.f32 %v8669_v59, %v6500_v58  ;;  %9246 = vmatprep.subr.bf16.mxu1 %v10018_v50  ;;  %v1431_v25 = vrot.slane %v10022_v14, %v10405_v37  ;;  %v1633_v23 = vrot.slane %v10024_v16, %v10405_v37  ;;  %v10030_v26 = vld [vmem:[#allocation2 + $0x264] ss:$48 sps:$4 sm:$0xff]  }
 0x170   :  { %v8687_v60 = vpop.f32.mrb[33].mxu0  ;;  %v8750_v0 = vpop.f32.mrb[32].mxu1  ;;  %v4688_v54 = vpack.c.bf16 %v1224_v53, %v1008_v46  ;;  %v1225_v58 = vcombine.low %v1208_v21, %v1222_v49  ;;  %v1226_v59 = vcombine.high %v1208_v21, %v1222_v49  ;;  %v10031_v27 = vld [vmem:[#allocation2 + $0x2c4] ss:$48 sps:$4 sm:$0xff]   ;;  %v10032_v21 = vld [vmem:[#allocation5 + $0x548] sm:$0xff]  }
 0x171   :  { %v8688_v4 = vadd.f32 %v8687_v60, %v8686_v55  ;;  %v8689_v5 = vpop.f32.mrb[34].mxu0  ;;  %v8751_v8 = vpop.f32.mrb[33].mxu1  ;;  %v4687_v55 = vpack.c.bf16 %v1223_v47, %v1007_v43  ;;  %v1640_v43 = vrot.slane %v10030_v26, %v10405_v37  ;;  %v1654_v46 = vrot.slane %v10031_v27, %v10405_v37  ;;  %v10033_v53 = vld [vmem:[#allocation5 + $0x508] sm:$0xff]  }
 0x172   :  { %v8690_v11 = vpop.f32.mrb[35].mxu0  ;;  %v8752_v12 = vadd.f32 %v8751_v8, %v8750_v0  ;;  %v8753_v34 = vpop.f32.mrb[34].mxu1  ;;  %7214 = vmatprep.mubr.bf16.mxu0 %v4688_v54 }
 0x173   :  { %v6635_v13 = vadd.f32 %v8688_v4, %v10657_v1  ;;  %v8691_v18 = vadd.f32 %v8690_v11, %v8689_v5  ;;  %v1006_v1 = vrot.slane %v10013_v24, %v10405_v37  ;;  %v8754_v22 = vpop.f32.mrb[35].mxu1  ;;  %v10020_v11 = vld [vmem:[#allocation2 + $0x1a0] ss:$48 sps:$4 sm:$0xff]   ;;  %v1657_v54 = vcombine.low %v1640_v43, %v1654_v46 }
 0x174   :  { %v8755_v51 = vadd.f32 %v8754_v22, %v8753_v34  ;;  %v1417_v24 = vrot.slane %v10020_v11, %v10405_v37  ;;  %v10038_v11 = vld [vmem:[#allocation2 + $0x380] ss:$48 sps:$4 sm:$0xff]  }
 0x175   :  { %v10748_v32 = vadd.f32 %v8752_v12, %v6635_v13  ;;  %v6638_v42 = vadd.f32 %v8691_v18, %v10660_v10  ;;  %v1009_v48 = vcombine.low %v992_v35, %v1006_v1  ;;  %v1010_v38 = vcombine.high %v992_v35, %v1006_v1  ;;  %v10019_v10 = vld [vmem:[#allocation5 + $0x580] sm:$0xff]   ;;  %7215 = vmatmul.mubr.bf16.vlgmr.msra.gmra.mrb[128].mxu0 %v4687_v55  ;;  %v10035_v55 = vld [vmem:[#allocation5 + $0x588] sm:$0xff]  }
 0x176   :  { %9183 = vmatpush3.bf16.msra.mxu0 %v10017_v56  ;;  %v10026_v12 = vld [vmem:[#allocation2 + $0x2c0] ss:$48 sps:$4 sm:$0xff]   ;;  %v10028_v18 = vld [vmem:[#allocation2 + $0x1a4] ss:$48 sps:$4 sm:$0xff]   ;;  %v1438_v1 = vrot.slane %v10029_v19, %v10405_v37  ;;  %v1439_v47 = vcombine.low %v1417_v24, %v1431_v25 }
 0x177   :  { %v8692_v52 = vpop.f32.mrb[36].mxu0  ;;  %v10755_v60 = vadd.f32 %v8755_v51, %v6638_v42  ;;  %v4690_v6 = vpack.c.bf16 %v1226_v59, %v1010_v38  ;;  %v4689_v8 = vpack.c.bf16 %v1225_v58, %v1009_v48  ;;  %v1424_v35 = vrot.slane %v10028_v18, %v10405_v37  ;;  %9184 = vmatprep.subr.bf16.mxu0 %v10032_v21  ;;  %v10034_v51 = vld [vmem:[#allocation5 + $0x5c8] sm:$0xff]  }
 0x178   :  { %v8693_v57 = vpop.f32.mrb[37].mxu0  ;;  %v8756_v61 = vpop.f32.mrb[36].mxu1  ;;  %v1440_v42 = vcombine.high %v1417_v24, %v1431_v25  ;;  %v10045_v24 = vld [vmem:[#allocation2 + $0x384] ss:$48 sps:$4 sm:$0xff]  }
 0x179   :  { %v8694_v62 = vadd.f32 %v8693_v57, %v8692_v52  ;;  %v8695_v0 = vpop.f32.mrb[38].mxu0  ;;  %v8757_v4 = vpop.f32.mrb[37].mxu1  ;;  %7311 = vmatprep.mubr.bf16.mxu1 %v4690_v6  ;;  %v1442_v38 = vcombine.high %v1424_v35, %v1438_v1  ;;  %v1441_v50 = vcombine.low %v1424_v35, %v1438_v1  ;;  %v1658_v52 = vcombine.high %v1640_v43, %v1654_v46  ;;  %v10046_v25 = vld [vmem:[#allocation2 + $0x3e4] ss:$48 sps:$4 sm:$0xff]  }
 0x17a   :  { %v8696_v5 = vpop.f32.mrb[39].mxu0  ;;  %v8758_v13 = vadd.f32 %v8757_v4, %v8756_v61  ;;  %7312 = vmatmul.mubr.bf16.vlgmr.msra.gmra.mrb[128].mxu1 %v4689_v8  ;;  %v8759_v30 = vpop.f32.mrb[38].mxu1  ;;  %9185 = vmatpush3.bf16.msra.mxu0 %v10033_v53  ;;  %v10036_v8 = vld [vmem:[#allocation2 + $0x320] ss:$48 sps:$4 sm:$0xff]  }
 0x17b   :  { %v6643_v17 = vadd.f32 %v8694_v62, %v10663_v39  ;;  %v8697_v20 = vadd.f32 %v8696_v5, %v8695_v0  ;;  %v1647_v39 = vrot.slane %v10026_v12, %v10405_v37  ;;  %9247 = vmatpush3.bf16.msra.mxu1 %v10019_v10  ;;  %v8760_v22 = vpop.f32.mrb[39].mxu1  ;;  %v4714_v61 = vpack.c.bf16 %v1658_v52, %v1442_v38  ;;  %v10044_v12 = vld [vmem:[#allocation2 + $0x324] ss:$48 sps:$4 sm:$0xff]  }
 0x17c   :  { %9248 = vmatprep.subr.bf16.mxu1 %v10034_v51  ;;  %v4713_v62 = vpack.c.bf16 %v1657_v54, %v1441_v50  ;;  %v1849_v19 = vrot.slane %v10036_v8, %v10405_v37  ;;  %v10048_v35 = vld [vmem:[#allocation5 + $0x550] sm:$0xff]  }
 0x17d   :  { %v10761_v28 = vadd.f32 %v8758_v13, %v6643_v17  ;;  %v6646_v34 = vadd.f32 %v8697_v20, %v10666_v40  ;;  %v1656_v48 = vcombine.high %v1633_v23, %v1647_v39  ;;  %v1655_v49 = vcombine.low %v1633_v23, %v1647_v39  ;;  %7319 = vmatprep.mubr.bf16.mxu1 %v4714_v61  ;;  %v10040_v17 = vld [vmem:[#allocation2 + $0x3e0] ss:$48 sps:$4 sm:$0xff]   ;;  %v10047_v23 = vld [vmem:[#allocation2 + $0x444] ss:$48 sps:$4 sm:$0xff]  }
 0x17e   :  { %v8761_v40 = vadd.f32 %v8760_v22, %v8759_v30  ;;  %v10042_v13 = vld [vmem:[#allocation2 + $0x440] ss:$48 sps:$4 sm:$0xff]   ;;  %v1863_v20 = vrot.slane %v10038_v11, %v10405_v37  ;;  %v2065_v26 = vrot.slane %v10040_v17, %v10405_v37  ;;  %v1856_v39 = vrot.slane %v10044_v12, %v10405_v37  ;;  %9186 = vmatprep.subr.bf16.mxu0 %v10048_v35  ;;  %v10063_v35 = vld [vmem:[#allocation2 + $0x5c4] ss:$48 sps:$4 sm:$0xff]  }
 0x17f   :  { %v8698_v56 = vpop.f32.mrb[40].mxu0  ;;  %v4712_v57 = vpack.c.bf16 %v1656_v48, %v1440_v42  ;;  %v4711_v58 = vpack.c.bf16 %v1655_v49, %v1439_v47  ;;  %9249 = vmatpush3.bf16.msra.mxu1 %v10035_v55  ;;  %v2079_v27 = vrot.slane %v10042_v13, %v10405_v37  ;;  %v2086_v42 = vrot.slane %v10047_v23, %v10405_v37  ;;  %v10049_v43 = vld [vmem:[#allocation5 + $0x510] sm:$0xff]  }
 0x180   :  { %v8762_v59 = vpop.f32.mrb[40].mxu1  ;;  %v8699_v10 = vpop.f32.mrb[41].mxu0  ;;  %v10769_v0 = vadd.f32 %v8761_v40, %v6646_v34  ;;  %v1872_v30 = vcombine.high %v1849_v19, %v1863_v20  ;;  %v2072_v34 = vrot.slane %v10046_v25, %v10405_v37  ;;  %v1871_v53 = vcombine.low %v1849_v19, %v1863_v20  ;;  %v10050_v48 = vld [vmem:[#allocation5 + $0x5d0] sm:$0xff]   ;;  %9187 = vmatpush3.bf16.msra.mxu0 %v10049_v43 }
 0x181   :  { %v8700_v4 = vadd.f32 %v8699_v10, %v8698_v56  ;;  %v8763_v5 = vpop.f32.mrb[41].mxu1  ;;  %v8701_v6 = vpop.f32.mrb[42].mxu0  ;;  %7222 = vmatprep.mubr.bf16.mxu0 %v4712_v57  ;;  %v2088_v47 = vcombine.high %v2065_v26, %v2079_v27  ;;  %v2087_v22 = vcombine.low %v2065_v26, %v2079_v27  ;;  %v10051_v54 = vld [vmem:[#allocation5 + $0x590] sm:$0xff]   ;;  %9250 = vmatprep.subr.bf16.mxu1 %v10050_v48  ;;  %v10065_v48 = vld [vmem:[#allocation5 + $0x518] sm:$0xff]  }
 0x182   :  { %v8764_v14 = vadd.f32 %v8763_v5, %v8762_v59  ;;  %v8765_v16 = vpop.f32.mrb[42].mxu1  ;;  %7223 = vmatmul.mubr.bf16.gmra.mrb[132].mxu0 %v4711_v58  ;;  %7320 = vmatmul.mubr.bf16.gmra.mrb[132].mxu1 %v4713_v62  ;;  %v8702_v21 = vpop.f32.mrb[43].mxu0  ;;  %v2090_v50 = vcombine.high %v2072_v34, %v2086_v42  ;;  %v2089_v52 = vcombine.low %v2072_v34, %v2086_v42  ;;  %v10052_v8 = vld [vmem:[#allocation2 + $0x4a0] ss:$48 sps:$4 sm:$0xff]   ;;  %v10061_v25 = vld [vmem:[#allocation2 + $0x504] ss:$48 sps:$4 sm:$0xff]  }
 0x183   :  { %v6651_v18 = vadd.f32 %v8700_v4, %v10669_v9  ;;  %v1870_v9 = vrot.slane %v10045_v24, %v10405_v37  ;;  %v8766_v46 = vpop.f32.mrb[43].mxu1  ;;  %v8703_v38 = vadd.f32 %v8702_v21, %v8701_v6  ;;  %v4736_v40 = vpack.c.bf16 %v2088_v47, %v1872_v30  ;;  %9251 = vmatpush3.bf16.msra.mxu1 %v10051_v54  ;;  %v10054_v12 = vld [vmem:[#allocation2 + $0x500] ss:$48 sps:$4 sm:$0xff]   ;;  %v10060_v24 = vld [vmem:[#allocation2 + $0x4a4] ss:$48 sps:$4 sm:$0xff]   ;;  %v10064_v34 = vld [vmem:[#allocation5 + $0x558] sm:$0xff]  }
 0x184   :  { %v4735_v56 = vpack.c.bf16 %v2087_v22, %v1871_v53  ;;  %v8767_v58 = vadd.f32 %v8766_v46, %v8765_v16  ;;  %v10058_v16 = vld [vmem:[#allocation2 + $0x5c0] ss:$48 sps:$4 sm:$0xff]   ;;  %v2281_v20 = vrot.slane %v10052_v8, %v10405_v37  ;;  %v10062_v23 = vld [vmem:[#allocation2 + $0x564] ss:$48 sps:$4 sm:$0xff]   ;;  %v2295_v26 = vrot.slane %v10054_v12, %v10405_v37  ;;  %9188 = vmatprep.subr.bf16.mxu0 %v10064_v34 }
 0x185   :  { %v10777_v1 = vadd.f32 %v8764_v14, %v6651_v18  ;;  %v1874_v49 = vcombine.high %v1856_v39, %v1870_v9  ;;  %v1873_v51 = vcombine.low %v1856_v39, %v1870_v9  ;;  %v6654_v57 = vadd.f32 %v8703_v38, %v10671_v41  ;;  %7230 = vmatprep.mubr.bf16.mxu0 %v4736_v40  ;;  %v10056_v41 = vld [vmem:[#allocation2 + $0x560] ss:$48 sps:$4 sm:$0xff]  }
 0x186   :  { %v2497_v27 = vrot.slane %v10056_v41, %v10405_v37  ;;  %v2511_v39 = vrot.slane %v10058_v16, %v10405_v37  ;;  %v2288_v30 = vrot.slane %v10060_v24, %v10405_v37  ;;  %v2504_v9 = vrot.slane %v10062_v23, %v10405_v37  ;;  %9189 = vmatpush3.bf16.msra.mxu0 %v10065_v48 }
 0x187   :  { %v8704_v55 = vpop.f32.mrb[44].mxu0  ;;  %v4738_v61 = vpack.c.bf16 %v2090_v50, %v1874_v49  ;;  %v4737_v62 = vpack.c.bf16 %v2089_v52, %v1873_v51  ;;  %v10783_v11 = vadd.f32 %v8767_v58, %v6654_v57  ;;  %v2304_v46 = vcombine.high %v2281_v20, %v2295_v26  ;;  %v10066_v51 = vld [vmem:[#allocation5 + $0x5d8] sm:$0xff]  }
 0x188   :  { %v8768_v59 = vpop.f32.mrb[44].mxu1  ;;  %v8705_v10 = vpop.f32.mrb[45].mxu0  ;;  %v2520_v47 = vcombine.high %v2497_v27, %v2511_v39  ;;  %v2518_v53 = vrot.slane %v10063_v35, %v10405_v37  ;;  %v2303_v22 = vcombine.low %v2281_v20, %v2295_v26  ;;  %v2519_v49 = vcombine.low %v2497_v27, %v2511_v39  ;;  %v10067_v57 = vld [vmem:[#allocation5 + $0x598] sm:$0xff]   ;;  %9252 = vmatprep.subr.bf16.mxu1 %v10066_v51  ;;  %v10077_v20 = vld [vmem:[#allocation2 + $0x684] ss:$48 sps:$4 sm:$0xff]  }
 0x189   :  { %v8706_v4 = vadd.f32 %v8705_v10, %v8704_v55  ;;  %v8769_v5 = vpop.f32.mrb[45].mxu1  ;;  %v8707_v6 = vpop.f32.mrb[46].mxu0  ;;  %7327 = vmatprep.mubr.bf16.mxu1 %v4738_v61  ;;  %9253 = vmatpush3.bf16.msra.mxu1 %v10067_v57  ;;  %v10078_v26 = vld [vmem:[#allocation2 + $0x6e4] ss:$48 sps:$4 sm:$0xff]  }
 0x18a   :  { %v8770_v14 = vadd.f32 %v8769_v5, %v8768_v59  ;;  %v8771_v17 = vpop.f32.mrb[46].mxu1  ;;  %v8708_v13 = vpop.f32.mrb[47].mxu0  ;;  %7231 = vmatmul.mubr.bf16.gmra.mrb[136].mxu0 %v4735_v56  ;;  %7328 = vmatmul.mubr.bf16.gmra.mrb[136].mxu1 %v4737_v62  ;;  %v4760_v55 = vpack.c.bf16 %v2520_v47, %v2304_v46  ;;  %v2522_v40 = vcombine.high %v2504_v9, %v2518_v53  ;;  %v10079_v27 = vld [vmem:[#allocation2 + $0x744] ss:$48 sps:$4 sm:$0xff]  }
 0x18b   :  { %v6659_v18 = vadd.f32 %v8706_v4, %v10682_v3  ;;  %v8709_v19 = vadd.f32 %v8708_v13, %v8707_v6  ;;  %v2302_v3 = vrot.slane %v10061_v25, %v10405_v37  ;;  %v8772_v43 = vpop.f32.mrb[47].mxu1  ;;  %v2521_v56 = vcombine.low %v2504_v9, %v2518_v53  ;;  %v10072_v13 = vld [vmem:[#allocation2 + $0x6e0] ss:$48 sps:$4 sm:$0xff]  }
 0x18c   :  { %v8773_v52 = vadd.f32 %v8772_v43, %v8771_v17  ;;  %v4759_v58 = vpack.c.bf16 %v2519_v49, %v2303_v22  ;;  %7238 = vmatprep.mubr.bf16.mxu0 %v4760_v55  ;;  %v10070_v17 = vld [vmem:[#allocation2 + $0x680] ss:$48 sps:$4 sm:$0xff]   ;;  %v2929_v23 = vrot.slane %v10072_v13, %v10405_v37  ;;  %v2936_v43 = vrot.slane %v10078_v26, %v10405_v37 }
 0x18d   :  { %v10790_v21 = vadd.f32 %v8770_v14, %v6659_v18  ;;  %v6662_v42 = vadd.f32 %v8709_v19, %v10685_v29  ;;  %v2306_v38 = vcombine.high %v2288_v30, %v2302_v3  ;;  %v2305_v50 = vcombine.low %v2288_v30, %v2302_v3  ;;  %v10068_v14 = vld [vmem:[#allocation2 + $0x620] ss:$48 sps:$4 sm:$0xff]   ;;  %v10076_v19 = vld [vmem:[#allocation2 + $0x624] ss:$48 sps:$4 sm:$0xff]  }
 0x18e   :  { %v10074_v18 = vld [vmem:[#allocation2 + $0x740] ss:$48 sps:$4 sm:$0xff]   ;;  %v2713_v24 = vrot.slane %v10068_v14, %v10405_v37  ;;  %v2727_v25 = vrot.slane %v10070_v17, %v10405_v37  ;;  %v2734_v30 = vrot.slane %v10077_v20, %v10405_v37  ;;  %v2950_v46 = vrot.slane %v10079_v27, %v10405_v37 }
 0x18f   :  { %v8710_v54 = vpop.f32.mrb[48].mxu0  ;;  %v10797_v59 = vadd.f32 %v8773_v52, %v6662_v42  ;;  %v4762_v4 = vpack.c.bf16 %v2522_v40, %v2306_v38  ;;  %v4761_v5 = vpack.c.bf16 %v2521_v56, %v2305_v50  ;;  %v2943_v35 = vrot.slane %v10074_v18, %v10405_v37  ;;  %v10080_v3 = vld [vmem:[#allocation5 + $0x560] sm:$0xff]  }
 0x190   :  { %v8711_v29 = vpop.f32.mrb[49].mxu0  ;;  %v8774_v10 = vpop.f32.mrb[48].mxu1  ;;  %v2736_v42 = vcombine.high %v2713_v24, %v2727_v25  ;;  %v2735_v47 = vcombine.low %v2713_v24, %v2727_v25  ;;  %v10081_v53 = vld [vmem:[#allocation5 + $0x520] sm:$0xff]   ;;  %9190 = vmatprep.subr.bf16.mxu0 %v10080_v3  ;;  %v2954_v52 = vcombine.high %v2936_v43, %v2950_v46 }
 0x191   :  { %v8712_v61 = vadd.f32 %v8711_v29, %v8710_v54  ;;  %v8713_v62 = vpop.f32.mrb[50].mxu0  ;;  %v8775_v6 = vpop.f32.mrb[49].mxu1  ;;  %7335 = vmatprep.mubr.bf16.mxu1 %v4762_v4  ;;  %v2952_v48 = vcombine.high %v2929_v23, %v2943_v35  ;;  %v2951_v49 = vcombine.low %v2929_v23, %v2943_v35  ;;  %v10082_v51 = vld [vmem:[#allocation5 + $0x5e0] sm:$0xff]   ;;  %v2953_v54 = vcombine.low %v2936_v43, %v2950_v46  ;;  %v10097_v43 = vld [vmem:[#allocation5 + $0x528] sm:$0xff]  }
 0x192   :  { %v8714_v8 = vpop.f32.mrb[51].mxu0  ;;  %7239 = vmatmul.mubr.bf16.gmra.mrb[140].mxu0 %v4759_v58  ;;  %v8776_v41 = vadd.f32 %v8775_v6, %v8774_v10  ;;  %7336 = vmatmul.mubr.bf16.gmra.mrb[140].mxu1 %v4761_v5  ;;  %v8777_v9 = vpop.f32.mrb[50].mxu1  ;;  %v10083_v55 = vld [vmem:[#allocation5 + $0x5a0] sm:$0xff]  }
 0x193   :  { %v6667_v12 = vadd.f32 %v8712_v61, %v10693_v44  ;;  %v8715_v16 = vadd.f32 %v8714_v8, %v8713_v62  ;;  %v2720_v44 = vrot.slane %v10076_v19, %v10405_v37  ;;  %v8778_v22 = vpop.f32.mrb[51].mxu1  ;;  %9191 = vmatpush3.bf16.msra.mxu0 %v10081_v53  ;;  %v4784_v56 = vpack.c.bf16 %v2952_v48, %v2736_v42  ;;  %v10084_v8 = vld [vmem:[#allocation2 + $0x7a0] ss:$48 sps:$4 sm:$0xff]   ;;  %v10093_v24 = vld [vmem:[#allocation2 + $0x804] ss:$48 sps:$4 sm:$0xff]   ;;  %v10098_v48 = vld [vmem:[#allocation5 + $0x5e8] sm:$0xff]  }
 0x194   :  { %v8779_v40 = vadd.f32 %v8778_v22, %v8777_v9  ;;  %v4783_v57 = vpack.c.bf16 %v2951_v49, %v2735_v47  ;;  %9254 = vmatprep.subr.bf16.mxu1 %v10082_v51  ;;  %v10086_v14 = vld [vmem:[#allocation2 + $0x800] ss:$48 sps:$4 sm:$0xff]   ;;  %v3145_v19 = vrot.slane %v10084_v8, %v10405_v37  ;;  %v10094_v25 = vld [vmem:[#allocation2 + $0x864] ss:$48 sps:$4 sm:$0xff]  }
 0x195   :  { %v10803_v39 = vadd.f32 %v8776_v41, %v6667_v12  ;;  %v6670_v34 = vadd.f32 %v8715_v16, %v10699_v15  ;;  %v2738_v38 = vcombine.high %v2720_v44, %v2734_v30  ;;  %v2737_v50 = vcombine.low %v2720_v44, %v2734_v30  ;;  %9255 = vmatpush3.bf16.msra.mxu1 %v10083_v55  ;;  %v10088_v12 = vld [vmem:[#allocation2 + $0x860] ss:$48 sps:$4 sm:$0xff]   ;;  %v10092_v16 = vld [vmem:[#allocation2 + $0x7a4] ss:$48 sps:$4 sm:$0xff]   ;;  %v10096_v44 = vld [vmem:[#allocation5 + $0x568] sm:$0xff]  }
 0x196   :  { %7246 = vmatprep.mubr.bf16.mxu0 %v4784_v56  ;;  %v10090_v41 = vld [vmem:[#allocation2 + $0x8c0] ss:$48 sps:$4 sm:$0xff]   ;;  %v3159_v20 = vrot.slane %v10086_v14, %v10405_v37  ;;  %v10095_v23 = vld [vmem:[#allocation2 + $0x8c4] ss:$48 sps:$4 sm:$0xff]   ;;  %v3361_v26 = vrot.slane %v10088_v12, %v10405_v37  ;;  %v3152_v35 = vrot.slane %v10092_v16, %v10405_v37  ;;  %9192 = vmatprep.subr.bf16.mxu0 %v10096_v44 }
 0x197   :  { %v8716_v15 = vpop.f32.mrb[52].mxu0  ;;  %v4786_v10 = vpack.c.bf16 %v2954_v52, %v2738_v38  ;;  %v4785_v61 = vpack.c.bf16 %v2953_v54, %v2737_v50  ;;  %v10811_v62 = vadd.f32 %v8779_v40, %v6670_v34  ;;  %v3375_v27 = vrot.slane %v10090_v41, %v10405_v37  ;;  %9193 = vmatpush3.bf16.msra.mxu0 %v10097_v43  ;;  %v10099_v54 = vld [vmem:[#allocation5 + $0x5a8] sm:$0xff]   ;;  %v10100_v8 = vld [vmem:[#allocation2 + $0x920] ss:$48 sps:$4 sm:$0xff]   ;;  %v10111_v44 = vld [vmem:[#allocation2 + $0xa44] ss:$48 sps:$4 sm:$0xff]  }
 0x198   :  { %v8780_v29 = vpop.f32.mrb[52].mxu1  ;;  %v8717_v58 = vpop.f32.mrb[53].mxu0  ;;  %v3168_v9 = vcombine.high %v3145_v19, %v3159_v20  ;;  %v3368_v34 = vrot.slane %v10094_v25, %v10405_v37  ;;  %v3382_v42 = vrot.slane %v10095_v23, %v10405_v37  ;;  %v3167_v53 = vcombine.low %v3145_v19, %v3159_v20  ;;  %9256 = vmatprep.subr.bf16.mxu1 %v10098_v48  ;;  %v10102_v16 = vld [vmem:[#allocation2 + $0x980] ss:$48 sps:$4 sm:$0xff]   ;;  %v10109_v25 = vld [vmem:[#allocation2 + $0x984] ss:$48 sps:$4 sm:$0xff]  }
 0x199   :  { %v8718_v4 = vadd.f32 %v8717_v58, %v8716_v15  ;;  %v8781_v5 = vpop.f32.mrb[53].mxu1  ;;  %v8719_v6 = vpop.f32.mrb[54].mxu0  ;;  %7343 = vmatprep.mubr.bf16.mxu1 %v4786_v10  ;;  %v3384_v47 = vcombine.high %v3361_v26, %v3375_v27  ;;  %v3383_v22 = vcombine.low %v3361_v26, %v3375_v27  ;;  %9257 = vmatpush3.bf16.msra.mxu1 %v10099_v54  ;;  %v10110_v23 = vld [vmem:[#allocation2 + $0x9e4] ss:$48 sps:$4 sm:$0xff]  }
 0x19a   :  { %v8782_v17 = vadd.f32 %v8781_v5, %v8780_v29  ;;  %v8783_v13 = vpop.f32.mrb[54].mxu1  ;;  %7247 = vmatmul.mubr.bf16.gmra.mrb[144].mxu0 %v4783_v57  ;;  %7344 = vmatmul.mubr.bf16.gmra.mrb[144].mxu1 %v4785_v61  ;;  %v8720_v3 = vpop.f32.mrb[55].mxu0  ;;  %v3386_v50 = vcombine.high %v3368_v34, %v3382_v42  ;;  %v3385_v52 = vcombine.low %v3368_v34, %v3382_v42  ;;  %v10112_v34 = vld [vmem:[#allocation5 + $0x570] sm:$0xff]  }
 0x19b   :  { %v6675_v18 = vadd.f32 %v8718_v4, %v10706_v36  ;;  %v3166_v36 = vrot.slane %v10093_v24, %v10405_v37  ;;  %v8784_v46 = vpop.f32.mrb[55].mxu1  ;;  %v8721_v38 = vadd.f32 %v8720_v3, %v8719_v6  ;;  %v4808_v40 = vpack.c.bf16 %v3384_v47, %v3168_v9  ;;  %v10108_v24 = vld [vmem:[#allocation2 + $0x924] ss:$48 sps:$4 sm:$0xff]   ;;  %9194 = vmatprep.subr.bf16.mxu0 %v10112_v34 }
 0x19c   :  { %v4807_v15 = vpack.c.bf16 %v3383_v22, %v3167_v53  ;;  %v8785_v57 = vadd.f32 %v8784_v46, %v8783_v13  ;;  %v10106_v13 = vld [vmem:[#allocation2 + $0xa40] ss:$48 sps:$4 sm:$0xff]   ;;  %v3577_v20 = vrot.slane %v10100_v8, %v10405_v37  ;;  %v3591_v26 = vrot.slane %v10102_v16, %v10405_v37 }
 0x19d   :  { %v10819_v30 = vadd.f32 %v8782_v17, %v6675_v18  ;;  %v3170_v49 = vcombine.high %v3152_v35, %v3166_v36  ;;  %v3169_v51 = vcombine.low %v3152_v35, %v3166_v36  ;;  %v6678_v56 = vadd.f32 %v8721_v38, %v10713_v63  ;;  %7254 = vmatprep.mubr.bf16.mxu0 %v4808_v40  ;;  %v10104_v63 = vld [vmem:[#allocation2 + $0x9e0] ss:$48 sps:$4 sm:$0xff]  }
 0x19e   :  { %v3793_v27 = vrot.slane %v10104_v63, %v10405_v37  ;;  %v3807_v35 = vrot.slane %v10106_v13, %v10405_v37  ;;  %v3584_v9 = vrot.slane %v10108_v24, %v10405_v37  ;;  %v3800_v36 = vrot.slane %v10110_v23, %v10405_v37  ;;  %v10113_v48 = vld [vmem:[#allocation5 + $0x530] sm:$0xff]  }
 0x19f   :  { %v8722_v55 = vpop.f32.mrb[56].mxu0  ;;  %v4810_v10 = vpack.c.bf16 %v3386_v50, %v3170_v49  ;;  %v4809_v61 = vpack.c.bf16 %v3385_v52, %v3169_v51  ;;  %v10825_v14 = vadd.f32 %v8785_v57, %v6678_v56  ;;  %v3600_v46 = vcombine.high %v3577_v20, %v3591_v26  ;;  %v10114_v51 = vld [vmem:[#allocation5 + $0x5f0] sm:$0xff]   ;;  %9195 = vmatpush3.bf16.msra.mxu0 %v10113_v48 }
 0x1a0   :  { %v8786_v29 = vpop.f32.mrb[56].mxu1  ;;  %v8723_v58 = vpop.f32.mrb[57].mxu0  ;;  %v3816_v47 = vcombine.high %v3793_v27, %v3807_v35  ;;  %v3814_v53 = vrot.slane %v10111_v44, %v10405_v37  ;;  %v3599_v22 = vcombine.low %v3577_v20, %v3591_v26  ;;  %v3815_v49 = vcombine.low %v3793_v27, %v3807_v35  ;;  %v10115_v56 = vld [vmem:[#allocation5 + $0x5b0] sm:$0xff]   ;;  %9258 = vmatprep.subr.bf16.mxu1 %v10114_v51  ;;  %v10130_v51 = vld [vmem:[#allocation5 + $0x5f8] sm:$0xff]  }
 0x1a1   :  { %v8724_v4 = vadd.f32 %v8723_v58, %v8722_v55  ;;  %v8787_v5 = vpop.f32.mrb[57].mxu1  ;;  %v8725_v6 = vpop.f32.mrb[58].mxu0  ;;  %7351 = vmatprep.mubr.bf16.mxu1 %v4810_v10  ;;  %9259 = vmatpush3.bf16.msra.mxu1 %v10115_v56  ;;  %v10125_v20 = vld [vmem:[#allocation2 + $0xb04] ss:$48 sps:$4 sm:$0xff]  }
 0x1a2   :  { %v8788_v17 = vadd.f32 %v8787_v5, %v8786_v29  ;;  %v8789_v12 = vpop.f32.mrb[58].mxu1  ;;  %v8726_v41 = vpop.f32.mrb[59].mxu0  ;;  %7255 = vmatmul.mubr.bf16.gmra.mrb[148].mxu0 %v4807_v15  ;;  %7352 = vmatmul.mubr.bf16.gmra.mrb[148].mxu1 %v4809_v61  ;;  %v4832_v55 = vpack.c.bf16 %v3816_v47, %v3600_v46  ;;  %v3818_v40 = vcombine.high %v3800_v36, %v3814_v53  ;;  %v10126_v26 = vld [vmem:[#allocation2 + $0xb64] ss:$48 sps:$4 sm:$0xff]  }
 0x1a3   :  { %v6683_v18 = vadd.f32 %v8724_v4, %v10719_v31  ;;  %v8727_v19 = vadd.f32 %v8726_v41, %v8725_v6  ;;  %v3598_v31 = vrot.slane %v10109_v25, %v10405_v37  ;;  %v8790_v43 = vpop.f32.mrb[59].mxu1  ;;  %v3817_v15 = vcombine.low %v3800_v36, %v3814_v53  ;;  %v10120_v41 = vld [vmem:[#allocation2 + $0xb60] ss:$48 sps:$4 sm:$0xff]   ;;  %v10127_v27 = vld [vmem:[#allocation2 + $0xbc4] ss:$48 sps:$4 sm:$0xff]   ;;  %v10129_v53 = vld [vmem:[#allocation5 + $0x538] sm:$0xff]   ;;  %9260 = vmatprep.subr.bf16.mxu1 %v10130_v51 }
 0x1a4   :  { %v8791_v52 = vadd.f32 %v8790_v43, %v8789_v12  ;;  %v4831_v57 = vpack.c.bf16 %v3815_v49, %v3599_v22  ;;  %7262 = vmatprep.mubr.bf16.mxu0 %v4832_v55  ;;  %v10118_v12 = vld [vmem:[#allocation2 + $0xb00] ss:$48 sps:$4 sm:$0xff]   ;;  %v4225_v23 = vrot.slane %v10120_v41, %v10405_v37  ;;  %v4232_v43 = vrot.slane %v10126_v26, %v10405_v37  ;;  %v10131_v55 = vld [vmem:[#allocation5 + $0x5b8] sm:$0xff]  }
 0x1a5   :  { %v10832_v3 = vadd.f32 %v8788_v17, %v6683_v18  ;;  %v6686_v42 = vadd.f32 %v8727_v19, %v10727_v2  ;;  %v3602_v38 = vcombine.high %v3584_v9, %v3598_v31  ;;  %v3601_v50 = vcombine.low %v3584_v9, %v3598_v31  ;;  %v10116_v17 = vld [vmem:[#allocation2 + $0xaa0] ss:$48 sps:$4 sm:$0xff]   ;;  %v10124_v19 = vld [vmem:[#allocation2 + $0xaa4] ss:$48 sps:$4 sm:$0xff]   ;;  %v10128_v31 = vld [vmem:[#allocation5 + $0x578] sm:$0xff]   ;;  %9261 = vmatpush3.bf16.msra.mxu1 %v10131_v55 }
 0x1a6   :  { %v10122_v18 = vld [vmem:[#allocation2 + $0xbc0] ss:$48 sps:$4 sm:$0xff]   ;;  %v4009_v24 = vrot.slane %v10116_v17, %v10405_v37  ;;  %v4023_v25 = vrot.slane %v10118_v12, %v10405_v37  ;;  %v4030_v9 = vrot.slane %v10125_v20, %v10405_v37  ;;  %v4246_v46 = vrot.slane %v10127_v27, %v10405_v37  ;;  %9196 = vmatprep.subr.bf16.mxu0 %v10128_v31  ;;  %v10134_v17 = vld [vmem:[#allocation2 + $0x88] ss:$48 sps:$4 sm:$0xff]  }
 0x1a7   :  { %v8728_v54 = vpop.f32.mrb[60].mxu0  ;;  %v10839_v29 = vadd.f32 %v8791_v52, %v6686_v42  ;;  %v4834_v4 = vpack.c.bf16 %v3818_v40, %v3602_v38  ;;  %v4833_v5 = vpack.c.bf16 %v3817_v15, %v3601_v50  ;;  %v4239_v44 = vrot.slane %v10122_v18, %v10405_v37  ;;  %9197 = vmatpush3.bf16.msra.mxu0 %v10129_v53  ;;  %v10144_v53 = vld [vmem:[#allocation2 + $0x1a8] ss:$48 sps:$4 sm:$0xff]  }
 0x1a8   :  { %v8729_v2 = vpop.f32.mrb[61].mxu0  ;;  %v8792_v58 = vpop.f32.mrb[60].mxu1  ;;  %v4032_v42 = vcombine.high %v4009_v24, %v4023_v25  ;;  %v4031_v47 = vcombine.low %v4009_v24, %v4023_v25  ;;  %v4250_v52 = vcombine.high %v4232_v43, %v4246_v46  ;;  %v1035_v20 = vrot.slane %v10134_v17, %v10405_v37  ;;  %v10141_v24 = vld [vmem:[#allocation2 + $0x8c] ss:$48 sps:$4 sm:$0xff]   ;;  %v10150_v51 = vld [vmem:[#allocation2 + $0x2c8] ss:$48 sps:$4 sm:$0xff]  }
 0x1a9   :  { %v8730_v10 = vadd.f32 %v8729_v2, %v8728_v54  ;;  %v8731_v61 = vpop.f32.mrb[62].mxu0  ;;  %v8793_v6 = vpop.f32.mrb[61].mxu1  ;;  %7359 = vmatprep.mubr.bf16.mxu1 %v4834_v4  ;;  %v4248_v48 = vcombine.high %v4225_v23, %v4239_v44  ;;  %v4247_v49 = vcombine.low %v4225_v23, %v4239_v44  ;;  %v4249_v54 = vcombine.low %v4232_v43, %v4246_v46  ;;  %v10142_v25 = vld [vmem:[#allocation2 + $0xec] ss:$48 sps:$4 sm:$0xff]  }
 0x1aa   :  { %v8732_v8 = vpop.f32.mrb[63].mxu0  ;;  %7263 = vmatmul.mubr.bf16.gmra.mrb[152].mxu0 %v4831_v57  ;;  %v8794_v63 = vadd.f32 %v8793_v6, %v8792_v58  ;;  %7360 = vmatmul.mubr.bf16.gmra.mrb[152].mxu1 %v4833_v5  ;;  %v8795_v36 = vpop.f32.mrb[62].mxu1  ;;  %v10143_v23 = vld [vmem:[#allocation2 + $0x14c] ss:$48 sps:$4 sm:$0xff]  }
 0x1ab   :  { %v6691_v16 = vadd.f32 %v8730_v10, %v10735_v45  ;;  %v8733_v13 = vadd.f32 %v8732_v8, %v8731_v61  ;;  %v4016_v45 = vrot.slane %v10124_v19, %v10405_v37  ;;  %v8796_v22 = vpop.f32.mrb[63].mxu1  ;;  %v4856_v15 = vpack.c.bf16 %v4248_v48, %v4032_v42  ;;  %v10132_v8 = vld [vmem:[#allocation2 + $0x28] ss:$48 sps:$4 sm:$0xff]  }
 0x1ac   :  { %v8797_v40 = vadd.f32 %v8796_v22, %v8795_v36  ;;  %v4855_v56 = vpack.c.bf16 %v4247_v49, %v4031_v47  ;;  %v1021_v19 = vrot.slane %v10132_v8, %v10405_v37  ;;  %v1244_v42 = vrot.slane %v10142_v25, %v10405_v37  ;;  %v10146_v49 = vld [vmem:[#allocation2 + $0x208] ss:$48 sps:$4 sm:$0xff]  }
 0x1ad   :  { %v10845_v35 = vadd.f32 %v8794_v63, %v6691_v16  ;;  %v6694_v34 = vadd.f32 %v8733_v13, %v10741_v7  ;;  %v4034_v38 = vcombine.high %v4016_v45, %v4030_v9  ;;  %v4033_v50 = vcombine.low %v4016_v45, %v4030_v9  ;;  %7270 = vmatprep.mubr.bf16.mxu0 %v4856_v15  ;;  %v10136_v16 = vld [vmem:[#allocation2 + $0xe8] ss:$48 sps:$4 sm:$0xff]   ;;  %v10140_v13 = vld [vmem:[#allocation2 + $0x2c] ss:$48 sps:$4 sm:$0xff]  }
 0x1ae   :  { %v10138_v63 = vld [vmem:[#allocation2 + $0x148] ss:$48 sps:$4 sm:$0xff]   ;;  %v1237_v26 = vrot.slane %v10136_v16, %v10405_v37  ;;  %v1028_v44 = vrot.slane %v10140_v13, %v10405_v37  ;;  %v1043_v36 = vcombine.low %v1021_v19, %v1035_v20  ;;  %v1258_v47 = vrot.slane %v10143_v23, %v10405_v37  ;;  %v10152_v15 = vld [vmem:[#allocation2 + $0x1ac] ss:$48 sps:$4 sm:$0xff]  }
 0x1af   :  { %v8814_v7 = vpop.f32.mrb[64].mxu0  ;;  %v4858_v58 = vpack.c.bf16 %v4250_v52, %v4034_v38  ;;  %v4857_v10 = vpack.c.bf16 %v4249_v54, %v4033_v50  ;;  %v10853_v61 = vadd.f32 %v8797_v40, %v6694_v34  ;;  %v1251_v27 = vrot.slane %v10138_v63, %v10405_v37  ;;  %v10148_v50 = vld [vmem:[#allocation2 + $0x268] ss:$48 sps:$4 sm:$0xff]  }
 0x1b0   :  { %v8878_v2 = vpop.f32.mrb[64].mxu1  ;;  %v8815_v57 = vpop.f32.mrb[65].mxu0  ;;  %v1042_v34 = vrot.slane %v10141_v24, %v10405_v37  ;;  %v1261_v55 = vcombine.low %v1244_v42, %v1258_v47  ;;  %v1262_v40 = vcombine.high %v1244_v42, %v1258_v47  ;;  %v10164_v47 = vld [vmem:[#allocation2 + $0x32c] ss:$48 sps:$4 sm:$0xff]  }
 0x1b1   :  { %v8816_v4 = vadd.f32 %v8815_v57, %v8814_v7  ;;  %v8879_v5 = vpop.f32.mrb[65].mxu1  ;;  %v8817_v6 = vpop.f32.mrb[66].mxu0  ;;  %7367 = vmatprep.mubr.bf16.mxu1 %v4858_v58  ;;  %v1259_v43 = vcombine.low %v1237_v26, %v1251_v27  ;;  %v1260_v46 = vcombine.high %v1237_v26, %v1251_v27  ;;  %v1453_v57 = vrot.slane %v10144_v53, %v10405_v37  ;;  %v10165_v53 = vld [vmem:[#allocation2 + $0x38c] ss:$48 sps:$4 sm:$0xff]  }
 0x1b2   :  { %v8880_v12 = vadd.f32 %v8879_v5, %v8878_v2  ;;  %v8881_v41 = vpop.f32.mrb[66].mxu1  ;;  %7271 = vmatmul.mubr.bf16.gmra.mrb[156].mxu0 %v4855_v56  ;;  %7368 = vmatmul.mubr.bf16.gmra.mrb[156].mxu1 %v4857_v10  ;;  %v8818_v9 = vpop.f32.mrb[67].mxu0  ;;  %v1045_v48 = vcombine.low %v1028_v44, %v1042_v34  ;;  %v1046_v38 = vcombine.high %v1028_v44, %v1042_v34  ;;  %v10153_v56 = vld [vmem:[#allocation2 + $0x20c] ss:$48 sps:$4 sm:$0xff]  }
 0x1b3   :  { %v6829_v18 = vadd.f32 %v8816_v4, %v10748_v32  ;;  %v8882_v31 = vpop.f32.mrb[67].mxu1  ;;  %v1044_v32 = vcombine.high %v1021_v19, %v1035_v20  ;;  %v8819_v22 = vadd.f32 %v8818_v9, %v8817_v6  ;;  %v4691_v7 = vpack.c.bf16 %v1259_v43, %v1043_v36  ;;  %v10154_v2 = vld [vmem:[#allocation2 + $0x26c] ss:$48 sps:$4 sm:$0xff]   ;;  %v10158_v36 = vld [vmem:[#allocation2 + $0x388] ss:$48 sps:$4 sm:$0xff]  }
 0x1b4   :  { %v10866_v52 = vadd.f32 %v8882_v31, %v8881_v41  ;;  %v1467_v58 = vrot.slane %v10146_v49, %v10405_v37  ;;  %v1669_v10 = vrot.slane %v10148_v50, %v10405_v37  ;;  %v1683_v4 = vrot.slane %v10150_v51, %v10405_v37  ;;  %v10155_v5 = vld [vmem:[#allocation2 + $0x2cc] ss:$48 sps:$4 sm:$0xff]   ;;  %v10156_v31 = vld [vmem:[#allocation2 + $0x328] ss:$48 sps:$4 sm:$0xff]  }
 0x1b5   :  { %v10861_v45 = vadd.f32 %v8880_v12, %v6829_v18  ;;  %v4692_v54 = vpack.c.bf16 %v1260_v46, %v1044_v32  ;;  %v4694_v17 = vpack.c.bf16 %v1262_v40, %v1046_v38  ;;  %v4693_v12 = vpack.c.bf16 %v1261_v55, %v1045_v48  ;;  %v10160_v32 = vld [vmem:[#allocation2 + $0x3e8] ss:$48 sps:$4 sm:$0xff]   ;;  %v10166_v51 = vld [vmem:[#allocation2 + $0x3ec] ss:$48 sps:$4 sm:$0xff]  }
 0x1b6   :  { %v1460_v41 = vrot.slane %v10152_v15, %v10405_v37  ;;  %v1474_v16 = vrot.slane %v10153_v56, %v10405_v37  ;;  %v1476_v18 = vcombine.high %v1453_v57, %v1467_v58  ;;  %v1692_v19 = vcombine.high %v1669_v10, %v1683_v4  ;;  %v10162_v46 = vld [vmem:[#allocation2 + $0x448] ss:$48 sps:$4 sm:$0xff]  }
 0x1b7   :  { %v10872_v6 = vpop.f32.mrb[68].mxu0  ;;  %7408 = vmatprep.mubr.bf16.mxu0 %v4692_v54  ;;  %v1676_v20 = vrot.slane %v10154_v2, %v10405_v37  ;;  %v1690_v24 = vrot.slane %v10155_v5, %v10405_v37  ;;  %7505 = vmatprep.mubr.bf16.mxu1 %v4694_v17  ;;  %v1475_v27 = vcombine.low %v1453_v57, %v1467_v58  ;;  %v10167_v54 = vld [vmem:[#allocation2 + $0x44c] ss:$48 sps:$4 sm:$0xff]  }
 0x1b8   :  { %v10874_v8 = vpop.f32.mrb[68].mxu1  ;;  %v10878_v63 = vpop.f32.mrb[69].mxu0  ;;  %v1478_v26 = vcombine.high %v1460_v41, %v1474_v16  ;;  %v1691_v44 = vcombine.low %v1669_v10, %v1683_v4  ;;  %v1477_v9 = vcombine.low %v1460_v41, %v1474_v16  ;;  %v4716_v34 = vpack.c.bf16 %v1692_v19, %v1476_v18  ;;  %v10168_v41 = vld [vmem:[#allocation2 + $0x4a8] ss:$48 sps:$4 sm:$0xff]  }
 0x1b9   :  { %v10880_v13 = vpop.f32.mrb[69].mxu1  ;;  %v10884_v25 = vpop.f32.mrb[70].mxu0  ;;  %v1694_v42 = vcombine.high %v1676_v20, %v1690_v24  ;;  %v1693_v43 = vcombine.low %v1676_v20, %v1690_v24  ;;  %v6832_v48 = vadd.f32 %v8819_v22, %v10755_v60  ;;  %v1885_v38 = vrot.slane %v10156_v31, %v10405_v37  ;;  %v10170_v16 = vld [vmem:[#allocation2 + $0x508] ss:$48 sps:$4 sm:$0xff]   ;;  %v10176_v31 = vld [vmem:[#allocation2 + $0x4ac] ss:$48 sps:$4 sm:$0xff]  }
 0x1ba   :  { %7409 = vmatmul.mubr.bf16.vlgmr.msra.gmra.mrb[160].mxu0 %v4691_v7  ;;  %v10886_v23 = vpop.f32.mrb[70].mxu1  ;;  %7506 = vmatmul.mubr.bf16.vlgmr.msra.gmra.mrb[160].mxu1 %v4693_v12  ;;  %v1899_v49 = vrot.slane %v10158_v36, %v10405_v37  ;;  %v2101_v50 = vrot.slane %v10160_v32, %v10405_v37  ;;  %v10892_v55 = vpop.f32.mrb[71].mxu0  ;;  %v4715_v7 = vpack.c.bf16 %v1691_v44, %v1475_v27  ;;  %v10172_v27 = vld [vmem:[#allocation2 + $0x568] ss:$48 sps:$4 sm:$0xff]  }
 0x1bb   :  { %7416 = vmatprep.mubr.bf16.mxu0 %v4716_v34  ;;  %v4718_v40 = vpack.c.bf16 %v1694_v42, %v1478_v26  ;;  %v2115_v15 = vrot.slane %v10162_v46, %v10405_v37  ;;  %v1892_v56 = vrot.slane %v10164_v47, %v10405_v37  ;;  %v10896_v2 = vpop.f32.mrb[71].mxu1  ;;  %v1906_v22 = vrot.slane %v10165_v53, %v10405_v37  ;;  %v10174_v44 = vld [vmem:[#allocation2 + $0x5c8] ss:$48 sps:$4 sm:$0xff]   ;;  %v10177_v34 = vld [vmem:[#allocation2 + $0x50c] ss:$48 sps:$4 sm:$0xff]  }
 0x1bc   :  { %v1908_v60 = vcombine.high %v1885_v38, %v1899_v49  ;;  %v2108_v57 = vrot.slane %v10166_v51, %v10405_v37  ;;  %v2122_v58 = vrot.slane %v10167_v54, %v10405_v37  ;;  %v4717_v4 = vpack.c.bf16 %v1693_v43, %v1477_v9  ;;  %v10178_v42 = vld [vmem:[#allocation2 + $0x56c] ss:$48 sps:$4 sm:$0xff]  }
 0x1bd   :  { %7513 = vmatprep.mubr.bf16.mxu1 %v4718_v40  ;;  %v2124_v5 = vcombine.high %v2101_v50, %v2115_v15  ;;  %v1907_v17 = vcombine.low %v1885_v38, %v1899_v49  ;;  %v10904_v12 = vadd.f32 %v10866_v52, %v6832_v48  ;;  %v1910_v19 = vcombine.high %v1892_v56, %v1906_v22  ;;  %v10179_v43 = vld [vmem:[#allocation2 + $0x5cc] ss:$48 sps:$4 sm:$0xff]  }
 0x1be   :  { %v2126_v20 = vcombine.high %v2108_v57, %v2122_v58  ;;  %v2123_v24 = vcombine.low %v2101_v50, %v2115_v15  ;;  %v1909_v26 = vcombine.low %v1892_v56, %v1906_v22  ;;  %v2125_v32 = vcombine.low %v2108_v57, %v2122_v58  ;;  %v10180_v22 = vld [vmem:[#allocation2 + $0x628] ss:$48 sps:$4 sm:$0xff]  }
 0x1bf   :  { %v10901_v10 = vpop.f32.mrb[72].mxu0  ;;  %v4740_v36 = vpack.c.bf16 %v2124_v5, %v1908_v60  ;;  %v10909_v9 = vrot.slane %v10168_v41, %v10405_v37  ;;  %v10912_v52 = vrot.slane %v10170_v16, %v10405_v37  ;;  %v2533_v47 = vrot.slane %v10172_v27, %v10405_v37  ;;  %v10182_v16 = vld [vmem:[#allocation2 + $0x688] ss:$48 sps:$4 sm:$0xff]  }
 0x1c0   :  { %v10906_v18 = vpop.f32.mrb[73].mxu0  ;;  %v4742_v46 = vpack.c.bf16 %v2126_v20, %v1910_v19  ;;  %v2547_v53 = vrot.slane %v10174_v44, %v10405_v37  ;;  %v10916_v48 = vpop.f32.mrb[72].mxu1  ;;  %v2324_v50 = vrot.slane %v10176_v31, %v10405_v37  ;;  %v2338_v51 = vrot.slane %v10177_v34, %v10405_v37  ;;  %v10184_v19 = vld [vmem:[#allocation2 + $0x6e8] ss:$48 sps:$4 sm:$0xff]   ;;  %v10188_v31 = vld [vmem:[#allocation2 + $0x62c] ss:$48 sps:$4 sm:$0xff]  }
 0x1c1   :  { %v10918_v38 = vpop.f32.mrb[74].mxu0  ;;  %v2340_v49 = vcombine.high %v10909_v9, %v10912_v52  ;;  %v10924_v54 = vpop.f32.mrb[73].mxu1  ;;  %v2540_v56 = vrot.slane %v10178_v42, %v10405_v37  ;;  %v2554_v60 = vrot.slane %v10179_v43, %v10405_v37  ;;  %v4741_v58 = vpack.c.bf16 %v2125_v32, %v1909_v26  ;;  %v10186_v20 = vld [vmem:[#allocation2 + $0x748] ss:$48 sps:$4 sm:$0xff]   ;;  %v10190_v34 = vld [vmem:[#allocation2 + $0x6ec] ss:$48 sps:$4 sm:$0xff]  }
 0x1c2   :  { %7417 = vmatmul.mubr.bf16.gmra.mrb[164].mxu0 %v4715_v7  ;;  %7514 = vmatmul.mubr.bf16.gmra.mrb[164].mxu1 %v4717_v4  ;;  %v10926_v40 = vpop.f32.mrb[75].mxu0  ;;  %v4739_v7 = vpack.c.bf16 %v2123_v24, %v1907_v17  ;;  %v2556_v15 = vcombine.high %v2533_v47, %v2547_v53  ;;  %v10930_v57 = vpop.f32.mrb[74].mxu1  ;;  %v2342_v4 = vcombine.high %v2324_v50, %v2338_v51 }
 0x1c3   :  { %7424 = vmatprep.mubr.bf16.mxu0 %v4740_v36  ;;  %7521 = vmatprep.mubr.bf16.mxu1 %v4742_v46  ;;  %v2339_v5 = vcombine.low %v10909_v9, %v10912_v52  ;;  %v8822_v41 = vadd.f32 %v10878_v63, %v10872_v6  ;;  %v2558_v24 = vcombine.high %v2540_v56, %v2554_v60  ;;  %v10189_v36 = vld [vmem:[#allocation2 + $0x68c] ss:$48 sps:$4 sm:$0xff]   ;;  %v8894_v52 = vpop.f32.mrb[75].mxu1 }
 0x1c4   :  { %v4764_v17 = vpack.c.bf16 %v2556_v15, %v2340_v49  ;;  %v2555_v27 = vcombine.low %v2533_v47, %v2547_v53  ;;  %v8886_v44 = vadd.f32 %v10880_v13, %v10874_v8  ;;  %v2341_v26 = vcombine.low %v2324_v50, %v2338_v51  ;;  %v10191_v63 = vld [vmem:[#allocation2 + $0x74c] ss:$48 sps:$4 sm:$0xff]   ;;  %v10192_v51 = vld [vmem:[#allocation2 + $0x7a8] ss:$48 sps:$4 sm:$0xff]  }
 0x1c5   :  { %v6837_v32 = vadd.f32 %v8822_v41, %v10761_v28  ;;  %v8825_v9 = vadd.f32 %v10892_v55, %v10884_v25  ;;  %v8889_v6 = vadd.f32 %v10896_v2, %v10886_v23  ;;  %v4766_v42 = vpack.c.bf16 %v2558_v24, %v2342_v4  ;;  %v10196_v15 = vld [vmem:[#allocation2 + $0x868] ss:$48 sps:$4 sm:$0xff]  }
 0x1c6   :  { %v2557_v43 = vcombine.low %v2540_v56, %v2554_v60  ;;  %v10944_v46 = vrot.slane %v10180_v22, %v10405_v37  ;;  %v10947_v8 = vrot.slane %v10182_v16, %v10405_v37  ;;  %v10955_v55 = vrot.slane %v10184_v19, %v10405_v37  ;;  %v10198_v41 = vld [vmem:[#allocation2 + $0x8c8] ss:$48 sps:$4 sm:$0xff]   ;;  %v10200_v16 = vld [vmem:[#allocation2 + $0x7ac] ss:$48 sps:$4 sm:$0xff]  }
 0x1c7   :  { %v10949_v13 = vpop.f32.mrb[76].mxu0  ;;  %v10951_v28 = vadd.f32 %v8886_v44, %v6837_v32  ;;  %v6840_v25 = vadd.f32 %v8825_v9, %v10769_v0  ;;  %v10958_v23 = vrot.slane %v10186_v20, %v10405_v37  ;;  %v10967_v49 = vrot.slane %v10188_v31, %v10405_v37  ;;  %v10201_v19 = vld [vmem:[#allocation2 + $0x80c] ss:$48 sps:$4 sm:$0xff]  }
 0x1c8   :  { %v10960_v2 = vpop.f32.mrb[76].mxu1  ;;  %v10962_v47 = vpop.f32.mrb[77].mxu0  ;;  %v2772_v53 = vcombine.high %v10944_v46, %v10947_v8  ;;  %v10970_v50 = vrot.slane %v10189_v36, %v10405_v37  ;;  %v10973_v0 = vrot.slane %v10190_v34, %v10405_v37  ;;  %v4763_v56 = vpack.c.bf16 %v2555_v27, %v2339_v5  ;;  %v10202_v5 = vld [vmem:[#allocation2 + $0x86c] ss:$48 sps:$4 sm:$0xff]  }
 0x1c9   :  { %v10975_v60 = vadd.f32 %v8889_v6, %v6840_v25  ;;  %v2988_v22 = vcombine.high %v10955_v55, %v10958_v23  ;;  %v2986_v4 = vrot.slane %v10191_v63, %v10405_v37  ;;  %v4765_v20 = vpack.c.bf16 %v2557_v43, %v2341_v26  ;;  %v10203_v27 = vld [vmem:[#allocation2 + $0x8cc] ss:$48 sps:$4 sm:$0xff]   ;;  %v8897_v44 = vpop.f32.mrb[77].mxu1  ;;  %v8835_v31 = vpop.f32.mrb[78].mxu0 }
 0x1ca   :  { %7425 = vmatmul.mubr.bf16.gmra.mrb[168].mxu0 %v4739_v7  ;;  %v10194_v7 = vld [vmem:[#allocation2 + $0x808] ss:$48 sps:$4 sm:$0xff]   ;;  %7522 = vmatmul.mubr.bf16.gmra.mrb[168].mxu1 %v4741_v58  ;;  %v2771_v24 = vcombine.low %v10944_v46, %v10947_v8  ;;  %v8828_v58 = vadd.f32 %v10906_v18, %v10901_v10  ;;  %v2987_v34 = vcombine.low %v10955_v55, %v10958_v23  ;;  %v8899_v9 = vpop.f32.mrb[78].mxu1  ;;  %v8836_v6 = vpop.f32.mrb[79].mxu0 }
 0x1cb   :  { %7432 = vmatprep.mubr.bf16.mxu0 %v4764_v17  ;;  %7529 = vmatprep.mubr.bf16.mxu1 %v4766_v42  ;;  %v2774_v17 = vcombine.high %v10967_v49, %v10970_v50  ;;  %v2990_v36 = vcombine.high %v10973_v0, %v2986_v4  ;;  %v2773_v26 = vcombine.low %v10967_v49, %v10970_v50  ;;  %v8900_v43 = vpop.f32.mrb[79].mxu1  ;;  %v10208_v49 = vld [vmem:[#allocation2 + $0x9e8] ss:$48 sps:$4 sm:$0xff]  }
 0x1cc   :  { %v8892_v32 = vadd.f32 %v10924_v54, %v10916_v48  ;;  %v4788_v63 = vpack.c.bf16 %v2988_v22, %v2772_v53  ;;  %v6845_v10 = vadd.f32 %v8828_v58, %v10777_v1  ;;  %v8831_v18 = vadd.f32 %v10926_v40, %v10918_v38  ;;  %v10204_v40 = vld [vmem:[#allocation2 + $0x928] ss:$48 sps:$4 sm:$0xff]   ;;  %v10214_v22 = vld [vmem:[#allocation2 + $0x9ec] ss:$48 sps:$4 sm:$0xff]  }
 0x1cd   :  { %v8895_v42 = vadd.f32 %v8894_v52, %v10930_v57  ;;  %v4790_v46 = vpack.c.bf16 %v2990_v36, %v2774_v17  ;;  %v2989_v8 = vcombine.low %v10973_v0, %v2986_v4  ;;  %v10999_v25 = vrot.slane %v10192_v51, %v10405_v37  ;;  %v10206_v53 = vld [vmem:[#allocation2 + $0x988] ss:$48 sps:$4 sm:$0xff]  }
 0x1ce   :  { %v11002_v55 = vrot.slane %v10194_v7, %v10405_v37  ;;  %v11004_v48 = vadd.f32 %v8892_v32, %v6845_v10  ;;  %v6848_v54 = vadd.f32 %v8831_v18, %v10783_v11  ;;  %v11008_v1 = vrot.slane %v10196_v15, %v10405_v37  ;;  %v10210_v11 = vld [vmem:[#allocation2 + $0xa48] ss:$48 sps:$4 sm:$0xff]   ;;  %v10212_v15 = vld [vmem:[#allocation2 + $0x92c] ss:$48 sps:$4 sm:$0xff]  }
 0x1cf   :  { %v11011_v38 = vrot.slane %v10198_v41, %v10405_v37  ;;  %v11014_v57 = vrot.slane %v10200_v16, %v10405_v37  ;;  %v11017_v52 = vrot.slane %v10201_v19, %v10405_v37  ;;  %v11020_v23 = vrot.slane %v10202_v5, %v10405_v37  ;;  %v8838_v4 = vpop.f32.mrb[80].mxu0 }
 0x1d0   :  { %v11022_v50 = vadd.f32 %v8895_v42, %v6848_v54  ;;  %v3204_v0 = vcombine.high %v10999_v25, %v11002_v55  ;;  %v11029_v7 = vrot.slane %v10203_v27, %v10405_v37  ;;  %v8902_v41 = vpop.f32.mrb[80].mxu1  ;;  %v4787_v16 = vpack.c.bf16 %v2987_v34, %v2771_v24  ;;  %v8839_v17 = vpop.f32.mrb[81].mxu0  ;;  %v10215_v34 = vld [vmem:[#allocation2 + $0xa4c] ss:$48 sps:$4 sm:$0xff]  }
 0x1d1   :  { %v3420_v51 = vcombine.high %v11008_v1, %v11011_v38  ;;  %v8834_v19 = vadd.f32 %v10962_v47, %v10949_v13  ;;  %v8903_v58 = vpop.f32.mrb[81].mxu1  ;;  %v4789_v5 = vpack.c.bf16 %v2989_v8, %v2773_v26  ;;  %v3206_v36 = vcombine.high %v11014_v57, %v11017_v52 }
 0x1d2   :  { %7433 = vmatmul.mubr.bf16.gmra.mrb[172].mxu0 %v4763_v56  ;;  %v10213_v56 = vld [vmem:[#allocation2 + $0x98c] ss:$48 sps:$4 sm:$0xff]   ;;  %7530 = vmatmul.mubr.bf16.gmra.mrb[172].mxu1 %v4765_v20  ;;  %v3422_v27 = vcombine.high %v11020_v23, %v11029_v7  ;;  %v8898_v32 = vadd.f32 %v8897_v44, %v10960_v2  ;;  %v8905_v10 = vpop.f32.mrb[82].mxu1  ;;  %v3203_v20 = vcombine.low %v10999_v25, %v11002_v55 }
 0x1d3   :  { %7440 = vmatprep.mubr.bf16.mxu0 %v4788_v63  ;;  %7537 = vmatprep.mubr.bf16.mxu1 %v4790_v46  ;;  %v8841_v63 = vpop.f32.mrb[82].mxu0  ;;  %v6853_v24 = vadd.f32 %v8834_v19, %v10790_v21  ;;  %v8837_v13 = vadd.f32 %v8836_v6, %v8835_v31  ;;  %v8901_v47 = vadd.f32 %v8900_v43, %v8899_v9  ;;  %v8906_v26 = vpop.f32.mrb[83].mxu1 }
 0x1d4   :  { %v8842_v18 = vpop.f32.mrb[83].mxu0  ;;  %v4812_v42 = vpack.c.bf16 %v3420_v51, %v3204_v0  ;;  %v3419_v46 = vcombine.low %v11008_v1, %v11011_v38  ;;  %v11044_v8 = vrot.slane %v10204_v40, %v10405_v37  ;;  %v11047_v2 = vrot.slane %v10206_v53, %v10405_v37  ;;  %v10216_v40 = vld [vmem:[#allocation2 + $0xaa8] ss:$48 sps:$4 sm:$0xff]  }
 0x1d5   :  { %v11049_v44 = vadd.f32 %v8898_v32, %v6853_v24  ;;  %v6856_v25 = vadd.f32 %v8837_v13, %v10797_v59  ;;  %v11053_v21 = vrot.slane %v10208_v49, %v10405_v37  ;;  %v11056_v31 = vrot.slane %v10210_v11, %v10405_v37  ;;  %v10218_v53 = vld [vmem:[#allocation2 + $0xb08] ss:$48 sps:$4 sm:$0xff]  }
 0x1d6   :  { %v4814_v9 = vpack.c.bf16 %v3422_v27, %v3206_v36  ;;  %v11059_v6 = vrot.slane %v10212_v15, %v10405_v37  ;;  %v11062_v43 = vrot.slane %v10213_v56, %v10405_v37  ;;  %v11065_v55 = vrot.slane %v10214_v22, %v10405_v37  ;;  %v10220_v0 = vld [vmem:[#allocation2 + $0xb68] ss:$48 sps:$4 sm:$0xff]   ;;  %v10224_v36 = vld [vmem:[#allocation2 + $0xaac] ss:$48 sps:$4 sm:$0xff]  }
 0x1d7   :  { %v11067_v54 = vadd.f32 %v8901_v47, %v6856_v25  ;;  %v3636_v59 = vcombine.high %v11044_v8, %v11047_v2  ;;  %v3852_v1 = vcombine.high %v11053_v21, %v11056_v31  ;;  %v11074_v38 = vrot.slane %v10215_v34, %v10405_v37  ;;  %v10222_v51 = vld [vmem:[#allocation2 + $0xbc8] ss:$48 sps:$4 sm:$0xff]   ;;  %v8844_v15 = vpop.f32.mrb[84].mxu0  ;;  %v10225_v27 = vld [vmem:[#allocation2 + $0xb0c] ss:$48 sps:$4 sm:$0xff]  }
 0x1d8   :  { %v3205_v49 = vcombine.low %v11014_v57, %v11017_v52  ;;  %v8840_v11 = vadd.f32 %v8839_v17, %v8838_v4  ;;  %v3421_v56 = vcombine.low %v11020_v23, %v11029_v7  ;;  %v3638_v22 = vcombine.high %v11059_v6, %v11062_v43  ;;  %v8845_v32 = vpop.f32.mrb[85].mxu0  ;;  %v10226_v17 = vld [vmem:[#allocation2 + $0xb6c] ss:$48 sps:$4 sm:$0xff]   ;;  %v8908_v24 = vpop.f32.mrb[84].mxu1 }
 0x1d9   :  { %v8904_v19 = vadd.f32 %v8903_v58, %v8902_v41  ;;  %v8843_v52 = vadd.f32 %v8842_v18, %v8841_v63  ;;  %v8907_v4 = vadd.f32 %v8906_v26, %v8905_v10  ;;  %v8847_v13 = vpop.f32.mrb[86].mxu0  ;;  %v4811_v23 = vpack.c.bf16 %v3419_v46, %v3203_v20  ;;  %v8909_v41 = vpop.f32.mrb[85].mxu1 }
 0x1da   :  { %7441 = vmatmul.mubr.bf16.gmra.mrb[176].mxu0 %v4787_v16  ;;  %7538 = vmatmul.mubr.bf16.gmra.mrb[176].mxu1 %v4789_v5  ;;  %v3854_v16 = vcombine.high %v11065_v55, %v11074_v38  ;;  %v6861_v57 = vadd.f32 %v8840_v11, %v10803_v39  ;;  %v10227_v5 = vld [vmem:[#allocation2 + $0xbcc] ss:$48 sps:$4 sm:$0xff]   ;;  %v4836_v7 = vpack.c.bf16 %v3852_v1, %v3636_v59  ;;  %v8848_v58 = vpop.f32.mrb[87].mxu0  ;;  %v8911_v18 = vpop.f32.mrb[86].mxu1 }
 0x1db   :  { %7448 = vmatprep.mubr.bf16.mxu0 %v4812_v42  ;;  %7545 = vmatprep.mubr.bf16.mxu1 %v4814_v9  ;;  %v11086_v47 = vrot.slane %v10216_v40, %v10405_v37  ;;  %v11089_v34 = vrot.slane %v10218_v53, %v10405_v37  ;;  %v6864_v39 = vadd.f32 %v8843_v52, %v10811_v62  ;;  %v8912_v25 = vpop.f32.mrb[87].mxu1 }
 0x1dc   :  { %v11091_v42 = vadd.f32 %v8904_v19, %v6861_v57  ;;  %v4261_v63 = vrot.slane %v10220_v0, %v10405_v37  ;;  %v4275_v10 = vrot.slane %v10222_v51, %v10405_v37  ;;  %v4813_v26 = vpack.c.bf16 %v3421_v56, %v3205_v49 }
 0x1dd   :  { %v4838_v20 = vpack.c.bf16 %v3854_v16, %v3638_v22  ;;  %v4052_v46 = vrot.slane %v10224_v36, %v10405_v37  ;;  %v11097_v9 = vadd.f32 %v8907_v4, %v6864_v39  ;;  %v4066_v59 = vrot.slane %v10225_v27, %v10405_v37 }
 0x1de   :  { %v4268_v1 = vrot.slane %v10226_v17, %v10405_v37  ;;  %v4282_v40 = vrot.slane %v10227_v5, %v10405_v37  ;;  %v3635_v62 = vcombine.low %v11044_v8, %v11047_v2  ;;  %v3851_v53 = vcombine.low %v11053_v21, %v11056_v31 }
 0x1df   :  { %v8846_v49 = vadd.f32 %v8845_v32, %v8844_v15  ;;  %v3637_v11 = vcombine.low %v11059_v6, %v11062_v43  ;;  %v4068_v0 = vcombine.high %v11086_v47, %v11089_v34  ;;  %v4284_v51 = vcombine.high %v4261_v63, %v4275_v10  ;;  %v8850_v15 = vpop.f32.mrb[88].mxu0 }
 0x1e0   :  { %v8910_v56 = vadd.f32 %v8909_v41, %v8908_v24  ;;  %v3853_v37 = vcombine.low %v11065_v55, %v11074_v38  ;;  %v8849_v8 = vadd.f32 %v8848_v58, %v8847_v13  ;;  %v8913_v2 = vadd.f32 %v8912_v25, %v8911_v18  ;;  %v8914_v43 = vpop.f32.mrb[88].mxu1  ;;  %v8851_v36 = vpop.f32.mrb[89].mxu0 }
 0x1e1   :  { %v6869_v22 = vadd.f32 %v8846_v49, %v10819_v30  ;;  %v4070_v21 = vcombine.high %v4052_v46, %v4066_v59  ;;  %v4286_v31 = vcombine.high %v4268_v1, %v4282_v40  ;;  %v4835_v16 = vpack.c.bf16 %v3851_v53, %v3635_v62  ;;  %v8915_v57 = vpop.f32.mrb[89].mxu1  ;;  %v8853_v52 = vpop.f32.mrb[90].mxu0 }
 0x1e2   :  { %7449 = vmatmul.mubr.bf16.gmra.mrb[180].mxu0 %v4811_v23  ;;  %7546 = vmatmul.mubr.bf16.gmra.mrb[180].mxu1 %v4813_v26  ;;  %v6872_v6 = vadd.f32 %v8849_v8, %v10825_v14  ;;  %v4860_v27 = vpack.c.bf16 %v4284_v51, %v4068_v0  ;;  %v8852_v32 = vadd.f32 %v8851_v36, %v8850_v15  ;;  %v8917_v4 = vpop.f32.mrb[90].mxu1  ;;  %v8854_v17 = vpop.f32.mrb[91].mxu0  ;;  %v7586_v8 = vld [vmem:[#allocation7] sm:$0xff] }
 0x1e3   :  { %7456 = vmatprep.mubr.bf16.mxu0 %v4836_v7  ;;  %7553 = vmatprep.mubr.bf16.mxu1 %v4838_v20  ;;  %v11113_v19 = vadd.f32 %v8910_v56, %v6869_v22  ;;  %v4837_v55 = vpack.c.bf16 %v3853_v37, %v3637_v11  ;;  %v8916_v30 = vadd.f32 %v8915_v57, %v8914_v43  ;;  %v8918_v23 = vpop.f32.mrb[91].mxu1  ;;  %v7589_v57 = vld [vmem:[#allocation7 + $0x18] sm:$0xff] }
 0x1e4   :  { %v11116_v38 = vadd.f32 %v8913_v2, %v6872_v6  ;;  %v4862_v5 = vpack.c.bf16 %v4286_v31, %v4070_v21  ;;  %v6877_v24 = vadd.f32 %v8852_v32, %v10832_v3  ;;  %v8855_v13 = vadd.f32 %v8854_v17, %v8853_v52  ;;  %v7587_v2 = vld [vmem:[#allocation7 + $0x8] sm:$0xff] }
 0x1e5   :  { %v4067_v14 = vcombine.low %v11086_v47, %v11089_v34  ;;  %v4283_v7 = vcombine.low %v4261_v63, %v4275_v10  ;;  %v8919_v41 = vadd.f32 %v8918_v23, %v8917_v4  ;;  %v4069_v18 = vcombine.low %v4052_v46, %v4066_v59 }
 0x1e6   :  { %v11121_v58 = vadd.f32 %v8916_v30, %v6877_v24  ;;  %v6880_v39 = vadd.f32 %v8855_v13, %v10839_v29  ;;  %v4285_v26 = vcombine.low %v4268_v1, %v4282_v40  ;;  %v9398_v15 = vpack.c.bf16 %v7587_v2, %v7586_v8  ;;  %v7591_v24 = vld [vmem:[#allocation7 + $0x28] sm:$0xff]  ;;  %v7596_v2 = vld [vmem:[#allocation7 + $0x50] sm:$0xff] }
 0x1e7   :  { %v4859_v3 = vpack.c.bf16 %v4283_v7, %v4067_v14  ;;  %v8856_v25 = vpop.f32.mrb[92].mxu0 }
 0x1e8   :  { %v11124_v20 = vadd.f32 %v8919_v41, %v6880_v39  ;;  %v8920_v62 = vpop.f32.mrb[92].mxu1  ;;  %v8857_v53 = vpop.f32.mrb[93].mxu0  ;;  %v4861_v49 = vpack.c.bf16 %v4285_v26, %v4069_v18  ;;  %9399 = vmatprep.subr.bf16.mxu0 %v9398_v15  ;;  %9430 = vmatprep.subr.bf16.mxu1 %v9398_v15 }
 0x1e9   :  { %v8858_v11 = vadd.f32 %v8857_v53, %v8856_v25  ;;  %v8921_v47 = vpop.f32.mrb[93].mxu1  ;;  %v8859_v34 = vpop.f32.mrb[94].mxu0  ;;  %9401 = vmatpush3.bf16.msra.mxu0 %v9398_v15  ;;  %9438 = vmatpush3.bf16.msra.mxu1 %v9398_v15  ;;  %v7592_v25 = vld [vmem:[#allocation7 + $0x30] sm:$0xff] }
 0x1ea   :  { %7457 = vmatmul.mubr.bf16.gmra.mrb[184].mxu0 %v4835_v16  ;;  %7554 = vmatmul.mubr.bf16.gmra.mrb[184].mxu1 %v4837_v55  ;;  %v8922_v63 = vadd.f32 %v8921_v47, %v8920_v62  ;;  %v8923_v10 = vpop.f32.mrb[94].mxu1  ;;  %v8860_v0 = vpop.f32.mrb[95].mxu0  ;;  %v7593_v62 = vld [vmem:[#allocation7 + $0x38] sm:$0xff] }
 0x1eb   :  { %7464 = vmatprep.mubr.bf16.mxu0 %v4860_v27  ;;  %7561 = vmatprep.mubr.bf16.mxu1 %v4862_v5  ;;  %v6885_v29 = vadd.f32 %v8858_v11, %v10845_v35  ;;  %v8861_v51 = vadd.f32 %v8860_v0, %v8859_v34  ;;  %v8924_v46 = vpop.f32.mrb[95].mxu1  ;;  %v7590_v5 = vld [vmem:[#allocation7 + $0x20] sm:$0xff]  ;;  %v9410_v47 = vpack.c.bf16 %v7593_v62, %v7592_v25 }
 0x1ec   :  { %v8925_v59 = vadd.f32 %v8924_v46, %v8923_v10  ;;  %v9406_v23 = vpack.c.bf16 %v7591_v24, %v7590_v5  ;;  %v7594_v0 = vld [vmem:[#allocation7 + $0x40] sm:$0xff] }
 0x1ed   :  { %v11127_v1 = vadd.f32 %v8922_v63, %v6885_v29  ;;  %v6888_v40 = vadd.f32 %v8861_v51, %v10853_v61  ;;  %v7588_v61 = vld [vmem:[#allocation7 + $0x10] sm:$0xff]  ;;  %v7595_v29 = vld [vmem:[#allocation7 + $0x48] sm:$0xff] }
 0x1ee   :  { %v9402_v30 = vpack.c.bf16 %v7589_v57, %v7588_v61  ;;  %v9414_v46 = vpack.c.bf16 %v7595_v29, %v7594_v0  ;;  %v7598_v61 = vld [vmem:[#allocation7 + $0x60] sm:$0xff]  ;;  %v7599_v57 = vld [vmem:[#allocation7 + $0x68] sm:$0xff] }
 0x1ef   :  { %v11130_v56 = vadd.f32 %v8925_v59, %v6888_v40  ;;  %v8942_v37 = vpop.f32.mrb[96].mxu0 }
 0x1f0   :  { %v8943_v22 = vpop.f32.mrb[97].mxu0  ;;  %v9006_v16 = vpop.f32.mrb[96].mxu1  ;;  %9403 = vmatprep.subr.bf16.mxu0 %v9402_v30  ;;  %9431 = vmatprep.subr.bf16.mxu1 %v9402_v30 }
 0x1f1   :  { %v8944_v21 = vadd.f32 %v8943_v22, %v8942_v37  ;;  %v8945_v31 = vpop.f32.mrb[98].mxu0  ;;  %v9007_v43 = vpop.f32.mrb[97].mxu1  ;;  %9405 = vmatpush3.bf16.msra.mxu0 %v9402_v30  ;;  %9439 = vmatpush3.bf16.msra.mxu1 %v9402_v30 }
 0x1f2   :  { %7465 = vmatmul.mubr.bf16.gmra.mrb[188].mxu0 %v4859_v3  ;;  %7562 = vmatmul.mubr.bf16.gmra.mrb[188].mxu1 %v4861_v49  ;;  %v8946_v6 = vpop.f32.mrb[99].mxu0  ;;  %v9008_v27 = vadd.f32 %v9007_v43, %v9006_v16  ;;  %v9009_v32 = vpop.f32.mrb[98].mxu1 }
 0x1f3   :  { %v7023_v35 = vadd.f32 %v8944_v21, %v10861_v45  ;;  %v8947_v36 = vadd.f32 %v8946_v6, %v8945_v31  ;;  %v9010_v55 = vpop.f32.mrb[99].mxu1  ;;  %9407 = vmatprep.subr.bf16.mxu0 %v9406_v23  ;;  %9432 = vmatprep.subr.bf16.mxu1 %v9406_v23 }
 0x1f4   :  { %v9011_v17 = vadd.f32 %v9010_v55, %v9009_v32 }
 0x1f5   :  { %v7026_v52 = vadd.f32 %v8947_v36, %v10904_v12  ;;  %v11134_v4 = vadd.f32 %v9008_v27, %v7023_v35  ;;  %9409 = vmatpush3.bf16.msra.mxu0 %v9406_v23  ;;  %9440 = vmatpush3.bf16.msra.mxu1 %v9406_v23 }
 0x1f6   :  { %9411 = vmatprep.subr.bf16.mxu0 %v9410_v47  ;;  %9433 = vmatprep.subr.bf16.mxu1 %v9410_v47 }
 0x1f7   :  { %v11136_v45 = vadd.f32 %v9011_v17, %v7026_v52  ;;  %v9422_v52 = vpack.c.bf16 %v7599_v57, %v7598_v61  ;;  %v7601_v17 = vld [vmem:[#allocation7 + $0x78] sm:$0xff] }
 0x1f9   :  { %9413 = vmatpush3.bf16.msra.mxu0 %v9410_v47  ;;  %9441 = vmatpush3.bf16.msra.mxu1 %v9410_v47 }
 0x1fa   :  { %9415 = vmatprep.subr.bf16.mxu0 %v9414_v46  ;;  %9434 = vmatprep.subr.bf16.mxu1 %v9414_v46 }
 0x1fd   :  { %9417 = vmatpush3.bf16.msra.mxu0 %v9414_v46  ;;  %9442 = vmatpush3.bf16.msra.mxu1 %v9414_v46 }
 0x20b   :  { %v8948_v13 = vpop.f32.mrb[100].mxu0 }
 0x20c   :  { %v8949_v7 = vpop.f32.mrb[101].mxu0 }
 0x20d   :  { %v9012_v14 = vpop.f32.mrb[100].mxu1  ;;  %v8950_v41 = vadd.f32 %v8949_v7, %v8948_v13  ;;  %v8951_v12 = vpop.f32.mrb[102].mxu0 }
 0x20e   :  { %v9013_v39 = vpop.f32.mrb[101].mxu1  ;;  %v8952_v3 = vpop.f32.mrb[103].mxu0 }
 0x20f   :  { %v9014_v18 = vadd.f32 %v9013_v39, %v9012_v14  ;;  %v9015_v26 = vpop.f32.mrb[102].mxu1  ;;  %v7031_v53 = vadd.f32 %v8950_v41, %v10951_v28  ;;  %v8953_v49 = vadd.f32 %v8952_v3, %v8951_v12 }
 0x210   :  { %v9016_v11 = vpop.f32.mrb[103].mxu1 }
 0x211   :  { %v9017_v34 = vadd.f32 %v9016_v11, %v9015_v26  ;;  %v11139_v63 = vadd.f32 %v9014_v18, %v7031_v53  ;;  %v7034_v10 = vadd.f32 %v8953_v49, %v10975_v60  ;;  %v7597_v60 = vld [vmem:[#allocation7 + $0x58] sm:$0xff] }
 0x212   :  { %v9418_v16 = vpack.c.bf16 %v7597_v60, %v7596_v2 }
 0x213   :  { %v11142_v51 = vadd.f32 %v9017_v34, %v7034_v10 }
 0x214   :  { %v8954_v59 = vpop.f32.mrb[104].mxu0  ;;  %9419 = vmatprep.subr.bf16.mxu0 %v9418_v16  ;;  %9435 = vmatprep.subr.bf16.mxu1 %v9418_v16 }
 0x215   :  { %v8955_v28 = vpop.f32.mrb[105].mxu0  ;;  %9421 = vmatpush3.bf16.msra.mxu0 %v9418_v16  ;;  %9443 = vmatpush3.bf16.msra.mxu1 %v9418_v16 }
 0x216   :  { %v9018_v40 = vpop.f32.mrb[104].mxu1  ;;  %v8956_v37 = vadd.f32 %v8955_v28, %v8954_v59  ;;  %v8957_v8 = vpop.f32.mrb[106].mxu0  ;;  %9423 = vmatprep.subr.bf16.mxu0 %v9422_v52  ;;  %9436 = vmatprep.subr.bf16.mxu1 %v9422_v52 }
 0x217   :  { %v9019_v22 = vpop.f32.mrb[105].mxu1  ;;  %v8958_v15 = vpop.f32.mrb[107].mxu0 }
 0x218   :  { %v9020_v21 = vadd.f32 %v9019_v22, %v9018_v40  ;;  %v9021_v31 = vpop.f32.mrb[106].mxu1  ;;  %v7039_v6 = vadd.f32 %v8956_v37, %v11004_v48  ;;  %v8959_v35 = vadd.f32 %v8958_v15, %v8957_v8  ;;  %v7600_v48 = vld [vmem:[#allocation7 + $0x70] sm:$0xff] }
 0x219   :  { %v9022_v43 = vpop.f32.mrb[107].mxu1  ;;  %9425 = vmatpush3.bf16.msra.mxu0 %v9422_v52  ;;  %9444 = vmatpush3.bf16.msra.mxu1 %v9422_v52  ;;  %v9426_v13 = vpack.c.bf16 %v7601_v17, %v7600_v48 }
 0x21a   :  { %v9023_v36 = vadd.f32 %v9022_v43, %v9021_v31  ;;  %v11145_v27 = vadd.f32 %v9020_v21, %v7039_v6  ;;  %v7042_v32 = vadd.f32 %v8959_v35, %v11022_v50 }
 0x21b   :  { %9427 = vmatprep.subr.bf16.mxu0 %v9426_v13  ;;  %9437 = vmatprep.subr.bf16.mxu1 %v9426_v13 }
 0x21c   :  { %v11148_v55 = vadd.f32 %v9023_v36, %v7042_v32 }
 0x21d   :  { %9429 = vmatpush3.bf16.msra.mxu0 %v9426_v13  ;;  %9445 = vmatpush3.bf16.msra.mxu1 %v9426_v13 }
 0x21e   :  { %v8960_v30 = vpop.f32.mrb[108].mxu0 }
 0x21f   :  { %v9024_v5 = vpop.f32.mrb[108].mxu1  ;;  %v8961_v24 = vpop.f32.mrb[109].mxu0 }
 0x220   :  { %v8962_v23 = vadd.f32 %v8961_v24, %v8960_v30  ;;  %v9025_v14 = vpop.f32.mrb[109].mxu1  ;;  %v8963_v50 = vpop.f32.mrb[110].mxu0 }
 0x221   :  { %v9026_v7 = vadd.f32 %v9025_v14, %v9024_v5  ;;  %v9027_v41 = vpop.f32.mrb[110].mxu1  ;;  %v8964_v39 = vpop.f32.mrb[111].mxu0 }
 0x222   :  { %v7047_v12 = vadd.f32 %v8962_v23, %v11049_v44  ;;  %v8965_v18 = vadd.f32 %v8964_v39, %v8963_v50  ;;  %v9028_v26 = vpop.f32.mrb[111].mxu1 }
 0x223   :  { %v9029_v3 = vadd.f32 %v9028_v26, %v9027_v41 }
 0x224   :  { %v11151_v25 = vadd.f32 %v9026_v7, %v7047_v12  ;;  %v7050_v62 = vadd.f32 %v8965_v18, %v11067_v54 }
 0x226   :  { %v11154_v53 = vadd.f32 %v9029_v3, %v7050_v62  ;;  %v8966_v49 = vpop.f32.mrb[112].mxu0 }
 0x227   :  { %v9030_v11 = vpop.f32.mrb[112].mxu1  ;;  %v8967_v47 = vpop.f32.mrb[113].mxu0 }
 0x228   :  { %v8968_v34 = vadd.f32 %v8967_v47, %v8966_v49  ;;  %v9031_v10 = vpop.f32.mrb[113].mxu1  ;;  %v8969_v0 = vpop.f32.mrb[114].mxu0 }
 0x229   :  { %v9032_v29 = vadd.f32 %v9031_v10, %v9030_v11  ;;  %v9033_v46 = vpop.f32.mrb[114].mxu1  ;;  %v8970_v44 = vpop.f32.mrb[115].mxu0 }
 0x22a   :  { %v7055_v59 = vadd.f32 %v8968_v34, %v11091_v42  ;;  %v8971_v40 = vadd.f32 %v8970_v44, %v8969_v0  ;;  %v9034_v28 = vpop.f32.mrb[115].mxu1 }
 0x22b   :  { %v9035_v37 = vadd.f32 %v9034_v28, %v9033_v46 }
 0x22c   :  { %v11157_v22 = vadd.f32 %v9032_v29, %v7055_v59  ;;  %v7058_v54 = vadd.f32 %v8971_v40, %v11097_v9 }
 0x22e   :  { %v11160_v8 = vadd.f32 %v9035_v37, %v7058_v54  ;;  %v8972_v2 = vpop.f32.mrb[116].mxu0 }
 0x22f   :  { %v8973_v60 = vpop.f32.mrb[117].mxu0 }
 0x230   :  { %v9036_v21 = vpop.f32.mrb[116].mxu1  ;;  %v8974_v31 = vadd.f32 %v8973_v60, %v8972_v2  ;;  %v8975_v15 = vpop.f32.mrb[118].mxu0 }
 0x231   :  { %v9037_v16 = vpop.f32.mrb[117].mxu1  ;;  %v8976_v6 = vpop.f32.mrb[119].mxu0 }
 0x232   :  { %v7063_v35 = vadd.f32 %v8974_v31, %v11113_v19  ;;  %v9038_v43 = vadd.f32 %v9037_v16, %v9036_v21  ;;  %v9039_v42 = vpop.f32.mrb[118].mxu1  ;;  %v8977_v36 = vadd.f32 %v8976_v6, %v8975_v15 }
 0x233   :  { %v9040_v32 = vpop.f32.mrb[119].mxu1 }
 0x234   :  { %v11163_v61 = vadd.f32 %v9038_v43, %v7063_v35  ;;  %v7066_v57 = vadd.f32 %v8977_v36, %v11116_v38  ;;  %v9041_v9 = vadd.f32 %v9040_v32, %v9039_v42 }
 0x236   :  { %v11166_v52 = vadd.f32 %v9041_v9, %v7066_v57 }
 0x237   :  { %v8978_v30 = vpop.f32.mrb[120].mxu0 }
 0x238   :  { %v8979_v17 = vpop.f32.mrb[121].mxu0 }
 0x239   :  { %v9042_v48 = vpop.f32.mrb[120].mxu1  ;;  %v8980_v5 = vadd.f32 %v8979_v17, %v8978_v30  ;;  %v8981_v13 = vpop.f32.mrb[122].mxu0 }
 0x23a   :  { %v9043_v24 = vpop.f32.mrb[121].mxu1  ;;  %v8982_v19 = vpop.f32.mrb[123].mxu0 }
 0x23b   :  { %v9044_v23 = vadd.f32 %v9043_v24, %v9042_v48  ;;  %v9045_v14 = vpop.f32.mrb[122].mxu1  ;;  %v7071_v50 = vadd.f32 %v8980_v5, %v11121_v58  ;;  %v8983_v7 = vadd.f32 %v8982_v19, %v8981_v13 }
 0x23c   :  { %v9046_v41 = vpop.f32.mrb[123].mxu1 }
 0x23d   :  { %v9047_v39 = vadd.f32 %v9046_v41, %v9045_v14  ;;  %v11169_v12 = vadd.f32 %v9044_v23, %v7071_v50  ;;  %v7074_v38 = vadd.f32 %v8983_v7, %v11124_v20 }
 0x23f   :  { %v11172_v18 = vadd.f32 %v9047_v39, %v7074_v38 }
 0x240   :  { %v8984_v26 = vpop.f32.mrb[124].mxu0 }
 0x241   :  { %v9048_v3 = vpop.f32.mrb[124].mxu1  ;;  %v8985_v62 = vpop.f32.mrb[125].mxu0 }
 0x242   :  { %v8986_v49 = vadd.f32 %v8985_v62, %v8984_v26  ;;  %v9049_v11 = vpop.f32.mrb[125].mxu1  ;;  %v8987_v47 = vpop.f32.mrb[126].mxu0 }
 0x243   :  { %v9050_v34 = vadd.f32 %v9049_v11, %v9048_v3  ;;  %v9051_v10 = vpop.f32.mrb[126].mxu1  ;;  %v8988_v0 = vpop.f32.mrb[127].mxu0 }
 0x244   :  { %v7079_v58 = vadd.f32 %v8986_v49, %v11127_v1  ;;  %v8989_v29 = vadd.f32 %v8988_v0, %v8987_v47  ;;  %v9052_v46 = vpop.f32.mrb[127].mxu1 }
 0x245   :  { %v9053_v44 = vadd.f32 %v9052_v46, %v9051_v10 }
 0x246   :  { %v11175_v59 = vadd.f32 %v9050_v34, %v7079_v58  ;;  %v7082_v20 = vadd.f32 %v8989_v29, %v11130_v56 }
 0x248   :  { %v11178_v40 = vadd.f32 %v9053_v44, %v7082_v20  ;;  %v9070_v28 = vpop.f32.mrb[128].mxu0 }
 0x249   :  { %v9071_v37 = vpop.f32.mrb[129].mxu0 }
 0x24a   :  { %v9072_v54 = vadd.f32 %v9071_v37, %v9070_v28  ;;  %v9073_v2 = vpop.f32.mrb[130].mxu0 }
 0x24b   :  { %v9074_v21 = vpop.f32.mrb[131].mxu0 }
 0x24c   :  { %v7217_v31 = vadd.f32 %v9072_v54, %v11134_v4  ;;  %v9075_v16 = vadd.f32 %v9074_v21, %v9073_v2 }
 0x24d   :  { %v9134_v60 = vpop.f32.mrb[128].mxu1 }
 0x24e   :  { %v9135_v15 = vpop.f32.mrb[129].mxu1  ;;  %v7220_v35 = vadd.f32 %v9075_v16, %v11136_v45 }
 0x24f   :  { %v9136_v1 = vadd.f32 %v9135_v15, %v9134_v60  ;;  %v9137_v6 = vpop.f32.mrb[130].mxu1 }
 0x250   :  { %v9138_v43 = vpop.f32.mrb[131].mxu1 }
 0x251   :  { %v11182_v42 = vadd.f32 %v9136_v1, %v7217_v31  ;;  %v9139_v56 = vadd.f32 %v9138_v43, %v9137_v6 }
 0x253   :  { %v11184_v36 = vadd.f32 %v9139_v56, %v7220_v35 }
 0x255   :  { %v9076_v32 = vpop.f32.mrb[132].mxu0  ;;  %v9140_v57 = vpop.f32.mrb[132].mxu1 }
 0x256   :  { %v9077_v9 = vpop.f32.mrb[133].mxu0  ;;  %v9141_v48 = vpop.f32.mrb[133].mxu1 }
 0x257   :  { %v9078_v30 = vadd.f32 %v9077_v9, %v9076_v32  ;;  %v9079_v17 = vpop.f32.mrb[134].mxu0  ;;  %v9142_v5 = vadd.f32 %v9141_v48, %v9140_v57  ;;  %v9143_v4 = vpop.f32.mrb[134].mxu1 }
 0x258   :  { %v9080_v24 = vpop.f32.mrb[135].mxu0  ;;  %v9144_v14 = vpop.f32.mrb[135].mxu1 }
 0x259   :  { %v7225_v13 = vadd.f32 %v9078_v30, %v11139_v63  ;;  %v9081_v23 = vadd.f32 %v9080_v24, %v9079_v17  ;;  %v9145_v45 = vadd.f32 %v9144_v14, %v9143_v4 }
 0x25b   :  { %v11187_v19 = vadd.f32 %v9142_v5, %v7225_v13  ;;  %v7228_v50 = vadd.f32 %v9081_v23, %v11142_v51 }
 0x25d   :  { %v11190_v7 = vadd.f32 %v9145_v45, %v7228_v50  ;;  %v9082_v41 = vpop.f32.mrb[136].mxu0  ;;  %v9146_v39 = vpop.f32.mrb[136].mxu1 }
 0x25e   :  { %v9083_v38 = vpop.f32.mrb[137].mxu0  ;;  %v9147_v3 = vpop.f32.mrb[137].mxu1 }
 0x25f   :  { %v9084_v26 = vadd.f32 %v9083_v38, %v9082_v41  ;;  %v9085_v62 = vpop.f32.mrb[138].mxu0  ;;  %v9148_v49 = vadd.f32 %v9147_v3, %v9146_v39  ;;  %v9149_v11 = vpop.f32.mrb[138].mxu1 }
 0x260   :  { %v9086_v47 = vpop.f32.mrb[139].mxu0  ;;  %v9150_v10 = vpop.f32.mrb[139].mxu1 }
 0x261   :  { %v7233_v63 = vadd.f32 %v9084_v26, %v11145_v27  ;;  %v9087_v34 = vadd.f32 %v9086_v47, %v9085_v62  ;;  %v9151_v0 = vadd.f32 %v9150_v10, %v9149_v11 }
 0x263   :  { %v11193_v58 = vadd.f32 %v9148_v49, %v7233_v63  ;;  %v7236_v51 = vadd.f32 %v9087_v34, %v11148_v55 }
 0x265   :  { %v11196_v29 = vadd.f32 %v9151_v0, %v7236_v51  ;;  %v9088_v46 = vpop.f32.mrb[140].mxu0  ;;  %v9152_v20 = vpop.f32.mrb[140].mxu1 }
 0x266   :  { %v9089_v44 = vpop.f32.mrb[141].mxu0  ;;  %v9153_v54 = vpop.f32.mrb[141].mxu1 }
 0x267   :  { %v9090_v28 = vadd.f32 %v9089_v44, %v9088_v46  ;;  %v9091_v37 = vpop.f32.mrb[142].mxu0  ;;  %v9154_v21 = vadd.f32 %v9153_v54, %v9152_v20  ;;  %v9155_v27 = vpop.f32.mrb[142].mxu1 }
 0x268   :  { %v9092_v2 = vpop.f32.mrb[143].mxu0  ;;  %v9156_v15 = vpop.f32.mrb[143].mxu1 }
 0x269   :  { %v7241_v60 = vadd.f32 %v9090_v28, %v11151_v25  ;;  %v9093_v31 = vadd.f32 %v9092_v2, %v9091_v37  ;;  %v9157_v55 = vadd.f32 %v9156_v15, %v9155_v27 }
 0x26b   :  { %v11199_v16 = vadd.f32 %v9154_v21, %v7241_v60  ;;  %v7244_v1 = vadd.f32 %v9093_v31, %v11154_v53 }
 0x26d   :  { %v11202_v6 = vadd.f32 %v9157_v55, %v7244_v1  ;;  %v9094_v35 = vpop.f32.mrb[144].mxu0  ;;  %v9158_v43 = vpop.f32.mrb[144].mxu1 }
 0x26e   :  { %v9095_v56 = vpop.f32.mrb[145].mxu0  ;;  %v9159_v57 = vpop.f32.mrb[145].mxu1 }
 0x26f   :  { %v9096_v32 = vadd.f32 %v9095_v56, %v9094_v35  ;;  %v9097_v9 = vpop.f32.mrb[146].mxu0  ;;  %v9160_v30 = vadd.f32 %v9159_v57, %v9158_v43  ;;  %v9161_v48 = vpop.f32.mrb[146].mxu1 }
 0x270   :  { %v9098_v25 = vpop.f32.mrb[147].mxu0  ;;  %v9162_v4 = vpop.f32.mrb[147].mxu1 }
 0x271   :  { %v7249_v17 = vadd.f32 %v9096_v32, %v11157_v22  ;;  %v9099_v5 = vadd.f32 %v9098_v25, %v9097_v9  ;;  %v9163_v24 = vadd.f32 %v9162_v4, %v9161_v48 }
 0x273   :  { %v11205_v13 = vadd.f32 %v9160_v30, %v7249_v17  ;;  %v7252_v53 = vadd.f32 %v9099_v5, %v11160_v8 }
 0x275   :  { %v11208_v23 = vadd.f32 %v9163_v24, %v7252_v53  ;;  %v9100_v14 = vpop.f32.mrb[148].mxu0  ;;  %v9164_v45 = vpop.f32.mrb[148].mxu1 }
 0x276   :  { %v9101_v50 = vpop.f32.mrb[149].mxu0  ;;  %v9165_v39 = vpop.f32.mrb[149].mxu1 }
 0x277   :  { %v9102_v41 = vadd.f32 %v9101_v50, %v9100_v14  ;;  %v9103_v38 = vpop.f32.mrb[150].mxu0  ;;  %v9166_v26 = vadd.f32 %v9165_v39, %v9164_v45  ;;  %v9167_v3 = vpop.f32.mrb[150].mxu1 }
 0x278   :  { %v9104_v62 = vpop.f32.mrb[151].mxu0  ;;  %v9168_v11 = vpop.f32.mrb[151].mxu1 }
 0x279   :  { %v7257_v22 = vadd.f32 %v9102_v41, %v11163_v61  ;;  %v9105_v49 = vadd.f32 %v9104_v62, %v9103_v38  ;;  %v9169_v47 = vadd.f32 %v9168_v11, %v9167_v3 }
 0x27b   :  { %v11211_v63 = vadd.f32 %v9166_v26, %v7257_v22  ;;  %v7260_v8 = vadd.f32 %v9105_v49, %v11166_v52 }
 0x27d   :  { %v11214_v34 = vadd.f32 %v9169_v47, %v7260_v8  ;;  %v9106_v10 = vpop.f32.mrb[152].mxu0  ;;  %v9170_v51 = vpop.f32.mrb[152].mxu1 }
 0x27e   :  { %v9107_v0 = vpop.f32.mrb[153].mxu0  ;;  %v9171_v20 = vpop.f32.mrb[153].mxu1 }
 0x27f   :  { %v9108_v46 = vadd.f32 %v9107_v0, %v9106_v10  ;;  %v9109_v44 = vpop.f32.mrb[154].mxu0  ;;  %v9172_v54 = vadd.f32 %v9171_v20, %v9170_v51  ;;  %v9173_v61 = vpop.f32.mrb[154].mxu1 }
 0x280   :  { %v9110_v28 = vpop.f32.mrb[155].mxu0  ;;  %v9174_v60 = vpop.f32.mrb[155].mxu1 }
 0x281   :  { %v7265_v37 = vadd.f32 %v9108_v46, %v11169_v12  ;;  %v9111_v2 = vadd.f32 %v9110_v28, %v9109_v44  ;;  %v9175_v52 = vadd.f32 %v9174_v60, %v9173_v61 }
 0x283   :  { %v11217_v21 = vadd.f32 %v9172_v54, %v7265_v37  ;;  %v7268_v27 = vadd.f32 %v9111_v2, %v11172_v18 }
 0x285   :  { %v11220_v31 = vadd.f32 %v9175_v52, %v7268_v27  ;;  %v9112_v15 = vpop.f32.mrb[156].mxu0  ;;  %v9176_v1 = vpop.f32.mrb[156].mxu1 }
 0x286   :  { %v9113_v55 = vpop.f32.mrb[157].mxu0  ;;  %v9177_v43 = vpop.f32.mrb[157].mxu1 }
 0x287   :  { %v9114_v35 = vadd.f32 %v9113_v55, %v9112_v15  ;;  %v9115_v56 = vpop.f32.mrb[158].mxu0  ;;  %v9178_v32 = vadd.f32 %v9177_v43, %v9176_v1  ;;  %v9179_v57 = vpop.f32.mrb[158].mxu1 }
 0x288   :  { %v9116_v12 = vpop.f32.mrb[159].mxu0  ;;  %v9180_v48 = vpop.f32.mrb[159].mxu1 }
 0x289   :  { %v7273_v9 = vadd.f32 %v9114_v35, %v11175_v59  ;;  %v9117_v30 = vadd.f32 %v9116_v12, %v9115_v56  ;;  %v9181_v25 = vadd.f32 %v9180_v48, %v9179_v57 }
 0x28b   :  { %v11223_v17 = vadd.f32 %v9178_v32, %v7273_v9  ;;  %v7276_v18 = vadd.f32 %v9117_v30, %v11178_v40 }
 0x28d   :  { %v11226_v5 = vadd.f32 %v9181_v25, %v7276_v18  ;;  %v9198_v4 = vpop.f32.mrb[160].mxu0  ;;  %v9262_v53 = vpop.f32.mrb[160].mxu1 }
 0x28e   :  { %v9199_v24 = vpop.f32.mrb[161].mxu0  ;;  %v9263_v50 = vpop.f32.mrb[161].mxu1 }
 0x28f   :  { %v9200_v14 = vadd.f32 %v9199_v24, %v9198_v4  ;;  %v9201_v45 = vpop.f32.mrb[162].mxu0  ;;  %v9264_v38 = vadd.f32 %v9263_v50, %v9262_v53  ;;  %v9265_v59 = vpop.f32.mrb[162].mxu1 }
 0x290   :  { %v9202_v41 = vpop.f32.mrb[163].mxu0  ;;  %v9266_v3 = vpop.f32.mrb[163].mxu1 }
 0x291   :  { %v7411_v39 = vadd.f32 %v9200_v14, %v11182_v42  ;;  %v9203_v26 = vadd.f32 %v9202_v41, %v9201_v45  ;;  %v9267_v49 = vadd.f32 %v9266_v3, %v9265_v59 }
 0x293   :  { %v7508_v62 = vadd.f32 %v9264_v38, %v7411_v39  ;;  %v7414_v22 = vadd.f32 %v9203_v26, %v11184_v36 }
 0x295   :  { %v7570_v40 = vmax.f32 %v7508_v62, 0.0  ;;  %v7511_v11 = vadd.f32 %v9267_v49, %v7414_v22  ;;  %v9204_v47 = vpop.f32.mrb[164].mxu0  ;;  %v9268_v0 = vpop.f32.mrb[164].mxu1 }
 0x296   :  { %v9205_v8 = vpop.f32.mrb[165].mxu0  ;;  %v9269_v44 = vpop.f32.mrb[165].mxu1 }
 0x297   :  { %v7571_v10 = vmax.f32 %v7511_v11, 0.0  ;;  %v9206_v51 = vadd.f32 %v9205_v8, %v9204_v47  ;;  %v9207_v46 = vpop.f32.mrb[166].mxu0  ;;  %9374 = vmatprep.mubr.f32.mxu0 %v7570_v40  ;;  %v9270_v28 = vadd.f32 %v9269_v44, %v9268_v0  ;;  %v9271_v37 = vpop.f32.mrb[166].mxu1 }
 0x298   :  { %v9208_v20 = vpop.f32.mrb[167].mxu0  ;;  %v9272_v61 = vpop.f32.mrb[167].mxu1 }
 0x299   :  { %v7419_v42 = vadd.f32 %v9206_v51, %v11187_v19  ;;  %v9209_v54 = vadd.f32 %v9208_v20, %v9207_v46  ;;  %9375 = vmatmul.mubr.f32.vlgmr.msra.gmra.mrb[192].mxu0 %v7571_v10  ;;  %v9273_v60 = vadd.f32 %v9272_v61, %v9271_v37 }
 0x29b   :  { %v7516_v36 = vadd.f32 %v9270_v28, %v7419_v42  ;;  %v7422_v2 = vadd.f32 %v9209_v54, %v11190_v7 }
 0x29d   :  { %v7572_v27 = vmax.f32 %v7516_v36, 0.0  ;;  %v7519_v52 = vadd.f32 %v9273_v60, %v7422_v2  ;;  %v9210_v15 = vpop.f32.mrb[168].mxu0  ;;  %v9274_v35 = vpop.f32.mrb[168].mxu1 }
 0x29e   :  { %v9211_v1 = vpop.f32.mrb[169].mxu0  ;;  %v9275_v32 = vpop.f32.mrb[169].mxu1 }
 0x29f   :  { %v7573_v55 = vmax.f32 %v7519_v52, 0.0  ;;  %v9212_v43 = vadd.f32 %v9211_v1, %v9210_v15  ;;  %v9213_v56 = vpop.f32.mrb[170].mxu0  ;;  %9377 = vmatprep.mubr.f32.mxu0 %v7572_v27  ;;  %v9276_v12 = vadd.f32 %v9275_v32, %v9274_v35  ;;  %v9277_v9 = vpop.f32.mrb[170].mxu1 }
 0x2a0   :  { %v9214_v19 = vpop.f32.mrb[171].mxu0  ;;  %v9278_v48 = vpop.f32.mrb[171].mxu1 }
 0x2a1   :  { %v7427_v57 = vadd.f32 %v9212_v43, %v11193_v58  ;;  %v9215_v30 = vadd.f32 %v9214_v19, %v9213_v56  ;;  %9378 = vmatmul.mubr.f32.gmra.mrb[194].mxu0 %v7573_v55  ;;  %v9279_v18 = vadd.f32 %v9278_v48, %v9277_v9 }
 0x2a3   :  { %v7524_v7 = vadd.f32 %v9276_v12, %v7427_v57  ;;  %v7430_v25 = vadd.f32 %v9215_v30, %v11196_v29 }
 0x2a5   :  { %v7574_v4 = vmax.f32 %v7524_v7, 0.0  ;;  %v7527_v24 = vadd.f32 %v9279_v18, %v7430_v25  ;;  %v9216_v53 = vpop.f32.mrb[172].mxu0  ;;  %v9280_v50 = vpop.f32.mrb[172].mxu1 }
 0x2a6   :  { %v9217_v14 = vpop.f32.mrb[173].mxu0  ;;  %v9281_v38 = vpop.f32.mrb[173].mxu1 }
 0x2a7   :  { %v7575_v45 = vmax.f32 %v7527_v24, 0.0  ;;  %v9218_v41 = vadd.f32 %v9217_v14, %v9216_v53  ;;  %v9219_v39 = vpop.f32.mrb[174].mxu0  ;;  %9380 = vmatprep.mubr.f32.mxu0 %v7574_v4  ;;  %v9282_v26 = vadd.f32 %v9281_v38, %v9280_v50  ;;  %v9283_v3 = vpop.f32.mrb[174].mxu1 }
 0x2a8   :  { %v9220_v58 = vpop.f32.mrb[175].mxu0  ;;  %v9284_v22 = vpop.f32.mrb[175].mxu1 }
 0x2a9   :  { %v7435_v59 = vadd.f32 %v9218_v41, %v11199_v16  ;;  %v9221_v62 = vadd.f32 %v9220_v58, %v9219_v39  ;;  %9381 = vmatmul.mubr.f32.gmra.mrb[196].mxu0 %v7575_v45  ;;  %v9285_v40 = vadd.f32 %v9284_v22, %v9283_v3 }
 0x2ab   :  { %v7532_v29 = vadd.f32 %v9282_v26, %v7435_v59  ;;  %v7438_v49 = vadd.f32 %v9221_v62, %v11202_v6 }
 0x2ad   :  { %v7576_v11 = vmax.f32 %v7532_v29, 0.0  ;;  %v7535_v47 = vadd.f32 %v9285_v40, %v7438_v49  ;;  %v9222_v8 = vpop.f32.mrb[176].mxu0  ;;  %v9286_v51 = vpop.f32.mrb[176].mxu1 }
 0x2ae   :  { %v9223_v10 = vpop.f32.mrb[177].mxu0  ;;  %v9287_v20 = vpop.f32.mrb[177].mxu1 }
 0x2af   :  { %v7577_v0 = vmax.f32 %v7535_v47, 0.0  ;;  %v9224_v46 = vadd.f32 %v9223_v10, %v9222_v8  ;;  %v9225_v44 = vpop.f32.mrb[178].mxu0  ;;  %9383 = vmatprep.mubr.f32.mxu0 %v7576_v11  ;;  %v9288_v28 = vadd.f32 %v9287_v20, %v9286_v51  ;;  %v9289_v37 = vpop.f32.mrb[178].mxu1 }
 0x2b0   :  { %v9226_v16 = vpop.f32.mrb[179].mxu0  ;;  %v9290_v61 = vpop.f32.mrb[179].mxu1 }
 0x2b1   :  { %v7443_v42 = vadd.f32 %v9224_v46, %v11205_v13  ;;  %v9227_v54 = vadd.f32 %v9226_v16, %v9225_v44  ;;  %9384 = vmatmul.mubr.f32.gmra.mrb[198].mxu0 %v7577_v0  ;;  %v9291_v2 = vadd.f32 %v9290_v61, %v9289_v37  ;;  %v10332_v61 = vmov 1966171168  }
 0x2b3   :  { %v7540_v6 = vadd.f32 %v9288_v28, %v7443_v42  ;;  %v7446_v36 = vadd.f32 %v9227_v54, %v11208_v23 }
 0x2b5   :  { %v7578_v60 = vmax.f32 %v7540_v6, 0.0  ;;  %v7543_v27 = vadd.f32 %v9291_v2, %v7446_v36  ;;  %v9228_v52 = vpop.f32.mrb[180].mxu0  ;;  %v9292_v55 = vpop.f32.mrb[180].mxu1  ;;  %v7772_v6 = vunpack.c.l.s4 %v10332_v61 }
 0x2b6   :  { %v9229_v15 = vpop.f32.mrb[181].mxu0  ;;  %v9293_v56 = vpop.f32.mrb[181].mxu1 }
 0x2b7   :  { %v7579_v1 = vmax.f32 %v7543_v27, 0.0  ;;  %v9230_v35 = vadd.f32 %v9229_v15, %v9228_v52  ;;  %v9231_v43 = vpop.f32.mrb[182].mxu0  ;;  %9386 = vmatprep.mubr.f32.mxu1 %v7578_v60  ;;  %v9294_v19 = vadd.f32 %v9293_v56, %v9292_v55  ;;  %v9295_v57 = vpop.f32.mrb[182].mxu1  ;;  %v7773_v36 = vunpack.c.0.s8 %v7772_v6 }
 0x2b8   :  { %v9232_v13 = vpop.f32.mrb[183].mxu0  ;;  %v9296_v9 = vpop.f32.mrb[183].mxu1 }
 0x2b9   :  { %v7451_v32 = vadd.f32 %v9230_v35, %v11211_v63  ;;  %v9233_v12 = vadd.f32 %v9232_v13, %v9231_v43  ;;  %9387 = vmatmul.mubr.f32.vlgmr.msra.gmra.mrb[192].mxu1 %v7579_v1  ;;  %v9297_v48 = vadd.f32 %v9296_v9, %v9295_v57  ;;  %v11251_v27 = vsub.s32 %v7773_v36, %v10402_v33 }
 0x2bb   :  { %v7548_v23 = vadd.f32 %v9294_v19, %v7451_v32  ;;  %v7454_v30 = vadd.f32 %v9233_v12, %v11214_v34 }
 0x2bd   :  { %v7580_v7 = vmax.f32 %v7548_v23, 0.0  ;;  %v7551_v25 = vadd.f32 %v9297_v48, %v7454_v30  ;;  %v9234_v18 = vpop.f32.mrb[184].mxu0  ;;  %v9298_v53 = vpop.f32.mrb[184].mxu1 }
 0x2be   :  { %v9235_v4 = vpop.f32.mrb[185].mxu0  ;;  %v9299_v50 = vpop.f32.mrb[185].mxu1 }
 0x2bf   :  { %v7581_v24 = vmax.f32 %v7551_v25, 0.0  ;;  %v9236_v14 = vadd.f32 %v9235_v4, %v9234_v18  ;;  %v9237_v45 = vpop.f32.mrb[186].mxu0  ;;  %9389 = vmatprep.mubr.f32.mxu1 %v7580_v7  ;;  %v9300_v39 = vadd.f32 %v9299_v50, %v9298_v53  ;;  %v9301_v38 = vpop.f32.mrb[186].mxu1 }
 0x2c0   :  { %v9238_v63 = vpop.f32.mrb[187].mxu0  ;;  %v9302_v59 = vpop.f32.mrb[187].mxu1 }
 0x2c1   :  { %v7459_v41 = vadd.f32 %v9236_v14, %v11217_v21  ;;  %v9239_v58 = vadd.f32 %v9238_v63, %v9237_v45  ;;  %9390 = vmatmul.mubr.f32.gmra.mrb[194].mxu1 %v7581_v24  ;;  %v9303_v3 = vadd.f32 %v9302_v59, %v9301_v38 }
 0x2c3   :  { %v7556_v34 = vadd.f32 %v9300_v39, %v7459_v41  ;;  %v7462_v26 = vadd.f32 %v9239_v58, %v11220_v31 }
 0x2c5   :  { %v7582_v62 = vmax.f32 %v7556_v34, 0.0  ;;  %v7559_v22 = vadd.f32 %v9303_v3, %v7462_v26  ;;  %v9240_v29 = vpop.f32.mrb[188].mxu0  ;;  %v9304_v11 = vpop.f32.mrb[188].mxu1 }
 0x2c6   :  { %v9241_v49 = vpop.f32.mrb[189].mxu0  ;;  %v9305_v10 = vpop.f32.mrb[189].mxu1 }
 0x2c7   :  { %v7583_v40 = vmax.f32 %v7559_v22, 0.0  ;;  %v9242_v47 = vadd.f32 %v9241_v49, %v9240_v29  ;;  %v9243_v8 = vpop.f32.mrb[190].mxu0  ;;  %9392 = vmatprep.mubr.f32.mxu1 %v7582_v62  ;;  %v9306_v51 = vadd.f32 %v9305_v10, %v9304_v11  ;;  %v9307_v46 = vpop.f32.mrb[190].mxu1 }
 0x2c8   :  { %v9244_v21 = vpop.f32.mrb[191].mxu0  ;;  %v9308_v20 = vpop.f32.mrb[191].mxu1 }
 0x2c9   :  { %v7467_v0 = vadd.f32 %v9242_v47, %v11223_v17  ;;  %v9245_v44 = vadd.f32 %v9244_v21, %v9243_v8  ;;  %9393 = vmatmul.mubr.f32.gmra.mrb[196].mxu1 %v7583_v40  ;;  %v9309_v42 = vadd.f32 %v9308_v20, %v9307_v46  ;;  %v11247_v17 = vld [vmem:[%s11332_s4] ss:$0 sm:$0xff] }
 0x2cb   :  { %v7564_v31 = vadd.f32 %v9306_v51, %v7467_v0  ;;  %v7470_v16 = vadd.f32 %v9245_v44, %v11226_v5 }
 0x2cd   :  { %v7584_v28 = vmax.f32 %v7564_v31, 0.0  ;;  %v7567_v37 = vadd.f32 %v9309_v42, %v7470_v16 }
 0x2cf   :  { %v7585_v54 = vmax.f32 %v7567_v37, 0.0  ;;  %9395 = vmatprep.mubr.f32.mxu1 %v7584_v28 }
 0x2d1   :  { %9396 = vmatmul.mubr.f32.gmra.mrb[198].mxu1 %v7585_v54 }
 0x36c   :  { %v9376_v2 = vpop.f32.mrb[192].mxu0 }
 0x36d   :  { %v7681_v60 = vadd.f32 %v9376_v2, %v11247_v17  ;;  %v7675_v5 = vpop.f32.mrb[193].mxu0 }
 0x36e   :  { %v7676_v52 = vadd.f32 %v11247_v17, %v7675_v5 }
 0x36f   :  { %v8502_v15 = vpack.c.bf16 %v7681_v60, %v7681_v60 }
 0x370   :  { %v7754_v1 = vpack.c.bf16 %v7681_v60, %v7676_v52 }
 0x371   :  { %v7784_v55 = vrot.slane %v8502_v15, %v11251_v27 }
 0x372   :  { %v7777_v35 = vrot.slane %v7754_v1, %v11251_v27 }
 0x373   :  { %v7786_v43 = vcombine.high %v7784_v55, %v7784_v55  ;;  %v7800_v56 = vrot.slane %v7784_v55, %v11251_v27  ;;  %8512 = vst.sshfl [vmem:[#allocation8 + $0x4] sm:$0x1 pattern:$0x73625140] %v7784_v55 }
 0x374   :  { %v7785_v13 = vcombine.high %v7777_v35, %v7777_v35  ;;  %v7793_v32 = vrot.slane %v7777_v35, %v11251_v27  ;;  %8510 = vst.sshfl [vmem:[#allocation8] sm:$0x1 pattern:$0x73625140] %v7777_v35  ;;  %v9379_v19 = vpop.f32.mrb[194].mxu0 }
 0x375   :  { %v7814_v33 = vrot.slane %v7786_v43, %v11251_v27  ;;  %v7816_v57 = vcombine.high %v7800_v56, %v7800_v56  ;;  %8513 = vst.sshfl [vmem:[#allocation8 + $0x5] sm:$0x1 pattern:$0x73625140] %v7786_v43  ;;  %v7691_v12 = vadd.f32 %v9379_v19, %v11247_v17  ;;  %v7685_v9 = vpop.f32.mrb[195].mxu0 }
 0x376   :  { %v7807_v23 = vrot.slane %v7785_v13, %v11251_v27  ;;  %v7815_v30 = vcombine.high %v7793_v32, %v7793_v32  ;;  %8511 = vst.sshfl [vmem:[#allocation8 + $0x1] sm:$0x1 pattern:$0x73625140] %v7785_v13  ;;  %v7686_v48 = vadd.f32 %v11247_v17, %v7685_v9 }
 0x377   :  { %v7818_v7 = vcombine.high %v7814_v33, %v7814_v33  ;;  %8232 = vst [vmem:[#allocation8 + $0x6] sm:$0x1] %v7816_v57  ;;  %v8503_v25 = vpack.c.bf16 %v7691_v12, %v7691_v12 }
 0x378   :  { %v7817_v18 = vcombine.high %v7807_v23, %v7807_v23  ;;  %8228 = vst [vmem:[#allocation8 + $0x2] sm:$0x1] %v7815_v30  ;;  %v7755_v4 = vpack.c.bf16 %v7691_v12, %v7686_v48 }
 0x379   :  { %8233 = vst [vmem:[#allocation8 + $0x7] sm:$0x1] %v7818_v7  ;;  %v7833_v24 = vrot.slane %v8503_v25, %v11251_v27 }
 0x37a   :  { %8229 = vst [vmem:[#allocation8 + $0x3] sm:$0x1] %v7817_v18  ;;  %v7826_v53 = vrot.slane %v7755_v4, %v11251_v27 }
 0x37b   :  { %v7835_v14 = vcombine.high %v7833_v24, %v7833_v24  ;;  %v7849_v45 = vrot.slane %v7833_v24, %v11251_v27  ;;  %8516 = vst.sshfl [vmem:[#allocation8 + $0xc] sm:$0x1 pattern:$0x73625140] %v7833_v24 }
 0x37c   :  { %v7834_v50 = vcombine.high %v7826_v53, %v7826_v53  ;;  %v7842_v63 = vrot.slane %v7826_v53, %v11251_v27  ;;  %8514 = vst.sshfl [vmem:[#allocation8 + $0x8] sm:$0x1 pattern:$0x73625140] %v7826_v53  ;;  %v9382_v41 = vpop.f32.mrb[196].mxu0 }
 0x37d   :  { %v7863_v39 = vrot.slane %v7835_v14, %v11251_v27  ;;  %v7865_v38 = vcombine.high %v7849_v45, %v7849_v45  ;;  %8517 = vst.sshfl [vmem:[#allocation8 + $0xd] sm:$0x1 pattern:$0x73625140] %v7835_v14  ;;  %v7701_v58 = vadd.f32 %v9382_v41, %v11247_v17  ;;  %v7695_v59 = vpop.f32.mrb[197].mxu0 }
 0x37e   :  { %v7856_v34 = vrot.slane %v7834_v50, %v11251_v27  ;;  %v7864_v26 = vcombine.high %v7842_v63, %v7842_v63  ;;  %8515 = vst.sshfl [vmem:[#allocation8 + $0x9] sm:$0x1 pattern:$0x73625140] %v7834_v50  ;;  %v7696_v3 = vadd.f32 %v11247_v17, %v7695_v59 }
 0x37f   :  { %v7867_v62 = vcombine.high %v7863_v39, %v7863_v39  ;;  %8240 = vst [vmem:[#allocation8 + $0xe] sm:$0x1] %v7865_v38  ;;  %v8504_v22 = vpack.c.bf16 %v7701_v58, %v7701_v58 }
 0x380   :  { %v7866_v29 = vcombine.high %v7856_v34, %v7856_v34  ;;  %8236 = vst [vmem:[#allocation8 + $0xa] sm:$0x1] %v7864_v26  ;;  %v7756_v49 = vpack.c.bf16 %v7701_v58, %v7696_v3 }
 0x381   :  { %8241 = vst [vmem:[#allocation8 + $0xf] sm:$0x1] %v7867_v62  ;;  %v7882_v40 = vrot.slane %v8504_v22, %v11251_v27 }
 0x382   :  { %8237 = vst [vmem:[#allocation8 + $0xb] sm:$0x1] %v7866_v29  ;;  %v7875_v11 = vrot.slane %v7756_v49, %v11251_v27 }
 0x383   :  { %v7884_v47 = vcombine.high %v7882_v40, %v7882_v40  ;;  %v7898_v8 = vrot.slane %v7882_v40, %v11251_v27  ;;  %8520 = vst.sshfl [vmem:[#allocation8 + $0x14] sm:$0x1 pattern:$0x73625140] %v7882_v40 }
 0x384   :  { %v7883_v10 = vcombine.high %v7875_v11, %v7875_v11  ;;  %v7891_v21 = vrot.slane %v7875_v11, %v11251_v27  ;;  %8518 = vst.sshfl [vmem:[#allocation8 + $0x10] sm:$0x1 pattern:$0x73625140] %v7875_v11  ;;  %v9385_v0 = vpop.f32.mrb[198].mxu0 }
 0x385   :  { %v7912_v51 = vrot.slane %v7884_v47, %v11251_v27  ;;  %v7914_v46 = vcombine.high %v7898_v8, %v7898_v8  ;;  %8521 = vst.sshfl [vmem:[#allocation8 + $0x15] sm:$0x1 pattern:$0x73625140] %v7884_v47  ;;  %v7711_v44 = vadd.f32 %v9385_v0, %v11247_v17  ;;  %v7705_v20 = vpop.f32.mrb[199].mxu0 }
 0x386   :  { %v7905_v31 = vrot.slane %v7883_v10, %v11251_v27  ;;  %v7913_v16 = vcombine.high %v7891_v21, %v7891_v21  ;;  %8519 = vst.sshfl [vmem:[#allocation8 + $0x11] sm:$0x1 pattern:$0x73625140] %v7883_v10  ;;  %v7706_v42 = vadd.f32 %v11247_v17, %v7705_v20 }
 0x387   :  { %v7916_v28 = vcombine.high %v7912_v51, %v7912_v51  ;;  %8248 = vst [vmem:[#allocation8 + $0x16] sm:$0x1] %v7914_v46  ;;  %v8505_v37 = vpack.c.bf16 %v7711_v44, %v7711_v44 }
 0x388   :  { %v7915_v54 = vcombine.high %v7905_v31, %v7905_v31  ;;  %8244 = vst [vmem:[#allocation8 + $0x12] sm:$0x1] %v7913_v16  ;;  %v7757_v61 = vpack.c.bf16 %v7711_v44, %v7706_v42 }
 0x389   :  { %8249 = vst [vmem:[#allocation8 + $0x17] sm:$0x1] %v7916_v28  ;;  %v7931_v6 = vrot.slane %v8505_v37, %v11251_v27 }
 0x38a   :  { %8245 = vst [vmem:[#allocation8 + $0x13] sm:$0x1] %v7915_v54  ;;  %v7924_v36 = vrot.slane %v7757_v61, %v11251_v27 }
 0x38b   :  { %v7933_v2 = vcombine.high %v7931_v6, %v7931_v6  ;;  %v7947_v60 = vrot.slane %v7931_v6, %v11251_v27  ;;  %8524 = vst.sshfl [vmem:[#allocation8 + $0x1c] sm:$0x1 pattern:$0x73625140] %v7931_v6 }
 0x38c   :  { %v7932_v5 = vcombine.high %v7924_v36, %v7924_v36  ;;  %v7940_v52 = vrot.slane %v7924_v36, %v11251_v27  ;;  %8522 = vst.sshfl [vmem:[#allocation8 + $0x18] sm:$0x1 pattern:$0x73625140] %v7924_v36  ;;  %v9388_v15 = vpop.f32.mrb[192].mxu1 }
 0x38d   :  { %v7961_v1 = vrot.slane %v7933_v2, %v11251_v27  ;;  %v7963_v55 = vcombine.high %v7947_v60, %v7947_v60  ;;  %8525 = vst.sshfl [vmem:[#allocation8 + $0x1d] sm:$0x1 pattern:$0x73625140] %v7933_v2  ;;  %v7721_v35 = vadd.f32 %v9388_v15, %v11247_v17  ;;  %v7715_v43 = vpop.f32.mrb[193].mxu1 }
 0x38e   :  { %v7954_v56 = vrot.slane %v7932_v5, %v11251_v27  ;;  %v7962_v13 = vcombine.high %v7940_v52, %v7940_v52  ;;  %8523 = vst.sshfl [vmem:[#allocation8 + $0x19] sm:$0x1 pattern:$0x73625140] %v7932_v5  ;;  %v7716_v32 = vadd.f32 %v11247_v17, %v7715_v43 }
 0x38f   :  { %v7965_v19 = vcombine.high %v7961_v1, %v7961_v1  ;;  %8256 = vst [vmem:[#allocation8 + $0x1e] sm:$0x1] %v7963_v55  ;;  %v8506_v33 = vpack.c.bf16 %v7721_v35, %v7721_v35 }
 0x390   :  { %v7964_v57 = vcombine.high %v7954_v56, %v7954_v56  ;;  %8252 = vst [vmem:[#allocation8 + $0x1a] sm:$0x1] %v7962_v13  ;;  %v7758_v12 = vpack.c.bf16 %v7721_v35, %v7716_v32 }
 0x391   :  { %8257 = vst [vmem:[#allocation8 + $0x1f] sm:$0x1] %v7965_v19  ;;  %v7980_v9 = vrot.slane %v8506_v33, %v11251_v27 }
 0x392   :  { %8253 = vst [vmem:[#allocation8 + $0x1b] sm:$0x1] %v7964_v57  ;;  %v7973_v23 = vrot.slane %v7758_v12, %v11251_v27 }
 0x393   :  { %v7982_v30 = vcombine.high %v7980_v9, %v7980_v9  ;;  %v7996_v48 = vrot.slane %v7980_v9, %v11251_v27  ;;  %8528 = vst.sshfl [vmem:[#allocation8 + $0x24] sm:$0x1 pattern:$0x73625140] %v7980_v9 }
 0x394   :  { %v7981_v7 = vcombine.high %v7973_v23, %v7973_v23  ;;  %v7989_v25 = vrot.slane %v7973_v23, %v11251_v27  ;;  %8526 = vst.sshfl [vmem:[#allocation8 + $0x20] sm:$0x1 pattern:$0x73625140] %v7973_v23  ;;  %v9391_v18 = vpop.f32.mrb[194].mxu1 }
 0x395   :  { %v8010_v4 = vrot.slane %v7982_v30, %v11251_v27  ;;  %v8012_v24 = vcombine.high %v7996_v48, %v7996_v48  ;;  %8529 = vst.sshfl [vmem:[#allocation8 + $0x25] sm:$0x1 pattern:$0x73625140] %v7982_v30  ;;  %v7731_v53 = vadd.f32 %v9391_v18, %v11247_v17  ;;  %v7725_v14 = vpop.f32.mrb[195].mxu1 }
 0x396   :  { %v8003_v45 = vrot.slane %v7981_v7, %v11251_v27  ;;  %v8011_v50 = vcombine.high %v7989_v25, %v7989_v25  ;;  %8527 = vst.sshfl [vmem:[#allocation8 + $0x21] sm:$0x1 pattern:$0x73625140] %v7981_v7  ;;  %v7726_v63 = vadd.f32 %v11247_v17, %v7725_v14 }
 0x397   :  { %v8014_v41 = vcombine.high %v8010_v4, %v8010_v4  ;;  %8264 = vst [vmem:[#allocation8 + $0x26] sm:$0x1] %v8012_v24  ;;  %v8507_v39 = vpack.c.bf16 %v7731_v53, %v7731_v53 }
 0x398   :  { %v8013_v38 = vcombine.high %v8003_v45, %v8003_v45  ;;  %8260 = vst [vmem:[#allocation8 + $0x22] sm:$0x1] %v8011_v50  ;;  %v7759_v58 = vpack.c.bf16 %v7731_v53, %v7726_v63 }
 0x399   :  { %8265 = vst [vmem:[#allocation8 + $0x27] sm:$0x1] %v8014_v41  ;;  %v8029_v59 = vrot.slane %v8507_v39, %v11251_v27 }
 0x39a   :  { %8261 = vst [vmem:[#allocation8 + $0x23] sm:$0x1] %v8013_v38  ;;  %v8022_v34 = vrot.slane %v7759_v58, %v11251_v27 }
 0x39b   :  { %v8031_v26 = vcombine.high %v8029_v59, %v8029_v59  ;;  %v8045_v3 = vrot.slane %v8029_v59, %v11251_v27  ;;  %8532 = vst.sshfl [vmem:[#allocation8 + $0x2c] sm:$0x1 pattern:$0x73625140] %v8029_v59 }
 0x39c   :  { %v8030_v62 = vcombine.high %v8022_v34, %v8022_v34  ;;  %v8038_v22 = vrot.slane %v8022_v34, %v11251_v27  ;;  %8530 = vst.sshfl [vmem:[#allocation8 + $0x28] sm:$0x1 pattern:$0x73625140] %v8022_v34  ;;  %v9394_v29 = vpop.f32.mrb[196].mxu1 }
 0x39d   :  { %v8059_v49 = vrot.slane %v8031_v26, %v11251_v27  ;;  %v8061_v40 = vcombine.high %v8045_v3, %v8045_v3  ;;  %8533 = vst.sshfl [vmem:[#allocation8 + $0x2d] sm:$0x1 pattern:$0x73625140] %v8031_v26  ;;  %v7741_v11 = vadd.f32 %v9394_v29, %v11247_v17  ;;  %v7735_v47 = vpop.f32.mrb[197].mxu1 }
 0x39e   :  { %v8052_v8 = vrot.slane %v8030_v62, %v11251_v27  ;;  %v8060_v10 = vcombine.high %v8038_v22, %v8038_v22  ;;  %8531 = vst.sshfl [vmem:[#allocation8 + $0x29] sm:$0x1 pattern:$0x73625140] %v8030_v62  ;;  %v7736_v21 = vadd.f32 %v11247_v17, %v7735_v47 }
 0x39f   :  { %v8063_v0 = vcombine.high %v8059_v49, %v8059_v49  ;;  %8272 = vst [vmem:[#allocation8 + $0x2e] sm:$0x1] %v8061_v40  ;;  %v8508_v51 = vpack.c.bf16 %v7741_v11, %v7741_v11 }
 0x3a0   :  { %v8062_v46 = vcombine.high %v8052_v8, %v8052_v8  ;;  %8268 = vst [vmem:[#allocation8 + $0x2a] sm:$0x1] %v8060_v10  ;;  %v7760_v44 = vpack.c.bf16 %v7741_v11, %v7736_v21 }
 0x3a1   :  { %8273 = vst [vmem:[#allocation8 + $0x2f] sm:$0x1] %v8063_v0  ;;  %v8078_v20 = vrot.slane %v8508_v51, %v11251_v27 }
 0x3a2   :  { %8269 = vst [vmem:[#allocation8 + $0x2b] sm:$0x1] %v8062_v46  ;;  %v8071_v31 = vrot.slane %v7760_v44, %v11251_v27 }
 0x3a3   :  { %v8080_v16 = vcombine.high %v8078_v20, %v8078_v20  ;;  %v8094_v42 = vrot.slane %v8078_v20, %v11251_v27  ;;  %8536 = vst.sshfl [vmem:[#allocation8 + $0x34] sm:$0x1 pattern:$0x73625140] %v8078_v20 }
 0x3a4   :  { %v8079_v28 = vcombine.high %v8071_v31, %v8071_v31  ;;  %v8087_v37 = vrot.slane %v8071_v31, %v11251_v27  ;;  %8534 = vst.sshfl [vmem:[#allocation8 + $0x30] sm:$0x1 pattern:$0x73625140] %v8071_v31  ;;  %v9397_v54 = vpop.f32.mrb[198].mxu1 }
 0x3a5   :  { %v8108_v61 = vrot.slane %v8080_v16, %v11251_v27  ;;  %v8110_v6 = vcombine.high %v8094_v42, %v8094_v42  ;;  %8537 = vst.sshfl [vmem:[#allocation8 + $0x35] sm:$0x1 pattern:$0x73625140] %v8080_v16  ;;  %v7751_v36 = vadd.f32 %v9397_v54, %v11247_v17  ;;  %v7745_v2 = vpop.f32.mrb[199].mxu1 }
 0x3a6   :  { %v8101_v60 = vrot.slane %v8079_v28, %v11251_v27  ;;  %v8109_v5 = vcombine.high %v8087_v37, %v8087_v37  ;;  %8535 = vst.sshfl [vmem:[#allocation8 + $0x31] sm:$0x1 pattern:$0x73625140] %v8079_v28  ;;  %v7746_v52 = vadd.f32 %v11247_v17, %v7745_v2 }
 0x3a7   :  { %v8112_v15 = vcombine.high %v8108_v61, %v8108_v61  ;;  %8280 = vst [vmem:[#allocation8 + $0x36] sm:$0x1] %v8110_v6  ;;  %v8509_v1 = vpack.c.bf16 %v7751_v36, %v7751_v36 }
 0x3a8   :  { %v8111_v55 = vcombine.high %v8101_v60, %v8101_v60  ;;  %8276 = vst [vmem:[#allocation8 + $0x32] sm:$0x1] %v8109_v5  ;;  %v7761_v35 = vpack.c.bf16 %v7751_v36, %v7746_v52 }
 0x3a9   :  { %8281 = vst [vmem:[#allocation8 + $0x37] sm:$0x1] %v8112_v15  ;;  %v8127_v43 = vrot.slane %v8509_v1, %v11251_v27 }
 0x3aa   :  { %8277 = vst [vmem:[#allocation8 + $0x33] sm:$0x1] %v8111_v55  ;;  %v8120_v56 = vrot.slane %v7761_v35, %v11251_v27 }
 0x3ab   :  { %v8129_v13 = vcombine.high %v8127_v43, %v8127_v43  ;;  %v8143_v32 = vrot.slane %v8127_v43, %v11251_v27  ;;  %8540 = vst.sshfl [vmem:[#allocation8 + $0x3c] sm:$0x1 pattern:$0x73625140] %v8127_v43 }
 0x3ac   :  { %v8128_v19 = vcombine.high %v8120_v56, %v8120_v56  ;;  %v8136_v33 = vrot.slane %v8120_v56, %v11251_v27  ;;  %8538 = vst.sshfl [vmem:[#allocation8 + $0x38] sm:$0x1 pattern:$0x73625140] %v8120_v56 }
 0x3ad   :  { %v8157_v17 = vrot.slane %v8129_v13, %v11251_v27  ;;  %v8159_v57 = vcombine.high %v8143_v32, %v8143_v32  ;;  %8541 = vst.sshfl [vmem:[#allocation8 + $0x3d] sm:$0x1 pattern:$0x73625140] %v8129_v13 }
 0x3ae   :  { %v8150_v12 = vrot.slane %v8128_v19, %v11251_v27  ;;  %v8158_v9 = vcombine.high %v8136_v33, %v8136_v33  ;;  %8539 = vst.sshfl [vmem:[#allocation8 + $0x39] sm:$0x1 pattern:$0x73625140] %v8128_v19 }
 0x3af   :  { %v8161_v23 = vcombine.high %v8157_v17, %v8157_v17  ;;  %8288 = vst [vmem:[#allocation8 + $0x3e] sm:$0x1] %v8159_v57 }
 0x3b0   :  { %v8160_v30 = vcombine.high %v8150_v12, %v8150_v12  ;;  %8284 = vst [vmem:[#allocation8 + $0x3a] sm:$0x1] %v8158_v9 }
 0x3b1   :  { %8289 = vst [vmem:[#allocation8 + $0x3f] sm:$0x1] %v8161_v23 }
 0x3b2   :  { %8285 = vst [vmem:[#allocation8 + $0x3b] sm:$0x1] %v8160_v30 }
 0x3b3   :  { %8294 = vsyncadd [#allocation4], 1008  ;;  %s10333_s4 = smov [#allocation8]  }
 0x3b4   :  { %s8295_s11 = sshll.u32 %s10333_s4, 4  ;;  %s8296_s11 = int_to_ptr.vmem [resolvable:$true] %s8295_s11 }
 0x3b5   :  { %s10294_s12 = scalar_lea.vmem %s8296_s11, 16  ;;  %s10298_s13 = scalar_lea.vmem %s8296_s11, 1024 }
 0x3b6   :  { %p10295_p10 = scmp.ne.s32.totalorder %s8296_s11, %s10294_s12  ;;  %p10299_p11 = scmp.lt.s32.totalorder %s8296_s11, %s8296_s11 }
 0x3b7   :  { %p10300_p12 = scmp.lt.s32.totalorder %s10298_s13, %s10294_s12 }
 0x3b9   :  { %p10301_p13 = por %p10300_p12, %p10299_p11 }
 0x3bb   :  { %p10302_p0 = pnand %p10301_p13, %p10295_p10 }
 0x3bd   :  { %10305 = shalt.err (!%p10302_p0)
}
 0x3be   :  { %s10306_s16 = scalar_lea.hbm %s11333_s5, 16 }
 0x3bf   :  { %p10307_p1 = scmp.ne.s32.totalorder %s11333_s5, %s10306_s16  ;;  %p10310_p2 = scmp.lt.u32.totalorder %s10306_s16, %s11333_s5 }
 0x3c1   :  { %p10312_p3 = pnand %p10310_p2, %p10307_p1 }
 0x3c3   :  { %10315 = shalt.err (!%p10312_p3)
}
 0x3c4   :  { %s10334_s20 = smov 16   ;;  %s10335_s21 = smov 1  }
 0x3c5   :  { %8301 = dma.vmem_to_hbm [thread:$0]  %s8296_s11, 16, %s11333_s5, [#allocation4], %s10334_s20, %s10334_s20, %s10335_s21  }
 0x3c6   :  { %10320 = dma.done.wait [#allocation4], 1024  }
 0x3c7   :  { %10321 = vsyncadd [#allocation4], 4294966272 }
 0x3c8   :  { %8305 = vsyncpa [#allocation3], 1 }
 0x3c9   :  { %8306 = vsyncpa [#allocation6], 1 }
 0x3ca   :  { %8307 = vsyncpa [#allocation4], 1 }

</bundles_post_ra>
